<compile_context>
chip_gen: v5e
topology: v5e:2x2
jax: 0.10.0
libtpu: 0.0.40
codegen_flags: <defaults>
</compile_context>

<pallas_src>
import functools

import jax
import jax.numpy as jnp
from jax.experimental import pallas as pl
from jax.experimental.pallas import tpu as pltpu


def _round_up(x, m):
    return (x + m - 1) // m * m


# ---------------------------------------------------------------------------
# 1x1 conv + BN + LeakyReLU  (pure matmul path)
# ---------------------------------------------------------------------------
def _conv_1x1(x_nhwc, w_oihw, scale, bias, out_dtype=jnp.bfloat16):
    N, H, W, Cin = x_nhwc.shape
    Cout = w_oihw.shape[0]
    M = N * H * W
    x2 = x_nhwc.reshape(M, Cin).astype(jnp.bfloat16)

    Cout_p = _round_up(Cout, 128)
    TN = 256 if (Cout_p % 256 == 0) else 128
    if M >= 512:
        TM = 512
    elif M >= 256:
        TM = 256
    else:
        TM = _round_up(M, 8)
    M_p = pl.cdiv(M, TM) * TM
    if M_p != M:
        x2 = jnp.pad(x2, ((0, M_p - M), (0, 0)))

    w = jnp.transpose(w_oihw.reshape(Cout, Cin), (1, 0)).astype(jnp.bfloat16)
    w = jnp.pad(w, ((0, 0), (0, Cout_p - Cout)))
    sc = jnp.pad(scale.reshape(1, -1), ((0, 0), (0, Cout_p - Cout))).astype(jnp.float32)
    bi = jnp.pad(bias.reshape(1, -1), ((0, 0), (0, Cout_p - Cout))).astype(jnp.float32)

    def kernel(x_ref, w_ref, s_ref, b_ref, o_ref):
        acc = jnp.dot(x_ref[...], w_ref[...], preferred_element_type=jnp.float32)
        y = acc * s_ref[...] + b_ref[...]
        o_ref[...] = jnp.where(y > 0, y, 0.01 * y).astype(o_ref.dtype)

    out = pl.pallas_call(
        kernel,
        out_shape=jax.ShapeDtypeStruct((M_p, Cout_p), out_dtype),
        grid_spec=pltpu.PrefetchScalarGridSpec(
            num_scalar_prefetch=0,
            grid=(Cout_p // TN, M_p // TM),      # cout tiles outer -> weight block reused
            in_specs=[
                pl.BlockSpec((TM, Cin), lambda j, i: (i, 0)),
                pl.BlockSpec((Cin, TN), lambda j, i: (0, j)),
                pl.BlockSpec((1, TN), lambda j, i: (0, j)),
                pl.BlockSpec((1, TN), lambda j, i: (0, j)),
            ],
            out_specs=pl.BlockSpec((TM, TN), lambda j, i: (i, j)),
        ),
        compiler_params=pltpu.CompilerParams(
            dimension_semantics=("parallel", "parallel"),
            vmem_limit_bytes=64 * 1024 * 1024),
    )(x2, w, sc, bi)

    return out[:M, :Cout].reshape(N, H, W, Cout)


# ---------------------------------------------------------------------------
# kxk conv + BN + LeakyReLU  (row-tap path, k=3, stride 1 or 2)
# ---------------------------------------------------------------------------
def _build_row_taps(x_nhwc, k, s, p, Ho, Wo):
    """Build (xrow, offs): xrow[kh, r] is the padded input row feeding output row r
    at vertical tap kh; offs[kw] is the static column offset of horizontal tap kw
    inside xrow's width, so the kernel only needs unit-stride slices."""
    N, H, W, C = x_nhwc.shape
    xp = jnp.pad(x_nhwc, ((0, 0), (p, p), (p, p), (0, 0)))
    Wp = W + 2 * p
    taps = [xp[:, kh: kh + (Ho - 1) * s + 1: s, :, :] for kh in range(k)]
    xr = jnp.stack(taps, axis=0).reshape(k, N * Ho, Wp, C)
    if s == 1:
        return xr, list(range(k))
    assert s == 2, "only stride 1 / 2 occur in Darknet53"
    # split even / odd padded columns so all kw taps become unit-stride slices
    xe = xr[:, :, 0::2, :]
    xo = xr[:, :, 1::2, :]
    ne = xe.shape[2]
    xrow = jnp.concatenate([xe, xo], axis=2)
    offs = [(kw // 2) if kw % 2 == 0 else ne + kw // 2 for kw in range(k)]
    return xrow, offs


def _conv_kxk(x_nhwc, w_oihw, scale, bias, stride, padding, out_dtype=jnp.bfloat16):
    N, H, W, Cin = x_nhwc.shape
    Cout = w_oihw.shape[0]
    k = w_oihw.shape[2]
    Ho = (H + 2 * padding - k) // stride + 1
    Wo = (W + 2 * padding - k) // stride + 1

    xrow, offs = _build_row_taps(x_nhwc.astype(jnp.bfloat16), k, stride, padding, Ho, Wo)
    _, R, Wcat, _ = xrow.shape

    Cout_p = _round_up(Cout, 128)
    TN = 256 if (Cout_p % 256 == 0) else 128

    w = jnp.transpose(w_oihw, (2, 3, 1, 0)).astype(jnp.bfloat16)      # (kh, kw, Cin, Cout)
    w = jnp.pad(w, ((0, 0), (0, 0), (0, 0), (0, Cout_p - Cout)))
    sc = jnp.pad(scale.reshape(1, -1), ((0, 0), (0, Cout_p - Cout))).astype(jnp.float32)
    bi = jnp.pad(bias.reshape(1, -1), ((0, 0), (0, Cout_p - Cout))).astype(jnp.float32)

    # TH output image-rows per grid step (TH | R, bounded unroll).
    TH = min(R, 8, max(1, 256 // Wo))
    while R % TH:
        TH -= 1

    def kernel(x_ref, w_ref, s_ref, b_ref, o_ref):
        scale_v = s_ref[...]
        bias_v = b_ref[...]
        acc = [None] * TH
        for kh in range(k):
            for kw in range(k):
                w_kk = w_ref[kh, kw]                                   # (Cin, TN) bf16
                for t in range(TH):
                    lhs = x_ref[kh, t, offs[kw]:offs[kw] + Wo, :]      # (Wo, Cin) bf16
                    part = jnp.dot(lhs, w_kk, preferred_element_type=jnp.float32)
                    acc[t] = part if acc[t] is None else acc[t] + part
        for t in range(TH):
            y = acc[t] * scale_v + bias_v
            o_ref[t] = jnp.where(y > 0, y, 0.01 * y).astype(o_ref.dtype)

    out = pl.pallas_call(
        kernel,
        out_shape=jax.ShapeDtypeStruct((R, Wo, Cout_p), out_dtype),
        grid_spec=pltpu.PrefetchScalarGridSpec(
            num_scalar_prefetch=0,
            grid=(Cout_p // TN, R // TH),       # cout tiles outer -> weight block reused
            in_specs=[
                pl.BlockSpec((k, TH, Wcat, Cin), lambda j, i: (0, i, 0, 0)),
                pl.BlockSpec((k, k, Cin, TN), lambda j, i: (0, 0, 0, j)),
                pl.BlockSpec((1, TN), lambda j, i: (0, j)),
                pl.BlockSpec((1, TN), lambda j, i: (0, j)),
            ],
            out_specs=pl.BlockSpec((TH, Wo, TN), lambda j, i: (i, 0, j)),
        ),
        compiler_params=pltpu.CompilerParams(
            dimension_semantics=("parallel", "parallel"),
            vmem_limit_bytes=64 * 1024 * 1024),
    )(xrow, w, sc, bi)

    return out[:, :, :Cout].reshape(N, Ho, Wo, Cout)


# ---------------------------------------------------------------------------
# Fused ConvolutionalLayer: Conv2d(bias=False) -> BatchNorm2d(eval) -> LeakyReLU
# ---------------------------------------------------------------------------
@functools.partial(jax.jit, static_argnums=(6, 7))
def pallas_conv_bn_lrelu(x_nhwc, w, gamma, beta, mean, var, stride, padding):
    eps = 1e-5
    scale = gamma * jax.lax.rsqrt(var + eps)
    bias = beta - mean * scale
    k = w.shape[2]
    if k == 1 and stride == 1 and padding == 0:
        return _conv_1x1(x_nhwc, w, scale, bias)
    return _conv_kxk(x_nhwc, w, scale, bias, stride, padding)


@functools.partial(jax.jit, static_argnums=(6, 7))
def reference_conv_bn_lrelu(x_nhwc, w, gamma, beta, mean, var, stride, padding):
    eps = 1e-5
    xb = x_nhwc.astype(jnp.bfloat16)
    wb = jnp.transpose(w, (2, 3, 1, 0)).astype(jnp.bfloat16)           # OIHW -> HWIO
    y = jax.lax.conv_general_dilated(
        xb, wb, window_strides=(stride, stride),
        padding=((padding, padding), (padding, padding)),
        dimension_numbers=("NHWC", "HWIO", "NHWC"),
        preferred_element_type=jnp.float32)
    scale = gamma * jax.lax.rsqrt(var + eps)
    bias = beta - mean * scale
    y = y * scale + bias
    y = jnp.where(y > 0, y, 0.01 * y)
    return y.astype(jnp.bfloat16)


# ---------------------------------------------------------------------------
# Darknet53 architecture (mirrors the PyTorch module)
# ---------------------------------------------------------------------------
def _darknet53_cfg():
    def conv(cin, cout, k, s, p):
        return ("conv", cin, cout, k, s, p)

    def res(c):
        return ("res", c)

    trunk_52 = ([conv(3, 32, 3, 1, 1), conv(32, 64, 3, 2, 1), res(64),
                 conv(64, 128, 3, 2, 1), res(128), res(128),
                 conv(128, 256, 3, 2, 1)] + [res(256)] * 8)
    trunk_26 = [conv(256, 512, 3, 2, 1)] + [res(512)] * 8
    trunk_13 = [conv(512, 1024, 3, 2, 1)] + [res(1024)] * 4
    return (trunk_52, trunk_26, trunk_13)


def init_darknet53_params(key):
    def make(k, cin, cout, ksz):
        ks = jax.random.split(k, 5)
        w = jax.random.normal(ks[0], (cout, cin, ksz, ksz), jnp.float32) * jnp.sqrt(
            2.0 / (cin * ksz * ksz))
        gamma = jax.random.uniform(ks[1], (cout,), jnp.float32, 0.8, 1.2)
        beta = jax.random.normal(ks[2], (cout,), jnp.float32) * 0.05
        mean = jax.random.normal(ks[3], (cout,), jnp.float32) * 0.05
        var = jax.random.uniform(ks[4], (cout,), jnp.float32, 0.8, 1.2)
        return (w, gamma, beta, mean, var)

    params = []
    for trunk in _darknet53_cfg():
        for item in trunk:
            if item[0] == "conv":
                _, cin, cout, ksz, _, _ = item
                key, sub = jax.random.split(key)
                params.append(make(sub, cin, cout, ksz))
            else:
                c = item[1]
                key, s1, s2 = jax.random.split(key, 3)
                params.append(make(s1, c, c // 2, 1))
                params.append(make(s2, c // 2, c, 3))
    return params


def darknet53_forward(x_nchw, params, conv_fn):
    """Shared driver (NCHW in/out); conv_fn(x_nhwc, w, g, b, m, v, stride, pad) -> NHWC."""
    x = jnp.transpose(x_nchw, (0, 2, 3, 1)).astype(jnp.bfloat16)   # NHWC once at entry
    outs = []
    idx = 0
    for trunk in _darknet53_cfg():
        for item in trunk:
            if item[0] == "conv":
                _, _, _, _, s, p = item
                x = conv_fn(x, *params[idx], s, p)
                idx += 1
            else:                                   # ResidualLayer: 1x1 then 3x3 + skip
                y = conv_fn(x, *params[idx], 1, 0)
                idx += 1
                y = conv_fn(y, *params[idx], 1, 1)
                idx += 1
                x = x + y
        outs.append(x)
    h52, h26, h13 = outs
    to_nchw = lambda t: jnp.transpose(t, (0, 3, 1, 2)).astype(jnp.float32)
    return to_nchw(h52), to_nchw(h26), to_nchw(h13)


# ---------------------------------------------------------------------------
# Self-test
# ---------------------------------------------------------------------------
def _check_layer(key, n, h, w, cin, cout, ksz, s, p):
    ks = jax.random.split(key, 6)
    x = jax.random.normal(ks[0], (n, h, w, cin), jnp.float32)
    wgt = jax.random.normal(ks[1], (cout, cin, ksz, ksz), jnp.float32) * jnp.sqrt(
        2.0 / (cin * ksz * ksz))
    gamma = jax.random.uniform(ks[2], (cout,), jnp.float32, 0.8, 1.2)
    beta = jax.random.normal(ks[3], (cout,), jnp.float32) * 0.1
    mean = jax.random.normal(ks[4], (cout,), jnp.float32) * 0.1
    var = jax.random.uniform(ks[5], (cout,), jnp.float32, 0.8, 1.2)

    got = jnp.asarray(pallas_conv_bn_lrelu(x, wgt, gamma, beta, mean, var, s, p),
                      jnp.float32)
    ref = jnp.asarray(reference_conv_bn_lrelu(x, wgt, gamma, beta, mean, var, s, p),
                      jnp.float32)
    assert got.shape == ref.shape, (got.shape, ref.shape)
    err = float(jnp.max(jnp.abs(got - ref)))
    scale_ref = float(jnp.max(jnp.abs(ref))) + 1e-6
    assert err <= 0.02 * scale_ref + 0.02, (err, scale_ref)


if __name__ == "__main__":
    key = jax.random.PRNGKey(0)
    k_params, k_x, k_t = jax.random.split(key, 3)

    # Unit checks of the fused conv+BN+LeakyReLU kernel (all conv flavours used).
    checks = [
        (2, 64, 64, 3, 32, 3, 1, 1),     # stem 3x3 / s1 (tiny Cin)
        (2, 32, 32, 32, 64, 3, 1, 1),    # residual 3x3 / s1 (Cout padded to 128)
        (2, 32, 32, 64, 128, 3, 2, 1),   # DownsamplingLayer 3x3 / s2
        (2, 8, 8, 256, 128, 1, 1, 0),    # residual 1x1 / s1
    ]
    for i, cfg in enumerate(checks):
        _check_layer(jax.random.fold_in(k_t, i), *cfg)

    # Full Darknet53 forward (2 x 3 x 64 x 64 input -> 8/4/2 spatial heads).
    params = init_darknet53_params(k_params)
    x = jax.random.normal(k_x, (2, 3, 64, 64), jnp.float32)
    h52, h26, h13 = darknet53_forward(x, params, pallas_conv_bn_lrelu)
    h52, h26, h13 = jax.block_until_ready((h52, h26, h13))

    assert h52.shape == (2, 256, 8, 8), h52.shape
    assert h26.shape == (2, 512, 4, 4), h26.shape
    assert h13.shape == (2, 1024, 2, 2), h13.shape
    for h in (h52, h26, h13):
        assert bool(jnp.isfinite(h).all())

    print("KERNEL_OK")
</pallas_src>

<mosaic_0001>
module attributes {stable_mosaic.version = 11 : i64} {
  func.func @kernel(%arg0: i32, %arg1: i32, %arg2: memref<3x4x66x3xbf16, #tpu.memory_space<vmem>>, %arg3: memref<3x3x3x128xbf16, #tpu.memory_space<vmem>>, %arg4: memref<1x128xf32, #tpu.memory_space<vmem>>, %arg5: memref<1x128xf32, #tpu.memory_space<vmem>>, %arg6: memref<4x64x128xbf16, #tpu.memory_space<vmem>>) attributes {dimension_semantics = [#tpu.dimension_semantics<parallel>, #tpu.dimension_semantics<parallel>], iteration_bounds = array<i64: 1, 32>, scalar_prefetch = 0 : i64, scratch_operands = 0 : i64, tpu.core_type = #tpu.core_type<tc>, window_params = [{transform_indices = @transform_0, window_bounds = array<i64: 3, 4, 66, 3>}, {transform_indices = @transform_1, window_bounds = array<i64: 3, 3, 3, 128>}, {transform_indices = @transform_2, window_bounds = array<i64: 1, 128>}, {transform_indices = @transform_3, window_bounds = array<i64: 1, 128>}, {transform_indices = @transform_4, window_bounds = array<i64: 4, 64, 128>}]} {
    %c0 = arith.constant 0 : index
    %c0_0 = arith.constant 0 : index
    %0 = vector.load %arg4[%c0, %c0_0] : memref<1x128xf32, #tpu.memory_space<vmem>>, vector<1x128xf32>
    %c0_1 = arith.constant 0 : index
    %c0_2 = arith.constant 0 : index
    %1 = vector.load %arg5[%c0_1, %c0_2] : memref<1x128xf32, #tpu.memory_space<vmem>>, vector<1x128xf32>
    %c0_3 = arith.constant 0 : index
    %c0_4 = arith.constant 0 : index
    %c0_5 = arith.constant 0 : index
    %c0_6 = arith.constant 0 : index
    %2 = vector.load %arg3[%c0_3, %c0_4, %c0_5, %c0_6] : memref<3x3x3x128xbf16, #tpu.memory_space<vmem>>, vector<1x1x3x128xbf16>
    %3 = vector.shape_cast %2 : vector<1x1x3x128xbf16> to vector<3x128xbf16>
    %c0_7 = arith.constant 0 : index
    %c0_8 = arith.constant 0 : index
    %c0_9 = arith.constant 0 : index
    %c0_10 = arith.constant 0 : index
    %4 = vector.load %arg2[%c0_7, %c0_8, %c0_9, %c0_10] : memref<3x4x66x3xbf16, #tpu.memory_space<vmem>>, vector<1x1x64x3xbf16>
    %5 = vector.shape_cast %4 : vector<1x1x64x3xbf16> to vector<64x3xbf16>
    %cst = arith.constant dense<0.000000e+00> : vector<64x128xf32>
    %6 = tpu.matmul %5, %3, %cst {dimension_numbers = #tpu.dot_dimension_numbers<[1], [0], [0], [1], [0, 0, 1, 1], [], []>} : vector<64x3xbf16>, vector<3x128xbf16>, vector<64x128xf32> -> vector<64x128xf32>
    %c0_11 = arith.constant 0 : index
    %c1 = arith.constant 1 : index
    %c0_12 = arith.constant 0 : index
    %c0_13 = arith.constant 0 : index
    %7 = vector.load %arg2[%c0_11, %c1, %c0_12, %c0_13] : memref<3x4x66x3xbf16, #tpu.memory_space<vmem>>, vector<1x1x64x3xbf16>
    %8 = vector.shape_cast %7 : vector<1x1x64x3xbf16> to vector<64x3xbf16>
    %cst_14 = arith.constant dense<0.000000e+00> : vector<64x128xf32>
    %9 = tpu.matmul %8, %3, %cst_14 {dimension_numbers = #tpu.dot_dimension_numbers<[1], [0], [0], [1], [0, 0, 1, 1], [], []>} : vector<64x3xbf16>, vector<3x128xbf16>, vector<64x128xf32> -> vector<64x128xf32>
    %c0_15 = arith.constant 0 : index
    %c2 = arith.constant 2 : index
    %c0_16 = arith.constant 0 : index
    %c0_17 = arith.constant 0 : index
    %10 = vector.load %arg2[%c0_15, %c2, %c0_16, %c0_17] : memref<3x4x66x3xbf16, #tpu.memory_space<vmem>>, vector<1x1x64x3xbf16>
    %11 = vector.shape_cast %10 : vector<1x1x64x3xbf16> to vector<64x3xbf16>
    %cst_18 = arith.constant dense<0.000000e+00> : vector<64x128xf32>
    %12 = tpu.matmul %11, %3, %cst_18 {dimension_numbers = #tpu.dot_dimension_numbers<[1], [0], [0], [1], [0, 0, 1, 1], [], []>} : vector<64x3xbf16>, vector<3x128xbf16>, vector<64x128xf32> -> vector<64x128xf32>
    %c0_19 = arith.constant 0 : index
    %c3 = arith.constant 3 : index
    %c0_20 = arith.constant 0 : index
    %c0_21 = arith.constant 0 : index
    %13 = vector.load %arg2[%c0_19, %c3, %c0_20, %c0_21] : memref<3x4x66x3xbf16, #tpu.memory_space<vmem>>, vector<1x1x64x3xbf16>
    %14 = vector.shape_cast %13 : vector<1x1x64x3xbf16> to vector<64x3xbf16>
    %cst_22 = arith.constant dense<0.000000e+00> : vector<64x128xf32>
    %15 = tpu.matmul %14, %3, %cst_22 {dimension_numbers = #tpu.dot_dimension_numbers<[1], [0], [0], [1], [0, 0, 1, 1], [], []>} : vector<64x3xbf16>, vector<3x128xbf16>, vector<64x128xf32> -> vector<64x128xf32>
    %c0_23 = arith.constant 0 : index
    %c1_24 = arith.constant 1 : index
    %c0_25 = arith.constant 0 : index
    %c0_26 = arith.constant 0 : index
    %16 = vector.load %arg3[%c0_23, %c1_24, %c0_25, %c0_26] : memref<3x3x3x128xbf16, #tpu.memory_space<vmem>>, vector<1x1x3x128xbf16>
    %17 = vector.shape_cast %16 : vector<1x1x3x128xbf16> to vector<3x128xbf16>
    %c0_27 = arith.constant 0 : index
    %c0_28 = arith.constant 0 : index
    %c1_29 = arith.constant 1 : index
    %c0_30 = arith.constant 0 : index
    %18 = vector.load %arg2[%c0_27, %c0_28, %c1_29, %c0_30] : memref<3x4x66x3xbf16, #tpu.memory_space<vmem>>, vector<1x1x64x3xbf16>
    %19 = vector.shape_cast %18 : vector<1x1x64x3xbf16> to vector<64x3xbf16>
    %cst_31 = arith.constant dense<0.000000e+00> : vector<64x128xf32>
    %20 = tpu.matmul %19, %17, %cst_31 {dimension_numbers = #tpu.dot_dimension_numbers<[1], [0], [0], [1], [0, 0, 1, 1], [], []>} : vector<64x3xbf16>, vector<3x128xbf16>, vector<64x128xf32> -> vector<64x128xf32>
    %21 = arith.addf %6, %20 : vector<64x128xf32>
    %c0_32 = arith.constant 0 : index
    %c1_33 = arith.constant 1 : index
    %c1_34 = arith.constant 1 : index
    %c0_35 = arith.constant 0 : index
    %22 = vector.load %arg2[%c0_32, %c1_33, %c1_34, %c0_35] : memref<3x4x66x3xbf16, #tpu.memory_space<vmem>>, vector<1x1x64x3xbf16>
    %23 = vector.shape_cast %22 : vector<1x1x64x3xbf16> to vector<64x3xbf16>
    %cst_36 = arith.constant dense<0.000000e+00> : vector<64x128xf32>
    %24 = tpu.matmul %23, %17, %cst_36 {dimension_numbers = #tpu.dot_dimension_numbers<[1], [0], [0], [1], [0, 0, 1, 1], [], []>} : vector<64x3xbf16>, vector<3x128xbf16>, vector<64x128xf32> -> vector<64x128xf32>
    %25 = arith.addf %9, %24 : vector<64x128xf32>
    %c0_37 = arith.constant 0 : index
    %c2_38 = arith.constant 2 : index
    %c1_39 = arith.constant 1 : index
    %c0_40 = arith.constant 0 : index
    %26 = vector.load %arg2[%c0_37, %c2_38, %c1_39, %c0_40] : memref<3x4x66x3xbf16, #tpu.memory_space<vmem>>, vector<1x1x64x3xbf16>
    %27 = vector.shape_cast %26 : vector<1x1x64x3xbf16> to vector<64x3xbf16>
    %cst_41 = arith.constant dense<0.000000e+00> : vector<64x128xf32>
    %28 = tpu.matmul %27, %17, %cst_41 {dimension_numbers = #tpu.dot_dimension_numbers<[1], [0], [0], [1], [0, 0, 1, 1], [], []>} : vector<64x3xbf16>, vector<3x128xbf16>, vector<64x128xf32> -> vector<64x128xf32>
    %29 = arith.addf %12, %28 : vector<64x128xf32>
    %c0_42 = arith.constant 0 : index
    %c3_43 = arith.constant 3 : index
    %c1_44 = arith.constant 1 : index
    %c0_45 = arith.constant 0 : index
    %30 = vector.load %arg2[%c0_42, %c3_43, %c1_44, %c0_45] : memref<3x4x66x3xbf16, #tpu.memory_space<vmem>>, vector<1x1x64x3xbf16>
    %31 = vector.shape_cast %30 : vector<1x1x64x3xbf16> to vector<64x3xbf16>
    %cst_46 = arith.constant dense<0.000000e+00> : vector<64x128xf32>
    %32 = tpu.matmul %31, %17, %cst_46 {dimension_numbers = #tpu.dot_dimension_numbers<[1], [0], [0], [1], [0, 0, 1, 1], [], []>} : vector<64x3xbf16>, vector<3x128xbf16>, vector<64x128xf32> -> vector<64x128xf32>
    %33 = arith.addf %15, %32 : vector<64x128xf32>
    %c0_47 = arith.constant 0 : index
    %c2_48 = arith.constant 2 : index
    %c0_49 = arith.constant 0 : index
    %c0_50 = arith.constant 0 : index
    %34 = vector.load %arg3[%c0_47, %c2_48, %c0_49, %c0_50] : memref<3x3x3x128xbf16, #tpu.memory_space<vmem>>, vector<1x1x3x128xbf16>
    %35 = vector.shape_cast %34 : vector<1x1x3x128xbf16> to vector<3x128xbf16>
    %c0_51 = arith.constant 0 : index
    %c0_52 = arith.constant 0 : index
    %c2_53 = arith.constant 2 : index
    %c0_54 = arith.constant 0 : index
    %36 = vector.load %arg2[%c0_51, %c0_52, %c2_53, %c0_54] : memref<3x4x66x3xbf16, #tpu.memory_space<vmem>>, vector<1x1x64x3xbf16>
    %37 = vector.shape_cast %36 : vector<1x1x64x3xbf16> to vector<64x3xbf16>
    %cst_55 = arith.constant dense<0.000000e+00> : vector<64x128xf32>
    %38 = tpu.matmul %37, %35, %cst_55 {dimension_numbers = #tpu.dot_dimension_numbers<[1], [0], [0], [1], [0, 0, 1, 1], [], []>} : vector<64x3xbf16>, vector<3x128xbf16>, vector<64x128xf32> -> vector<64x128xf32>
    %39 = arith.addf %21, %38 : vector<64x128xf32>
    %c0_56 = arith.constant 0 : index
    %c1_57 = arith.constant 1 : index
    %c2_58 = arith.constant 2 : index
    %c0_59 = arith.constant 0 : index
    %40 = vector.load %arg2[%c0_56, %c1_57, %c2_58, %c0_59] : memref<3x4x66x3xbf16, #tpu.memory_space<vmem>>, vector<1x1x64x3xbf16>
    %41 = vector.shape_cast %40 : vector<1x1x64x3xbf16> to vector<64x3xbf16>
    %cst_60 = arith.constant dense<0.000000e+00> : vector<64x128xf32>
    %42 = tpu.matmul %41, %35, %cst_60 {dimension_numbers = #tpu.dot_dimension_numbers<[1], [0], [0], [1], [0, 0, 1, 1], [], []>} : vector<64x3xbf16>, vector<3x128xbf16>, vector<64x128xf32> -> vector<64x128xf32>
    %43 = arith.addf %25, %42 : vector<64x128xf32>
    %c0_61 = arith.constant 0 : index
    %c2_62 = arith.constant 2 : index
    %c2_63 = arith.constant 2 : index
    %c0_64 = arith.constant 0 : index
    %44 = vector.load %arg2[%c0_61, %c2_62, %c2_63, %c0_64] : memref<3x4x66x3xbf16, #tpu.memory_space<vmem>>, vector<1x1x64x3xbf16>
    %45 = vector.shape_cast %44 : vector<1x1x64x3xbf16> to vector<64x3xbf16>
    %cst_65 = arith.constant dense<0.000000e+00> : vector<64x128xf32>
    %46 = tpu.matmul %45, %35, %cst_65 {dimension_numbers = #tpu.dot_dimension_numbers<[1], [0], [0], [1], [0, 0, 1, 1], [], []>} : vector<64x3xbf16>, vector<3x128xbf16>, vector<64x128xf32> -> vector<64x128xf32>
    %47 = arith.addf %29, %46 : vector<64x128xf32>
    %c0_66 = arith.constant 0 : index
    %c3_67 = arith.constant 3 : index
    %c2_68 = arith.constant 2 : index
    %c0_69 = arith.constant 0 : index
    %48 = vector.load %arg2[%c0_66, %c3_67, %c2_68, %c0_69] : memref<3x4x66x3xbf16, #tpu.memory_space<vmem>>, vector<1x1x64x3xbf16>
    %49 = vector.shape_cast %48 : vector<1x1x64x3xbf16> to vector<64x3xbf16>
    %cst_70 = arith.constant dense<0.000000e+00> : vector<64x128xf32>
    %50 = tpu.matmul %49, %35, %cst_70 {dimension_numbers = #tpu.dot_dimension_numbers<[1], [0], [0], [1], [0, 0, 1, 1], [], []>} : vector<64x3xbf16>, vector<3x128xbf16>, vector<64x128xf32> -> vector<64x128xf32>
    %51 = arith.addf %33, %50 : vector<64x128xf32>
    %c1_71 = arith.constant 1 : index
    %c0_72 = arith.constant 0 : index
    %c0_73 = arith.constant 0 : index
    %c0_74 = arith.constant 0 : index
    %52 = vector.load %arg3[%c1_71, %c0_72, %c0_73, %c0_74] : memref<3x3x3x128xbf16, #tpu.memory_space<vmem>>, vector<1x1x3x128xbf16>
    %53 = vector.shape_cast %52 : vector<1x1x3x128xbf16> to vector<3x128xbf16>
    %c1_75 = arith.constant 1 : index
    %c0_76 = arith.constant 0 : index
    %c0_77 = arith.constant 0 : index
    %c0_78 = arith.constant 0 : index
    %54 = vector.load %arg2[%c1_75, %c0_76, %c0_77, %c0_78] : memref<3x4x66x3xbf16, #tpu.memory_space<vmem>>, vector<1x1x64x3xbf16>
    %55 = vector.shape_cast %54 : vector<1x1x64x3xbf16> to vector<64x3xbf16>
    %cst_79 = arith.constant dense<0.000000e+00> : vector<64x128xf32>
    %56 = tpu.matmul %55, %53, %cst_79 {dimension_numbers = #tpu.dot_dimension_numbers<[1], [0], [0], [1], [0, 0, 1, 1], [], []>} : vector<64x3xbf16>, vector<3x128xbf16>, vector<64x128xf32> -> vector<64x128xf32>
    %57 = arith.addf %39, %56 : vector<64x128xf32>
    %c1_80 = arith.constant 1 : index
    %c1_81 = arith.constant 1 : index
    %c0_82 = arith.constant 0 : index
    %c0_83 = arith.constant 0 : index
    %58 = vector.load %arg2[%c1_80, %c1_81, %c0_82, %c0_83] : memref<3x4x66x3xbf16, #tpu.memory_space<vmem>>, vector<1x1x64x3xbf16>
    %59 = vector.shape_cast %58 : vector<1x1x64x3xbf16> to vector<64x3xbf16>
    %cst_84 = arith.constant dense<0.000000e+00> : vector<64x128xf32>
    %60 = tpu.matmul %59, %53, %cst_84 {dimension_numbers = #tpu.dot_dimension_numbers<[1], [0], [0], [1], [0, 0, 1, 1], [], []>} : vector<64x3xbf16>, vector<3x128xbf16>, vector<64x128xf32> -> vector<64x128xf32>
    %61 = arith.addf %43, %60 : vector<64x128xf32>
    %c1_85 = arith.constant 1 : index
    %c2_86 = arith.constant 2 : index
    %c0_87 = arith.constant 0 : index
    %c0_88 = arith.constant 0 : index
    %62 = vector.load %arg2[%c1_85, %c2_86, %c0_87, %c0_88] : memref<3x4x66x3xbf16, #tpu.memory_space<vmem>>, vector<1x1x64x3xbf16>
    %63 = vector.shape_cast %62 : vector<1x1x64x3xbf16> to vector<64x3xbf16>
    %cst_89 = arith.constant dense<0.000000e+00> : vector<64x128xf32>
    %64 = tpu.matmul %63, %53, %cst_89 {dimension_numbers = #tpu.dot_dimension_numbers<[1], [0], [0], [1], [0, 0, 1, 1], [], []>} : vector<64x3xbf16>, vector<3x128xbf16>, vector<64x128xf32> -> vector<64x128xf32>
    %65 = arith.addf %47, %64 : vector<64x128xf32>
    %c1_90 = arith.constant 1 : index
    %c3_91 = arith.constant 3 : index
    %c0_92 = arith.constant 0 : index
    %c0_93 = arith.constant 0 : index
    %66 = vector.load %arg2[%c1_90, %c3_91, %c0_92, %c0_93] : memref<3x4x66x3xbf16, #tpu.memory_space<vmem>>, vector<1x1x64x3xbf16>
    %67 = vector.shape_cast %66 : vector<1x1x64x3xbf16> to vector<64x3xbf16>
    %cst_94 = arith.constant dense<0.000000e+00> : vector<64x128xf32>
    %68 = tpu.matmul %67, %53, %cst_94 {dimension_numbers = #tpu.dot_dimension_numbers<[1], [0], [0], [1], [0, 0, 1, 1], [], []>} : vector<64x3xbf16>, vector<3x128xbf16>, vector<64x128xf32> -> vector<64x128xf32>
    %69 = arith.addf %51, %68 : vector<64x128xf32>
    %c1_95 = arith.constant 1 : index
    %c1_96 = arith.constant 1 : index
    %c0_97 = arith.constant 0 : index
    %c0_98 = arith.constant 0 : index
    %70 = vector.load %arg3[%c1_95, %c1_96, %c0_97, %c0_98] : memref<3x3x3x128xbf16, #tpu.memory_space<vmem>>, vector<1x1x3x128xbf16>
    %71 = vector.shape_cast %70 : vector<1x1x3x128xbf16> to vector<3x128xbf16>
    %c1_99 = arith.constant 1 : index
    %c0_100 = arith.constant 0 : index
    %c1_101 = arith.constant 1 : index
    %c0_102 = arith.constant 0 : index
    %72 = vector.load %arg2[%c1_99, %c0_100, %c1_101, %c0_102] : memref<3x4x66x3xbf16, #tpu.memory_space<vmem>>, vector<1x1x64x3xbf16>
    %73 = vector.shape_cast %72 : vector<1x1x64x3xbf16> to vector<64x3xbf16>
    %cst_103 = arith.constant dense<0.000000e+00> : vector<64x128xf32>
    %74 = tpu.matmul %73, %71, %cst_103 {dimension_numbers = #tpu.dot_dimension_numbers<[1], [0], [0], [1], [0, 0, 1, 1], [], []>} : vector<64x3xbf16>, vector<3x128xbf16>, vector<64x128xf32> -> vector<64x128xf32>
    %75 = arith.addf %57, %74 : vector<64x128xf32>
    %c1_104 = arith.constant 1 : index
    %c1_105 = arith.constant 1 : index
    %c1_106 = arith.constant 1 : index
    %c0_107 = arith.constant 0 : index
    %76 = vector.load %arg2[%c1_104, %c1_105, %c1_106, %c0_107] : memref<3x4x66x3xbf16, #tpu.memory_space<vmem>>, vector<1x1x64x3xbf16>
    %77 = vector.shape_cast %76 : vector<1x1x64x3xbf16> to vector<64x3xbf16>
    %cst_108 = arith.constant dense<0.000000e+00> : vector<64x128xf32>
    %78 = tpu.matmul %77, %71, %cst_108 {dimension_numbers = #tpu.dot_dimension_numbers<[1], [0], [0], [1], [0, 0, 1, 1], [], []>} : vector<64x3xbf16>, vector<3x128xbf16>, vector<64x128xf32> -> vector<64x128xf32>
    %79 = arith.addf %61, %78 : vector<64x128xf32>
    %c1_109 = arith.constant 1 : index
    %c2_110 = arith.constant 2 : index
    %c1_111 = arith.constant 1 : index
    %c0_112 = arith.constant 0 : index
    %80 = vector.load %arg2[%c1_109, %c2_110, %c1_111, %c0_112] : memref<3x4x66x3xbf16, #tpu.memory_space<vmem>>, vector<1x1x64x3xbf16>
    %81 = vector.shape_cast %80 : vector<1x1x64x3xbf16> to vector<64x3xbf16>
    %cst_113 = arith.constant dense<0.000000e+00> : vector<64x128xf32>
    %82 = tpu.matmul %81, %71, %cst_113 {dimension_numbers = #tpu.dot_dimension_numbers<[1], [0], [0], [1], [0, 0, 1, 1], [], []>} : vector<64x3xbf16>, vector<3x128xbf16>, vector<64x128xf32> -> vector<64x128xf32>
    %83 = arith.addf %65, %82 : vector<64x128xf32>
    %c1_114 = arith.constant 1 : index
    %c3_115 = arith.constant 3 : index
    %c1_116 = arith.constant 1 : index
    %c0_117 = arith.constant 0 : index
    %84 = vector.load %arg2[%c1_114, %c3_115, %c1_116, %c0_117] : memref<3x4x66x3xbf16, #tpu.memory_space<vmem>>, vector<1x1x64x3xbf16>
    %85 = vector.shape_cast %84 : vector<1x1x64x3xbf16> to vector<64x3xbf16>
    %cst_118 = arith.constant dense<0.000000e+00> : vector<64x128xf32>
    %86 = tpu.matmul %85, %71, %cst_118 {dimension_numbers = #tpu.dot_dimension_numbers<[1], [0], [0], [1], [0, 0, 1, 1], [], []>} : vector<64x3xbf16>, vector<3x128xbf16>, vector<64x128xf32> -> vector<64x128xf32>
    %87 = arith.addf %69, %86 : vector<64x128xf32>
    %c1_119 = arith.constant 1 : index
    %c2_120 = arith.constant 2 : index
    %c0_121 = arith.constant 0 : index
    %c0_122 = arith.constant 0 : index
    %88 = vector.load %arg3[%c1_119, %c2_120, %c0_121, %c0_122] : memref<3x3x3x128xbf16, #tpu.memory_space<vmem>>, vector<1x1x3x128xbf16>
    %89 = vector.shape_cast %88 : vector<1x1x3x128xbf16> to vector<3x128xbf16>
    %c1_123 = arith.constant 1 : index
    %c0_124 = arith.constant 0 : index
    %c2_125 = arith.constant 2 : index
    %c0_126 = arith.constant 0 : index
    %90 = vector.load %arg2[%c1_123, %c0_124, %c2_125, %c0_126] : memref<3x4x66x3xbf16, #tpu.memory_space<vmem>>, vector<1x1x64x3xbf16>
    %91 = vector.shape_cast %90 : vector<1x1x64x3xbf16> to vector<64x3xbf16>
    %cst_127 = arith.constant dense<0.000000e+00> : vector<64x128xf32>
    %92 = tpu.matmul %91, %89, %cst_127 {dimension_numbers = #tpu.dot_dimension_numbers<[1], [0], [0], [1], [0, 0, 1, 1], [], []>} : vector<64x3xbf16>, vector<3x128xbf16>, vector<64x128xf32> -> vector<64x128xf32>
    %93 = arith.addf %75, %92 : vector<64x128xf32>
    %c1_128 = arith.constant 1 : index
    %c1_129 = arith.constant 1 : index
    %c2_130 = arith.constant 2 : index
    %c0_131 = arith.constant 0 : index
    %94 = vector.load %arg2[%c1_128, %c1_129, %c2_130, %c0_131] : memref<3x4x66x3xbf16, #tpu.memory_space<vmem>>, vector<1x1x64x3xbf16>
    %95 = vector.shape_cast %94 : vector<1x1x64x3xbf16> to vector<64x3xbf16>
    %cst_132 = arith.constant dense<0.000000e+00> : vector<64x128xf32>
    %96 = tpu.matmul %95, %89, %cst_132 {dimension_numbers = #tpu.dot_dimension_numbers<[1], [0], [0], [1], [0, 0, 1, 1], [], []>} : vector<64x3xbf16>, vector<3x128xbf16>, vector<64x128xf32> -> vector<64x128xf32>
    %97 = arith.addf %79, %96 : vector<64x128xf32>
    %c1_133 = arith.constant 1 : index
    %c2_134 = arith.constant 2 : index
    %c2_135 = arith.constant 2 : index
    %c0_136 = arith.constant 0 : index
    %98 = vector.load %arg2[%c1_133, %c2_134, %c2_135, %c0_136] : memref<3x4x66x3xbf16, #tpu.memory_space<vmem>>, vector<1x1x64x3xbf16>
    %99 = vector.shape_cast %98 : vector<1x1x64x3xbf16> to vector<64x3xbf16>
    %cst_137 = arith.constant dense<0.000000e+00> : vector<64x128xf32>
    %100 = tpu.matmul %99, %89, %cst_137 {dimension_numbers = #tpu.dot_dimension_numbers<[1], [0], [0], [1], [0, 0, 1, 1], [], []>} : vector<64x3xbf16>, vector<3x128xbf16>, vector<64x128xf32> -> vector<64x128xf32>
    %101 = arith.addf %83, %100 : vector<64x128xf32>
    %c1_138 = arith.constant 1 : index
    %c3_139 = arith.constant 3 : index
    %c2_140 = arith.constant 2 : index
    %c0_141 = arith.constant 0 : index
    %102 = vector.load %arg2[%c1_138, %c3_139, %c2_140, %c0_141] : memref<3x4x66x3xbf16, #tpu.memory_space<vmem>>, vector<1x1x64x3xbf16>
    %103 = vector.shape_cast %102 : vector<1x1x64x3xbf16> to vector<64x3xbf16>
    %cst_142 = arith.constant dense<0.000000e+00> : vector<64x128xf32>
    %104 = tpu.matmul %103, %89, %cst_142 {dimension_numbers = #tpu.dot_dimension_numbers<[1], [0], [0], [1], [0, 0, 1, 1], [], []>} : vector<64x3xbf16>, vector<3x128xbf16>, vector<64x128xf32> -> vector<64x128xf32>
    %105 = arith.addf %87, %104 : vector<64x128xf32>
    %c2_143 = arith.constant 2 : index
    %c0_144 = arith.constant 0 : index
    %c0_145 = arith.constant 0 : index
    %c0_146 = arith.constant 0 : index
    %106 = vector.load %arg3[%c2_143, %c0_144, %c0_145, %c0_146] : memref<3x3x3x128xbf16, #tpu.memory_space<vmem>>, vector<1x1x3x128xbf16>
    %107 = vector.shape_cast %106 : vector<1x1x3x128xbf16> to vector<3x128xbf16>
    %c2_147 = arith.constant 2 : index
    %c0_148 = arith.constant 0 : index
    %c0_149 = arith.constant 0 : index
    %c0_150 = arith.constant 0 : index
    %108 = vector.load %arg2[%c2_147, %c0_148, %c0_149, %c0_150] : memref<3x4x66x3xbf16, #tpu.memory_space<vmem>>, vector<1x1x64x3xbf16>
    %109 = vector.shape_cast %108 : vector<1x1x64x3xbf16> to vector<64x3xbf16>
    %cst_151 = arith.constant dense<0.000000e+00> : vector<64x128xf32>
    %110 = tpu.matmul %109, %107, %cst_151 {dimension_numbers = #tpu.dot_dimension_numbers<[1], [0], [0], [1], [0, 0, 1, 1], [], []>} : vector<64x3xbf16>, vector<3x128xbf16>, vector<64x128xf32> -> vector<64x128xf32>
    %111 = arith.addf %93, %110 : vector<64x128xf32>
    %c2_152 = arith.constant 2 : index
    %c1_153 = arith.constant 1 : index
    %c0_154 = arith.constant 0 : index
    %c0_155 = arith.constant 0 : index
    %112 = vector.load %arg2[%c2_152, %c1_153, %c0_154, %c0_155] : memref<3x4x66x3xbf16, #tpu.memory_space<vmem>>, vector<1x1x64x3xbf16>
    %113 = vector.shape_cast %112 : vector<1x1x64x3xbf16> to vector<64x3xbf16>
    %cst_156 = arith.constant dense<0.000000e+00> : vector<64x128xf32>
    %114 = tpu.matmul %113, %107, %cst_156 {dimension_numbers = #tpu.dot_dimension_numbers<[1], [0], [0], [1], [0, 0, 1, 1], [], []>} : vector<64x3xbf16>, vector<3x128xbf16>, vector<64x128xf32> -> vector<64x128xf32>
    %115 = arith.addf %97, %114 : vector<64x128xf32>
    %c2_157 = arith.constant 2 : index
    %c2_158 = arith.constant 2 : index
    %c0_159 = arith.constant 0 : index
    %c0_160 = arith.constant 0 : index
    %116 = vector.load %arg2[%c2_157, %c2_158, %c0_159, %c0_160] : memref<3x4x66x3xbf16, #tpu.memory_space<vmem>>, vector<1x1x64x3xbf16>
    %117 = vector.shape_cast %116 : vector<1x1x64x3xbf16> to vector<64x3xbf16>
    %cst_161 = arith.constant dense<0.000000e+00> : vector<64x128xf32>
    %118 = tpu.matmul %117, %107, %cst_161 {dimension_numbers = #tpu.dot_dimension_numbers<[1], [0], [0], [1], [0, 0, 1, 1], [], []>} : vector<64x3xbf16>, vector<3x128xbf16>, vector<64x128xf32> -> vector<64x128xf32>
    %119 = arith.addf %101, %118 : vector<64x128xf32>
    %c2_162 = arith.constant 2 : index
    %c3_163 = arith.constant 3 : index
    %c0_164 = arith.constant 0 : index
    %c0_165 = arith.constant 0 : index
    %120 = vector.load %arg2[%c2_162, %c3_163, %c0_164, %c0_165] : memref<3x4x66x3xbf16, #tpu.memory_space<vmem>>, vector<1x1x64x3xbf16>
    %121 = vector.shape_cast %120 : vector<1x1x64x3xbf16> to vector<64x3xbf16>
    %cst_166 = arith.constant dense<0.000000e+00> : vector<64x128xf32>
    %122 = tpu.matmul %121, %107, %cst_166 {dimension_numbers = #tpu.dot_dimension_numbers<[1], [0], [0], [1], [0, 0, 1, 1], [], []>} : vector<64x3xbf16>, vector<3x128xbf16>, vector<64x128xf32> -> vector<64x128xf32>
    %123 = arith.addf %105, %122 : vector<64x128xf32>
    %c2_167 = arith.constant 2 : index
    %c1_168 = arith.constant 1 : index
    %c0_169 = arith.constant 0 : index
    %c0_170 = arith.constant 0 : index
    %124 = vector.load %arg3[%c2_167, %c1_168, %c0_169, %c0_170] : memref<3x3x3x128xbf16, #tpu.memory_space<vmem>>, vector<1x1x3x128xbf16>
    %125 = vector.shape_cast %124 : vector<1x1x3x128xbf16> to vector<3x128xbf16>
    %c2_171 = arith.constant 2 : index
    %c0_172 = arith.constant 0 : index
    %c1_173 = arith.constant 1 : index
    %c0_174 = arith.constant 0 : index
    %126 = vector.load %arg2[%c2_171, %c0_172, %c1_173, %c0_174] : memref<3x4x66x3xbf16, #tpu.memory_space<vmem>>, vector<1x1x64x3xbf16>
    %127 = vector.shape_cast %126 : vector<1x1x64x3xbf16> to vector<64x3xbf16>
    %cst_175 = arith.constant dense<0.000000e+00> : vector<64x128xf32>
    %128 = tpu.matmul %127, %125, %cst_175 {dimension_numbers = #tpu.dot_dimension_numbers<[1], [0], [0], [1], [0, 0, 1, 1], [], []>} : vector<64x3xbf16>, vector<3x128xbf16>, vector<64x128xf32> -> vector<64x128xf32>
    %129 = arith.addf %111, %128 : vector<64x128xf32>
    %c2_176 = arith.constant 2 : index
    %c1_177 = arith.constant 1 : index
    %c1_178 = arith.constant 1 : index
    %c0_179 = arith.constant 0 : index
    %130 = vector.load %arg2[%c2_176, %c1_177, %c1_178, %c0_179] : memref<3x4x66x3xbf16, #tpu.memory_space<vmem>>, vector<1x1x64x3xbf16>
    %131 = vector.shape_cast %130 : vector<1x1x64x3xbf16> to vector<64x3xbf16>
    %cst_180 = arith.constant dense<0.000000e+00> : vector<64x128xf32>
    %132 = tpu.matmul %131, %125, %cst_180 {dimension_numbers = #tpu.dot_dimension_numbers<[1], [0], [0], [1], [0, 0, 1, 1], [], []>} : vector<64x3xbf16>, vector<3x128xbf16>, vector<64x128xf32> -> vector<64x128xf32>
    %133 = arith.addf %115, %132 : vector<64x128xf32>
    %c2_181 = arith.constant 2 : index
    %c2_182 = arith.constant 2 : index
    %c1_183 = arith.constant 1 : index
    %c0_184 = arith.constant 0 : index
    %134 = vector.load %arg2[%c2_181, %c2_182, %c1_183, %c0_184] : memref<3x4x66x3xbf16, #tpu.memory_space<vmem>>, vector<1x1x64x3xbf16>
    %135 = vector.shape_cast %134 : vector<1x1x64x3xbf16> to vector<64x3xbf16>
    %cst_185 = arith.constant dense<0.000000e+00> : vector<64x128xf32>
    %136 = tpu.matmul %135, %125, %cst_185 {dimension_numbers = #tpu.dot_dimension_numbers<[1], [0], [0], [1], [0, 0, 1, 1], [], []>} : vector<64x3xbf16>, vector<3x128xbf16>, vector<64x128xf32> -> vector<64x128xf32>
    %137 = arith.addf %119, %136 : vector<64x128xf32>
    %c2_186 = arith.constant 2 : index
    %c3_187 = arith.constant 3 : index
    %c1_188 = arith.constant 1 : index
    %c0_189 = arith.constant 0 : index
    %138 = vector.load %arg2[%c2_186, %c3_187, %c1_188, %c0_189] : memref<3x4x66x3xbf16, #tpu.memory_space<vmem>>, vector<1x1x64x3xbf16>
    %139 = vector.shape_cast %138 : vector<1x1x64x3xbf16> to vector<64x3xbf16>
    %cst_190 = arith.constant dense<0.000000e+00> : vector<64x128xf32>
    %140 = tpu.matmul %139, %125, %cst_190 {dimension_numbers = #tpu.dot_dimension_numbers<[1], [0], [0], [1], [0, 0, 1, 1], [], []>} : vector<64x3xbf16>, vector<3x128xbf16>, vector<64x128xf32> -> vector<64x128xf32>
    %141 = arith.addf %123, %140 : vector<64x128xf32>
    %c2_191 = arith.constant 2 : index
    %c2_192 = arith.constant 2 : index
    %c0_193 = arith.constant 0 : index
    %c0_194 = arith.constant 0 : index
    %142 = vector.load %arg3[%c2_191, %c2_192, %c0_193, %c0_194] : memref<3x3x3x128xbf16, #tpu.memory_space<vmem>>, vector<1x1x3x128xbf16>
    %143 = vector.shape_cast %142 : vector<1x1x3x128xbf16> to vector<3x128xbf16>
    %c2_195 = arith.constant 2 : index
    %c0_196 = arith.constant 0 : index
    %c2_197 = arith.constant 2 : index
    %c0_198 = arith.constant 0 : index
    %144 = vector.load %arg2[%c2_195, %c0_196, %c2_197, %c0_198] : memref<3x4x66x3xbf16, #tpu.memory_space<vmem>>, vector<1x1x64x3xbf16>
    %145 = vector.shape_cast %144 : vector<1x1x64x3xbf16> to vector<64x3xbf16>
    %cst_199 = arith.constant dense<0.000000e+00> : vector<64x128xf32>
    %146 = tpu.matmul %145, %143, %cst_199 {dimension_numbers = #tpu.dot_dimension_numbers<[1], [0], [0], [1], [0, 0, 1, 1], [], []>} : vector<64x3xbf16>, vector<3x128xbf16>, vector<64x128xf32> -> vector<64x128xf32>
    %147 = arith.addf %129, %146 : vector<64x128xf32>
    %c2_200 = arith.constant 2 : index
    %c1_201 = arith.constant 1 : index
    %c2_202 = arith.constant 2 : index
    %c0_203 = arith.constant 0 : index
    %148 = vector.load %arg2[%c2_200, %c1_201, %c2_202, %c0_203] : memref<3x4x66x3xbf16, #tpu.memory_space<vmem>>, vector<1x1x64x3xbf16>
    %149 = vector.shape_cast %148 : vector<1x1x64x3xbf16> to vector<64x3xbf16>
    %cst_204 = arith.constant dense<0.000000e+00> : vector<64x128xf32>
    %150 = tpu.matmul %149, %143, %cst_204 {dimension_numbers = #tpu.dot_dimension_numbers<[1], [0], [0], [1], [0, 0, 1, 1], [], []>} : vector<64x3xbf16>, vector<3x128xbf16>, vector<64x128xf32> -> vector<64x128xf32>
    %151 = arith.addf %133, %150 : vector<64x128xf32>
    %c2_205 = arith.constant 2 : index
    %c2_206 = arith.constant 2 : index
    %c2_207 = arith.constant 2 : index
    %c0_208 = arith.constant 0 : index
    %152 = vector.load %arg2[%c2_205, %c2_206, %c2_207, %c0_208] : memref<3x4x66x3xbf16, #tpu.memory_space<vmem>>, vector<1x1x64x3xbf16>
    %153 = vector.shape_cast %152 : vector<1x1x64x3xbf16> to vector<64x3xbf16>
    %cst_209 = arith.constant dense<0.000000e+00> : vector<64x128xf32>
    %154 = tpu.matmul %153, %143, %cst_209 {dimension_numbers = #tpu.dot_dimension_numbers<[1], [0], [0], [1], [0, 0, 1, 1], [], []>} : vector<64x3xbf16>, vector<3x128xbf16>, vector<64x128xf32> -> vector<64x128xf32>
    %155 = arith.addf %137, %154 : vector<64x128xf32>
    %c2_210 = arith.constant 2 : index
    %c3_211 = arith.constant 3 : index
    %c2_212 = arith.constant 2 : index
    %c0_213 = arith.constant 0 : index
    %156 = vector.load %arg2[%c2_210, %c3_211, %c2_212, %c0_213] : memref<3x4x66x3xbf16, #tpu.memory_space<vmem>>, vector<1x1x64x3xbf16>
    %157 = vector.shape_cast %156 : vector<1x1x64x3xbf16> to vector<64x3xbf16>
    %cst_214 = arith.constant dense<0.000000e+00> : vector<64x128xf32>
    %158 = tpu.matmul %157, %143, %cst_214 {dimension_numbers = #tpu.dot_dimension_numbers<[1], [0], [0], [1], [0, 0, 1, 1], [], []>} : vector<64x3xbf16>, vector<3x128xbf16>, vector<64x128xf32> -> vector<64x128xf32>
    %159 = arith.addf %141, %158 : vector<64x128xf32>
    %160 = vector.broadcast %0 : vector<1x128xf32> to vector<64x128xf32>
    %161 = arith.mulf %147, %160 : vector<64x128xf32>
    %162 = vector.broadcast %1 : vector<1x128xf32> to vector<64x128xf32>
    %163 = arith.addf %161, %162 : vector<64x128xf32>
    %cst_215 = arith.constant 0.000000e+00 : f32
    %164 = vector.broadcast %cst_215 : f32 to vector<64x128xf32>
    %165 = arith.cmpf ogt, %163, %164 : vector<64x128xf32>
    %cst_216 = arith.constant 0.00999999977 : f32
    %166 = vector.broadcast %cst_216 : f32 to vector<64x128xf32>
    %167 = arith.mulf %166, %163 : vector<64x128xf32>
    %168 = arith.select %165, %163, %167 : vector<64x128xi1>, vector<64x128xf32>
    %169 = arith.truncf %168 : vector<64x128xf32> to vector<64x128xbf16>
    %c0_217 = arith.constant 0 : index
    %c0_218 = arith.constant 0 : index
    %c0_219 = arith.constant 0 : index
    %170 = vector.load %arg6[%c0_217, %c0_218, %c0_219] : memref<4x64x128xbf16, #tpu.memory_space<vmem>>, vector<1x64x128xbf16>
    %171 = vector.shape_cast %170 : vector<1x64x128xbf16> to vector<64x128xbf16>
    %172 = vector.shape_cast %169 : vector<64x128xbf16> to vector<1x64x128xbf16>
    tpu.vector_store %arg6[%c0_217, %c0_218, %c0_219], %172 {strides = array<i32>} : memref<4x64x128xbf16, #tpu.memory_space<vmem>>, vector<1x64x128xbf16>,
    %173 = vector.broadcast %0 : vector<1x128xf32> to vector<64x128xf32>
    %174 = arith.mulf %151, %173 : vector<64x128xf32>
    %175 = vector.broadcast %1 : vector<1x128xf32> to vector<64x128xf32>
    %176 = arith.addf %174, %175 : vector<64x128xf32>
    %cst_220 = arith.constant 0.000000e+00 : f32
    %177 = vector.broadcast %cst_220 : f32 to vector<64x128xf32>
    %178 = arith.cmpf ogt, %176, %177 : vector<64x128xf32>
    %cst_221 = arith.constant 0.00999999977 : f32
    %179 = vector.broadcast %cst_221 : f32 to vector<64x128xf32>
    %180 = arith.mulf %179, %176 : vector<64x128xf32>
    %181 = arith.select %178, %176, %180 : vector<64x128xi1>, vector<64x128xf32>
    %182 = arith.truncf %181 : vector<64x128xf32> to vector<64x128xbf16>
    %c1_222 = arith.constant 1 : index
    %c0_223 = arith.constant 0 : index
    %c0_224 = arith.constant 0 : index
    %183 = vector.load %arg6[%c1_222, %c0_223, %c0_224] : memref<4x64x128xbf16, #tpu.memory_space<vmem>>, vector<1x64x128xbf16>
    %184 = vector.shape_cast %183 : vector<1x64x128xbf16> to vector<64x128xbf16>
    %185 = vector.shape_cast %182 : vector<64x128xbf16> to vector<1x64x128xbf16>
    tpu.vector_store %arg6[%c1_222, %c0_223, %c0_224], %185 {strides = array<i32>} : memref<4x64x128xbf16, #tpu.memory_space<vmem>>, vector<1x64x128xbf16>,
    %186 = vector.broadcast %0 : vector<1x128xf32> to vector<64x128xf32>
    %187 = arith.mulf %155, %186 : vector<64x128xf32>
    %188 = vector.broadcast %1 : vector<1x128xf32> to vector<64x128xf32>
    %189 = arith.addf %187, %188 : vector<64x128xf32>
    %cst_225 = arith.constant 0.000000e+00 : f32
    %190 = vector.broadcast %cst_225 : f32 to vector<64x128xf32>
    %191 = arith.cmpf ogt, %189, %190 : vector<64x128xf32>
    %cst_226 = arith.constant 0.00999999977 : f32
    %192 = vector.broadcast %cst_226 : f32 to vector<64x128xf32>
    %193 = arith.mulf %192, %189 : vector<64x128xf32>
    %194 = arith.select %191, %189, %193 : vector<64x128xi1>, vector<64x128xf32>
    %195 = arith.truncf %194 : vector<64x128xf32> to vector<64x128xbf16>
    %c2_227 = arith.constant 2 : index
    %c0_228 = arith.constant 0 : index
    %c0_229 = arith.constant 0 : index
    %196 = vector.load %arg6[%c2_227, %c0_228, %c0_229] : memref<4x64x128xbf16, #tpu.memory_space<vmem>>, vector<1x64x128xbf16>
    %197 = vector.shape_cast %196 : vector<1x64x128xbf16> to vector<64x128xbf16>
    %198 = vector.shape_cast %195 : vector<64x128xbf16> to vector<1x64x128xbf16>
    tpu.vector_store %arg6[%c2_227, %c0_228, %c0_229], %198 {strides = array<i32>} : memref<4x64x128xbf16, #tpu.memory_space<vmem>>, vector<1x64x128xbf16>,
    %199 = vector.broadcast %0 : vector<1x128xf32> to vector<64x128xf32>
    %200 = arith.mulf %159, %199 : vector<64x128xf32>
    %201 = vector.broadcast %1 : vector<1x128xf32> to vector<64x128xf32>
    %202 = arith.addf %200, %201 : vector<64x128xf32>
    %cst_230 = arith.constant 0.000000e+00 : f32
    %203 = vector.broadcast %cst_230 : f32 to vector<64x128xf32>
    %204 = arith.cmpf ogt, %202, %203 : vector<64x128xf32>
    %cst_231 = arith.constant 0.00999999977 : f32
    %205 = vector.broadcast %cst_231 : f32 to vector<64x128xf32>
    %206 = arith.mulf %205, %202 : vector<64x128xf32>
    %207 = arith.select %204, %202, %206 : vector<64x128xi1>, vector<64x128xf32>
    %208 = arith.truncf %207 : vector<64x128xf32> to vector<64x128xbf16>
    %c3_232 = arith.constant 3 : index
    %c0_233 = arith.constant 0 : index
    %c0_234 = arith.constant 0 : index
    %209 = vector.load %arg6[%c3_232, %c0_233, %c0_234] : memref<4x64x128xbf16, #tpu.memory_space<vmem>>, vector<1x64x128xbf16>
    %210 = vector.shape_cast %209 : vector<1x64x128xbf16> to vector<64x128xbf16>
    %211 = vector.shape_cast %208 : vector<64x128xbf16> to vector<1x64x128xbf16>
    tpu.vector_store %arg6[%c3_232, %c0_233, %c0_234], %211 {strides = array<i32>} : memref<4x64x128xbf16, #tpu.memory_space<vmem>>, vector<1x64x128xbf16>,
    return
  }
  func.func @transform_0(%arg0: i32, %arg1: i32) -> (i32, i32, i32, i32) {
    %c0_i32 = arith.constant 0 : i32
    %c0_i32_0 = arith.constant 0 : i32
    %c0_i32_1 = arith.constant 0 : i32
    %c0_i32_2 = arith.constant 0 : i32
    return %c0_i32, %arg1, %c0_i32_0, %c0_i32_1 : i32, i32, i32, i32
  }
  func.func @transform_1(%arg0: i32, %arg1: i32) -> (i32, i32, i32, i32) {
    %c0_i32 = arith.constant 0 : i32
    %c0_i32_0 = arith.constant 0 : i32
    %c0_i32_1 = arith.constant 0 : i32
    %c0_i32_2 = arith.constant 0 : i32
    return %c0_i32, %c0_i32_0, %c0_i32_1, %arg0 : i32, i32, i32, i32
  }
  func.func @transform_2(%arg0: i32, %arg1: i32) -> (i32, i32) {
    %c0_i32 = arith.constant 0 : i32
    %c0_i32_0 = arith.constant 0 : i32
    return %c0_i32, %arg0 : i32, i32
  }
  func.func @transform_3(%arg0: i32, %arg1: i32) -> (i32, i32) {
    %c0_i32 = arith.constant 0 : i32
    %c0_i32_0 = arith.constant 0 : i32
    return %c0_i32, %arg0 : i32, i32
  }
  func.func @transform_4(%arg0: i32, %arg1: i32) -> (i32, i32, i32) {
    %c0_i32 = arith.constant 0 : i32
    %c0_i32_0 = arith.constant 0 : i32
    return %arg1, %c0_i32, %arg0 : i32, i32, i32
  }
}

</mosaic_0001>

<bundles_post_ra>
// kernel: pallas_conv_bn_lrelu.1
= control target key start
LH: loop header
LB: loop body
LE: loop exit
PB: predicated region body
PF: predicated region fallthrough
CT: control target
= control target key end

     0   :  { %s5203_s15 = smov 0   ;;  %s5205_s16 = smov 0   ;;  %s6775_s0 = inlined_call_operand.vmem [shape: bf16[3,128,66,3], index: 0, kind: input, shape index: {}]   ;;  %s6776_s1 = inlined_call_operand.vmem [shape: bf16[3,3,3,128], index: 1, kind: input, shape index: {}]   ;;  %s6777_s2 = inlined_call_operand.vmem [shape: f32[1,128], index: 2, kind: input, shape index: {}]   ;;  %s6778_s3 = inlined_call_operand.vmem [shape: f32[1,128], index: 3, kind: input, shape index: {}]   ;;  %s6779_s4 = inlined_call_operand.vmem [shape: bf16[128,64,128], index: 4, kind: output, shape index: {}]  }
   0x1   :  { %s5207_s17 = smov 0   ;;  %s5209_s18 = smov 0  }
   0x2   :  { %s5211_s19 = smov 0  }
   0x3 LB: > { %s23_s20 = sadd.s32 1, %s5171_s18  ;;  %p40_p1 = scmp.ne.s32.totalorder %s5163_s16, %s5159_s15  ;;  %s5175_s19 = sphi %s5211_s19, %s14_s19   ;;  %s5171_s18 = sphi %s5209_s18, %s6816_s18   ;;  %s5167_s17 = sphi %s5207_s17, %s6815_s17   ;;  %s5163_s16 = sphi %s5205_s16, %s6814_s16   ;;  %s5159_s15 = sphi %s5203_s15, %s6813_s15  }
   0x4   : > { %p24_p0 = scmp.ge.s32.totalorder %s23_s20, 32  ;;  %p41_p2 = scmp.eq.s32.totalorder %s5175_s19, 0 }
   0x5   : > { %s33_s22 = sadd.s32 1, %s5163_s16  ;;  %p4146_p5 = scmp.ge.s32.totalorder %s5175_s19, 32 }
   0x6   : > { %s6818_s20 = smov (%p24_p0, %s23_s20), 0  ;;  %p42_p3 = por %p41_p2, %p40_p1 }
   0x7   : > { %s30_s21 = ssub.s32 %s5171_s18, %s6818_s20  ;;  %191 = sbr.rel (%p4146_p5) target bundleno = 71 (0x47), region = 28 }
   0x8   : > { %p31_p4 = scmp.eq.s32.totalorder %s30_s21, 0 }
   0xa   : > { %s5238_s23 = scalar_select %p31_p4, %s5163_s16, %s33_s22  }
   0xc   : > { %194 = sbr.rel (!%p42_p3) target bundleno = 71 (0x47), region = 32  ;;  %s196_s24 = sand.u32 (%p42_p3), 1, %s5163_s16  }
   0xd   : > { %s5074_s25 = smul.u32 (%p42_p3), 144, %s5171_s18 }
   0xe   : > { %s5073_s26 = smul.u32 (%p42_p3), 432, %s196_s24 }
   0xf   : > { %s5246_s29 = scalar_lea.vmem (%p42_p3), %s6775_s0, %s5074_s25 }
  0x10   : > { %v219_v0 = vld [vmem:[%s5246_s29] sm:$0xff] (%p42_p3)   ;;  %v223_v1 = vld [vmem:[%s5246_s29 + $0x8] sm:$0xff] (%p42_p3)   ;;  %v227_v2 = vld [vmem:[%s5246_s29 + $0x10] sm:$0xff] (%p42_p3)   ;;  %s5251_s30 = scalar_lea.vmem (%p42_p3), [#allocation2], %s5073_s26 }
  0x11   : > { %220 = vst [vmem:[%s5251_s30] sm:$0xff] %v219_v0   ;;  %v231_v3 = vld [vmem:[%s5246_s29 + $0x18] sm:$0xff]   ;;  %v235_v4 = vld [vmem:[%s5246_s29 + $0x20] sm:$0xff]   ;;  %v239_v5 = vld [vmem:[%s5246_s29 + $0x28] sm:$0xff]  }
  0x12   : > { %224 = vst [vmem:[%s5251_s30 + $0x8] sm:$0xff] %v223_v1   ;;  %v243_v6 = vld [vmem:[%s5246_s29 + $0x30] sm:$0xff]   ;;  %v247_v7 = vld [vmem:[%s5246_s29 + $0x38] sm:$0xff]   ;;  %v251_v8 = vld [vmem:[%s5246_s29 + $0x40] sm:$0xff]  }
  0x13   : > { %228 = vst [vmem:[%s5251_s30 + $0x10] sm:$0xff] %v227_v2   ;;  %v255_v9 = vld [vmem:[%s5246_s29 + $0x48] sm:$0xff]   ;;  %v259_v10 = vld [vmem:[%s5246_s29 + $0x50] sm:$0xff]   ;;  %v263_v11 = vld [vmem:[%s5246_s29 + $0x58] sm:$0xff]  }
  0x14   : > { %232 = vst [vmem:[%s5251_s30 + $0x18] sm:$0xff] %v231_v3   ;;  %v267_v12 = vld [vmem:[%s5246_s29 + $0x60] sm:$0xff]   ;;  %v271_v13 = vld [vmem:[%s5246_s29 + $0x68] sm:$0xff]   ;;  %v275_v14 = vld [vmem:[%s5246_s29 + $0x70] sm:$0xff]  }
  0x15   : > { %236 = vst [vmem:[%s5251_s30 + $0x20] sm:$0xff] %v235_v4   ;;  %v279_v15 = vld [vmem:[%s5246_s29 + $0x78] sm:$0xff]   ;;  %v283_v16 = vld [vmem:[%s5246_s29 + $0x80] sm:$0xff]   ;;  %v287_v17 = vld [vmem:[%s5246_s29 + $0x88] sm:$0xff]  }
  0x16   : > { %240 = vst [vmem:[%s5251_s30 + $0x28] sm:$0xff] %v239_v5   ;;  %v291_v18 = vld [vmem:[%s5246_s29 + $0x1200] sm:$0xff]   ;;  %v295_v19 = vld [vmem:[%s5246_s29 + $0x1208] sm:$0xff]   ;;  %v299_v20 = vld [vmem:[%s5246_s29 + $0x1210] sm:$0xff]  }
  0x17   : > { %244 = vst [vmem:[%s5251_s30 + $0x30] sm:$0xff] %v243_v6   ;;  %v303_v21 = vld [vmem:[%s5246_s29 + $0x1218] sm:$0xff]   ;;  %v307_v22 = vld [vmem:[%s5246_s29 + $0x1220] sm:$0xff]   ;;  %v311_v23 = vld [vmem:[%s5246_s29 + $0x1228] sm:$0xff]  }
  0x18   : > { %248 = vst [vmem:[%s5251_s30 + $0x38] sm:$0xff] %v247_v7   ;;  %v315_v24 = vld [vmem:[%s5246_s29 + $0x1230] sm:$0xff]   ;;  %v319_v25 = vld [vmem:[%s5246_s29 + $0x1238] sm:$0xff]   ;;  %v323_v26 = vld [vmem:[%s5246_s29 + $0x1240] sm:$0xff]  }
  0x19   : > { %252 = vst [vmem:[%s5251_s30 + $0x40] sm:$0xff] %v251_v8   ;;  %v327_v27 = vld [vmem:[%s5246_s29 + $0x1248] sm:$0xff]   ;;  %v331_v28 = vld [vmem:[%s5246_s29 + $0x1250] sm:$0xff]   ;;  %v335_v29 = vld [vmem:[%s5246_s29 + $0x1258] sm:$0xff]  }
  0x1a   : > { %256 = vst [vmem:[%s5251_s30 + $0x48] sm:$0xff] %v255_v9   ;;  %v339_v30 = vld [vmem:[%s5246_s29 + $0x1260] sm:$0xff]   ;;  %v343_v31 = vld [vmem:[%s5246_s29 + $0x1268] sm:$0xff]   ;;  %v347_v32 = vld [vmem:[%s5246_s29 + $0x1270] sm:$0xff]  }
  0x1b   : > { %260 = vst [vmem:[%s5251_s30 + $0x50] sm:$0xff] %v259_v10   ;;  %v351_v33 = vld [vmem:[%s5246_s29 + $0x1278] sm:$0xff]   ;;  %v355_v34 = vld [vmem:[%s5246_s29 + $0x1280] sm:$0xff]   ;;  %v359_v35 = vld [vmem:[%s5246_s29 + $0x1288] sm:$0xff]  }
  0x1c   : > { %264 = vst [vmem:[%s5251_s30 + $0x58] sm:$0xff] %v263_v11   ;;  %v363_v36 = vld [vmem:[%s5246_s29 + $0x2400] sm:$0xff]   ;;  %v367_v37 = vld [vmem:[%s5246_s29 + $0x2408] sm:$0xff]   ;;  %v371_v38 = vld [vmem:[%s5246_s29 + $0x2410] sm:$0xff]  }
  0x1d   : > { %268 = vst [vmem:[%s5251_s30 + $0x60] sm:$0xff] %v267_v12   ;;  %v375_v39 = vld [vmem:[%s5246_s29 + $0x2418] sm:$0xff]   ;;  %v379_v40 = vld [vmem:[%s5246_s29 + $0x2420] sm:$0xff]   ;;  %v383_v41 = vld [vmem:[%s5246_s29 + $0x2428] sm:$0xff]  }
  0x1e   : > { %272 = vst [vmem:[%s5251_s30 + $0x68] sm:$0xff] %v271_v13   ;;  %v387_v42 = vld [vmem:[%s5246_s29 + $0x2430] sm:$0xff]   ;;  %v391_v43 = vld [vmem:[%s5246_s29 + $0x2438] sm:$0xff]   ;;  %v395_v44 = vld [vmem:[%s5246_s29 + $0x2440] sm:$0xff]  }
  0x1f   : > { %276 = vst [vmem:[%s5251_s30 + $0x70] sm:$0xff] %v275_v14   ;;  %v399_v45 = vld [vmem:[%s5246_s29 + $0x2448] sm:$0xff]   ;;  %v403_v46 = vld [vmem:[%s5246_s29 + $0x2450] sm:$0xff]   ;;  %v407_v47 = vld [vmem:[%s5246_s29 + $0x2458] sm:$0xff]  }
  0x20   : > { %280 = vst [vmem:[%s5251_s30 + $0x78] sm:$0xff] %v279_v15   ;;  %v411_v48 = vld [vmem:[%s5246_s29 + $0x2460] sm:$0xff]   ;;  %v415_v49 = vld [vmem:[%s5246_s29 + $0x2468] sm:$0xff]   ;;  %v419_v50 = vld [vmem:[%s5246_s29 + $0x2470] sm:$0xff]  }
  0x21   : > { %284 = vst [vmem:[%s5251_s30 + $0x80] sm:$0xff] %v283_v16   ;;  %v423_v51 = vld [vmem:[%s5246_s29 + $0x2478] sm:$0xff]   ;;  %v427_v52 = vld [vmem:[%s5246_s29 + $0x2480] sm:$0xff]   ;;  %v431_v53 = vld [vmem:[%s5246_s29 + $0x2488] sm:$0xff]  }
  0x22   : > { %288 = vst [vmem:[%s5251_s30 + $0x88] sm:$0xff] %v287_v17  }
  0x23   : > { %292 = vst [vmem:[%s5251_s30 + $0x90] sm:$0xff] %v291_v18  }
  0x24   : > { %296 = vst [vmem:[%s5251_s30 + $0x98] sm:$0xff] %v295_v19  }
  0x25   : > { %300 = vst [vmem:[%s5251_s30 + $0xa0] sm:$0xff] %v299_v20  }
  0x26   : > { %304 = vst [vmem:[%s5251_s30 + $0xa8] sm:$0xff] %v303_v21  }
  0x27   : > { %308 = vst [vmem:[%s5251_s30 + $0xb0] sm:$0xff] %v307_v22  }
  0x28   : > { %312 = vst [vmem:[%s5251_s30 + $0xb8] sm:$0xff] %v311_v23  }
  0x29   : > { %316 = vst [vmem:[%s5251_s30 + $0xc0] sm:$0xff] %v315_v24  }
  0x2a   : > { %320 = vst [vmem:[%s5251_s30 + $0xc8] sm:$0xff] %v319_v25  }
  0x2b   : > { %324 = vst [vmem:[%s5251_s30 + $0xd0] sm:$0xff] %v323_v26  }
  0x2c   : > { %328 = vst [vmem:[%s5251_s30 + $0xd8] sm:$0xff] %v327_v27  }
  0x2d   : > { %332 = vst [vmem:[%s5251_s30 + $0xe0] sm:$0xff] %v331_v28  }
  0x2e   : > { %336 = vst [vmem:[%s5251_s30 + $0xe8] sm:$0xff] %v335_v29  }
  0x2f   : > { %340 = vst [vmem:[%s5251_s30 + $0xf0] sm:$0xff] %v339_v30  }
  0x30   : > { %344 = vst [vmem:[%s5251_s30 + $0xf8] sm:$0xff] %v343_v31  }
  0x31   : > { %348 = vst [vmem:[%s5251_s30 + $0x100] sm:$0xff] %v347_v32  }
  0x32   : > { %352 = vst [vmem:[%s5251_s30 + $0x108] sm:$0xff] %v351_v33  }
  0x33   : > { %356 = vst [vmem:[%s5251_s30 + $0x110] sm:$0xff] %v355_v34  }
  0x34   : > { %360 = vst [vmem:[%s5251_s30 + $0x118] sm:$0xff] %v359_v35  }
  0x35   : > { %364 = vst [vmem:[%s5251_s30 + $0x120] sm:$0xff] %v363_v36  }
  0x36   : > { %368 = vst [vmem:[%s5251_s30 + $0x128] sm:$0xff] %v367_v37  }
  0x37   : > { %372 = vst [vmem:[%s5251_s30 + $0x130] sm:$0xff] %v371_v38  }
  0x38   : > { %376 = vst [vmem:[%s5251_s30 + $0x138] sm:$0xff] %v375_v39  }
  0x39   : > { %380 = vst [vmem:[%s5251_s30 + $0x140] sm:$0xff] %v379_v40  }
  0x3a   : > { %384 = vst [vmem:[%s5251_s30 + $0x148] sm:$0xff] %v383_v41  }
  0x3b   : > { %388 = vst [vmem:[%s5251_s30 + $0x150] sm:$0xff] %v387_v42  }
  0x3c   : > { %392 = vst [vmem:[%s5251_s30 + $0x158] sm:$0xff] %v391_v43  }
  0x3d   : > { %396 = vst [vmem:[%s5251_s30 + $0x160] sm:$0xff] %v395_v44  }
  0x3e   : > { %400 = vst [vmem:[%s5251_s30 + $0x168] sm:$0xff] %v399_v45  }
  0x3f   : > { %404 = vst [vmem:[%s5251_s30 + $0x170] sm:$0xff] %v403_v46  }
  0x40   : > { %408 = vst [vmem:[%s5251_s30 + $0x178] sm:$0xff] %v407_v47  }
  0x41   : > { %412 = vst [vmem:[%s5251_s30 + $0x180] sm:$0xff] %v411_v48  }
  0x42   : > { %416 = vst [vmem:[%s5251_s30 + $0x188] sm:$0xff] %v415_v49  }
  0x43   : > { %420 = vst [vmem:[%s5251_s30 + $0x190] sm:$0xff] %v419_v50  }
  0x44   : > { %424 = vst [vmem:[%s5251_s30 + $0x198] sm:$0xff] %v423_v51  }
  0x45   : > { %428 = vst [vmem:[%s5251_s30 + $0x1a0] sm:$0xff] %v427_v52  }
  0x46   : > { %432 = vst [vmem:[%s5251_s30 + $0x1a8] sm:$0xff] %v431_v53  }
  0x47 PF: > { %p4150_p6 = scmp.ge.s32.totalorder %s5175_s19, 1  ;;  %p673_p7 = scmp.lt.s32.totalorder %s5175_s19, 33 }
  0x49   : > { %p674_p8 = pnand %p4150_p6, %p673_p7 }
  0x4b   : > { %677 = sbr.rel (%p674_p8) target bundleno = 806 (0x326), region = 73 }
  0x50   : > { %v743_v54 = vld [vmem:[%s6776_s1] sm:$0x3]  ;;  %vm855_vm0 = vcmask 1040384   ;;  %vm856_vm1 = vcmask 1041408   ;;  %s680_s7 = sand.u32 1, %s5159_s15   ;;  %v5177_v55 = vmov 65535  }
  0x51   : > { %v857_v56 = vsel %vm855_vm0, 4294967295, %v5177_v55  ;;  %s5075_s8 = smul.u32 432, %s680_s7  ;;  %v4178_v57 = vld [vmem:[%s6776_s1 + $0x2] sm:$0x3]  ;;  %vm842_vm2 = vcmask 23552   ;;  %vm1447_vm4 = vcmask 1046528  }
  0x52   : > { %v5367_v58 = vsel %vm856_vm1, %v857_v56, 0  ;;  %vm805_vm3 = vsmask.f32 7424  ;;  %v4334_v50 = vld [vmem:[%s6776_s1 + $0x4] sm:$0x3] }
  0x53   : > { %v900_v59 = vand.u32 %v5367_v58, %v743_v54  ;;  %v860_v60 = vand.u32 %v4178_v57, %v5367_v58  ;;  %s5371_s11 = scalar_lea.vmem [#allocation2], %s5075_s8  ;;  %v1470_v52 = vand.u32 %v4334_v50, %v5367_v58  ;;  %s4151_s8 = sshll.u32 %s5167_s17, 2 }
  0x54   : > { %v4932_v61 = vld [vmem:[%s5371_s11] sm:$0xff]   ;;  %v5376_v63 = vld [vmem:[%s5371_s11 + $0x8] sm:$0xff]  ;;  %v5392_v15 = vld [vmem:[%s5371_s11 + $0x10] sm:$0xff]  ;;  %p731_p9 = scmp.lt.s32.totalorder %s4151_s8, 127 }
  0x55   : > { %v4854_v62 = vld [vmem:[%s5371_s11 + $0x24] sm:$0xff]  ;;  %909 = vmatpush.bf16.msra.mxu1 %v900_v59  ;;  %1079 = vmatpush.bf16.msra.mxu3 %v900_v59  ;;  %v807_v0 = vshrl.u32 %v4932_v61, 16  ;;  %v809_v1 = vshll.u32 %v4932_v61, 16  ;;  %v5383_v4 = vld [vmem:[%s5371_s11 + $0x2c] sm:$0xff]  ;;  %v814_v5 = vshll.u32 %v5376_v63, 16  ;;  %v818_v18 = vshrl.u32 %v5376_v63, 16 }
  0x56   : > { %v4199_v2 = vld [vmem:[%s5371_s11 + $0x24] sm:$0xff]   ;;  %869 = vmatpush.bf16.msra.mxu0 %v860_v60  ;;  %1018 = vmatpush.bf16.msra.mxu2 %v860_v60  ;;  %v971_v8 = vshll.u32 %v5383_v4, 16  ;;  %v822_v19 = vshll.u32 %v5392_v15, 16  ;;  %v5399_v20 = vld [vmem:[%s5371_s11 + $0x34] sm:$0xff]  ;;  %v4855_v21 = vld [vmem:[%s5371_s11 + $0x2c] sm:$0xff]  ;;  %v975_v24 = vshrl.u32 %v5383_v4, 16 }
  0x57   : > { %v5380_v3 = vld [vmem:[%s5371_s11 + $0x24] sm:$0xf0]  ;;  %v811_v6 = vrot.slane %v809_v1, 1  ;;  %v816_v7 = vrot.slane %v814_v5, 1  ;;  %v964_v10 = vshrl.u32 %v4199_v2, 16  ;;  %v966_v11 = vshll.u32 %v4199_v2, 16 }
  0x58   : > { %4195 = vmatmul.msk.bf16.vlgmr.msra.gmra.mxu1 %vm842_vm2, %v4932_v61  ;;  %4240 = vmatmul.msk.bf16.vlgmr.msra.gmra.mxu3 %vm842_vm2, %v4854_v62  ;;  %v973_v14 = vrot.slane %v971_v8, 1  ;;  %v824_v23 = vrot.slane %v822_v19, 1  ;;  %v979_v25 = vshll.u32 %v5399_v20, 16  ;;  %v5410_v29 = vld [vmem:[%s5371_s11 + $0x18] sm:$0xff]  ;;  %v826_v31 = vshrl.u32 %v5392_v15, 16  ;;  %v5035_v1 = vld [vmem:[%s5371_s11 + $0x48] sm:$0xff]  }
  0x59   : > { %1419 = vmatpush.bf16.msrb.mxu3 %v900_v59  ;;  %v812_v9 = vor.u32 %v811_v6, %v807_v0  ;;  %1249 = vmatpush.bf16.msrb.mxu1 %v900_v59  ;;  %v968_v13 = vrot.slane %v966_v11, 1  ;;  %v820_v22 = vor.u32 %v818_v18, %v816_v7  ;;  %v830_v32 = vshll.u32 %v5410_v29, 16  ;;  %v5417_v33 = vld [vmem:[%s5371_s11 + $0x3c] sm:$0xff]  ;;  %v4856_v34 = vld [vmem:[%s5371_s11 + $0x34] sm:$0xff]  ;;  %v4207_v44 = vld [vmem:[%s5371_s11 + $0x44] sm:$0x1] }
  0x5a   : > { %1358 = vmatpush.bf16.msrb.mxu2 %v860_v60  ;;  %1188 = vmatpush.bf16.msrb.mxu0 %v860_v60  ;;  %v977_v27 = vor.u32 %v975_v24, %v973_v14  ;;  %v981_v28 = vrot.slane %v979_v25, 1  ;;  %v828_v35 = vor.u32 %v826_v31, %v824_v23  ;;  %v983_v37 = vshrl.u32 %v5399_v20, 16  ;;  %v781_v39 = vld [vmem:[%s5371_s11 + $0x20] sm:$0x1]  ;;  %v4289_v59 = vld [vmem:[%s5371_s11 + $0x6c] sm:$0xff]   ;;  %v5471_v24 = vld [vmem:[%s5371_s11 + $0x58] sm:$0xff] }
  0x5b   : > { %v817_v12 = vsel %vm805_vm3, %v812_v9, %v816_v7  ;;  %v969_v16 = vor.u32 %v968_v13, %v964_v10  ;;  %v825_v26 = vsel %vm805_vm3, %v820_v22, %v824_v23  ;;  %v832_v36 = vrot.slane %v830_v32, 1  ;;  %v4857_v53 = vld [vmem:[%s5371_s11 + $0x3c] sm:$0xff]  ;;  %v5446_v60 = vld [vmem:[%s5371_s11 + $0x6c] sm:$0xf0]  ;;  %v5461_v10 = vld [vmem:[%s5371_s11 + $0x74] sm:$0xff]  ;;  %s6820_s8 = smov (!%p731_p9, %s4151_s8), 127 }
  0x5c   : > { %4191 = vmatmul.msk.bf16.vlgmr.msra.gmra.mxu0 %vm842_vm2, %v817_v12  ;;  %v982_v30 = vsel %vm805_vm3, %v977_v27, %v981_v28  ;;  %v987_v38 = vshll.u32 %v5417_v33, 16  ;;  %v799_v41 = vunpack.c.l.b16 %v781_v39  ;;  %v985_v42 = vor.u32 %v983_v37, %v981_v28  ;;  %v5455_v2 = vld [vmem:[%s5371_s11 + $0x50] sm:$0xff]  ;;  %v4858_v12 = vld [vmem:[%s5371_s11 + $0x48] sm:$0xff]  ;;  %v5478_v28 = vld [vmem:[%s5371_s11 + $0x7c] sm:$0xff]  ;;  %s4850_s17 = sshll.u32 %s6820_s8, 5 }
  0x5d   : > { %v974_v17 = vsel %vm805_vm3, %v969_v16, %v973_v14  ;;  %v833_v40 = vsel %vm805_vm3, %v828_v35, %v832_v36  ;;  %v957_v47 = vunpack.c.l.b16 %v4207_v44  ;;  %v834_v48 = vshrl.u32 %v5410_v29, 16  ;;  %1665 = vmatpush.bf16.msra.mxu3 %v1470_v52  ;;  %1541 = vmatpush.bf16.msra.mxu1 %v1470_v52  ;;  %v4862_v13 = vld [vmem:[%s5371_s11 + $0x6c] sm:$0xff]  ;;  %v4863_v31 = vld [vmem:[%s5371_s11 + $0x74] sm:$0xff]  ;;  %v5496_v44 = vld [vmem:[%s5371_s11 + $0x84] sm:$0xff]  ;;  %s6649_s13 = scalar_lea.vmem %s6779_s4, %s4850_s17 }
  0x5e   : > { %4220 = vmatmul.msk.bf16.vlgmr.msra.gmra.mxu2 %vm842_vm2, %v974_v17  ;;  %v989_v43 = vrot.slane %v987_v38, 1  ;;  %v5429_v45 = vpack.c.b16 %v799_v41, %v799_v41  ;;  %1479 = vmatpush.bf16.msra.mxu0 %v1470_v52  ;;  %v991_v56 = vshrl.u32 %v5417_v33, 16  ;;  %v1136_v5 = vshll.u32 %v5035_v1, 16 }
  0x5f   : > { %v5438_v51 = vpack.c.b16 %v957_v47, %v957_v47  ;;  %1603 = vmatpush.bf16.msra.mxu2 %v1470_v52  ;;  %v836_v54 = vor.u32 %v834_v48, %v832_v36  ;;  %v1134_v7 = vshrl.u32 %v5035_v1, 16  ;;  %v1141_v9 = vshll.u32 %v5455_v2, 16  ;;  %v4864_v47 = vld [vmem:[%s5371_s11 + $0x7c] sm:$0xff] }
  0x60   : > { %v990_v46 = vsel %vm805_vm3, %v985_v42, %v989_v43  ;;  %v838_v49 = vshll.u32 %v5429_v45, 16  ;;  %v993_v62 = vor.u32 %v991_v56, %v989_v43  ;;  %v1138_v8 = vrot.slane %v1136_v5, 1 }
  0x61   : > { %v995_v57 = vshll.u32 %v5438_v51, 16  ;;  %v1306_v11 = vshll.u32 %v4289_v59, 16  ;;  %v1143_v16 = vrot.slane %v1141_v9, 1  ;;  %v1304_v17 = vshrl.u32 %v4289_v59, 16  ;;  %v4297_v59 = vld [vmem:[%s5371_s11 + $0x8c] sm:$0x1] }
  0x62   : > { %v840_v55 = vrot.slane %v838_v49, 1  ;;  %v1139_v14 = vor.u32 %v1138_v8, %v1134_v7  ;;  %v1311_v19 = vshll.u32 %v5461_v10, 16  ;;  %v1149_v27 = vshll.u32 %v5471_v24, 16  ;;  %v4861_v9 = vld [vmem:[%s5371_s11 + $0x60] sm:$0xff] }
  0x63   : > { %v997_v0 = vrot.slane %v995_v57, 1  ;;  %v1308_v18 = vrot.slane %v1306_v11, 1  ;;  %v1315_v35 = vshrl.u32 %v5461_v10, 16  ;;  %v1319_v36 = vshll.u32 %v5478_v28, 16  ;;  %v4865_v11 = vld [vmem:[%s5371_s11 + $0x84] sm:$0xff] }
  0x64   : > { %v841_v61 = vsel %vm805_vm3, %v836_v54, %v840_v55  ;;  %v1313_v23 = vrot.slane %v1311_v19, 1  ;;  %v1153_v42 = vshrl.u32 %v5471_v24, 16  ;;  %v1323_v50 = vshrl.u32 %v5478_v28, 16 }
  0x65   : > { %v998_v6 = vsel %vm805_vm3, %v993_v62, %v997_v0  ;;  %v1309_v22 = vor.u32 %v1308_v18, %v1304_v17  ;;  %v1321_v39 = vrot.slane %v1319_v36, 1  ;;  %v1327_v52 = vshll.u32 %v5496_v44, 16  ;;  %v5120_v17 = vld [vmem:[%s5371_s11 + $0x24] sm:$0xe]  ;;  %v5123_v18 = vld [vmem:[%s5371_s11 + $0x6c] sm:$0xe] }
  0x66   : > { %v1317_v38 = vor.u32 %v1315_v35, %v1313_v23  ;;  %v1297_v0 = vunpack.c.l.b16 %v4297_v59  ;;  %v1638_v35 = vrot.slane %v5461_v10, 1 }
  0x67   : > { %v1314_v25 = vsel %vm805_vm3, %v1309_v22, %v1313_v23  ;;  %v1325_v56 = vor.u32 %v1323_v50, %v1321_v39  ;;  %v1329_v57 = vrot.slane %v1327_v52, 1  ;;  %v5121_v23 = vor.u32 %v5120_v17, %v5380_v3 }
  0x68   : > { %4196 = vmatmul.msk.bf16.gmra.mxu1 %vm842_vm2, %v5376_v63  ;;  %4241 = vmatmul.msk.bf16.gmra.mxu3 %vm842_vm2, %v4855_v21  ;;  %v1144_v21 = vsel %vm805_vm3, %v1139_v14, %v1143_v16  ;;  %v1322_v41 = vsel %vm805_vm3, %v1317_v38, %v1321_v39  ;;  %v5517_v7 = vpack.c.b16 %v1297_v0, %v1297_v0  ;;  %v1331_v14 = vshrl.u32 %v5496_v44, 16  ;;  %v5040_v38 = vld [vmem:[%s5371_s11 + $0x48] sm:$0xe] }
  0x69   : > { %v1330_v62 = vsel %vm805_vm3, %v1325_v56, %v1329_v57 }
  0x6c   : > { %4192 = vmatmul.msk.bf16.gmra.mxu0 %vm842_vm2, %v825_v26  ;;  %v1145_v26 = vshrl.u32 %v5455_v2, 16 }
  0x6e   : > { %4221 = vmatmul.msk.bf16.gmra.mxu2 %vm842_vm2, %v982_v30  ;;  %v4859_v30 = vld [vmem:[%s5371_s11 + $0x50] sm:$0xff]  ;;  %v1147_v32 = vor.u32 %v1145_v26, %v1143_v16  ;;  %v1335_v16 = vshll.u32 %v5517_v7, 16 }
  0x70   : > { %v1337_v22 = vrot.slane %v1335_v16, 1  ;;  %v1642_v16 = vrot.slane %v5496_v44, 1 }
  0x78   : > { %4197 = vmatmul.msk.bf16.gmra.mxu1 %vm842_vm2, %v5392_v15  ;;  %4242 = vmatmul.msk.bf16.gmra.mxu3 %vm842_vm2, %v4856_v34  ;;  %v1151_v34 = vrot.slane %v1149_v27, 1  ;;  %v5036_v27 = vld [vmem:[%s5371_s11] sm:$0xf0] }
  0x7a   : > { %v1152_v37 = vsel %vm805_vm3, %v1147_v32, %v1151_v34  ;;  %v1155_v48 = vor.u32 %v1153_v42, %v1151_v34  ;;  %v1513_v32 = vrot.slane %v5121_v23, 1  ;;  %v1449_v42 = vrot.slane %v5376_v63, 1 }
  0x7c   : > { %4193 = vmatmul.msk.bf16.gmra.mxu0 %vm842_vm2, %v833_v40  ;;  %v5489_v40 = vld [vmem:[%s5371_s11 + $0x60] sm:$0xff] }
  0x7d   : > { %v1157_v43 = vshll.u32 %v5489_v40, 16  ;;  %v1161_v1 = vshrl.u32 %v5489_v40, 16 }
  0x7e   : > { %4222 = vmatmul.msk.bf16.gmra.mxu2 %vm842_vm2, %v990_v46  ;;  %v4860_v46 = vld [vmem:[%s5371_s11 + $0x58] sm:$0xff] }
  0x7f   : > { %v1159_v49 = vrot.slane %v1157_v43, 1 }
  0x81   : > { %v1160_v54 = vsel %vm805_vm3, %v1155_v48, %v1159_v49  ;;  %v1576_v48 = vrot.slane %v5455_v2, 1 }
  0x88   : > { %4198 = vmatmul.msk.bf16.gmra.mxu1 %vm842_vm2, %v5410_v29  ;;  %4243 = vmatmul.msk.bf16.gmra.mxu3 %vm842_vm2, %v4857_v53  ;;  %v4252_v53 = vld [vmem:[%s5371_s11 + $0x68] sm:$0x1] }
  0x89   : > { %v1127_v55 = vunpack.c.l.b16 %v4252_v53  ;;  %v1516_v53 = vrot.slane %v5399_v20, 1 }
  0x8c   : > { %4194 = vmatmul.msk.bf16.gmra.mxu0 %vm842_vm2, %v841_v61  ;;  %v5508_v61 = vpack.c.b16 %v1127_v55, %v1127_v55 }
  0x8e   : > { %4223 = vmatmul.msk.bf16.gmra.mxu2 %vm842_vm2, %v998_v6  ;;  %v1165_v5 = vshll.u32 %v5508_v61, 16  ;;  %v4354_v6 = vld [vmem:[%s6776_s1 + $0x6] sm:$0x3] }
  0x8f   : > { %v1739_v8 = vand.u32 %v4354_v6, %v5367_v58  ;;  %v1578_v6 = vrot.slane %v5471_v24, 1 }
  0x98   : > { %4285 = vmatmul.msk.bf16.vlgmr.msrb.gmra.mxu1 %vm842_vm2, %v4858_v12  ;;  %4330 = vmatmul.msk.bf16.vlgmr.msrb.gmra.mxu3 %vm842_vm2, %v4862_v13  ;;  %v1163_v12 = vor.u32 %v1161_v1, %v1159_v49  ;;  %v1167_v13 = vrot.slane %v1165_v5, 1  ;;  %v1451_v1 = vrot.slane %v5392_v15, 1  ;;  %v1579_v15 = vsel %vm1447_vm4, %v1576_v48, %v1578_v6 }
  0x99   : > { %1982 = vmatpush.bf16.msrb.mxu3 %v1739_v8  ;;  %1826 = vmatpush.bf16.msrb.mxu1 %v1739_v8 }
  0x9a   : > { %v1168_v19 = vsel %vm805_vm3, %v1163_v12, %v1167_v13 }
  0x9c   : > { %4265 = vmatmul.msk.bf16.vlgmr.msrb.gmra.mxu0 %vm842_vm2, %v1144_v21  ;;  %v1333_v21 = vor.u32 %v1331_v14, %v1329_v57  ;;  %v1518_v14 = vrot.slane %v5417_v33, 1 }
  0x9d   : > { %1748 = vmatpush.bf16.msrb.mxu0 %v1739_v8 }
  0x9e   : > { %4310 = vmatmul.msk.bf16.vlgmr.msrb.gmra.mxu2 %vm842_vm2, %v1314_v25  ;;  %v5124_v25 = vor.u32 %v5123_v18, %v5446_v60  ;;  %v1338_v26 = vsel %vm805_vm3, %v1333_v21, %v1337_v22  ;;  %v1519_v22 = vsel %vm1447_vm4, %v1516_v53, %v1518_v14 }
  0x9f   : > { %1904 = vmatpush.bf16.msrb.mxu2 %v1739_v8 }
  0xa0   : > { %v1637_v34 = vrot.slane %v5124_v25, 1  ;;  %v1453_v25 = vrot.slane %v5410_v29, 1 }
  0xa2   : > { %v1639_v60 = vsel %vm1447_vm4, %v1637_v34, %v1638_v35  ;;  %v1454_v44 = vsel %vm1447_vm4, %v1451_v1, %v1453_v25 }
  0xa8   : > { %4286 = vmatmul.msk.bf16.gmra.mxu1 %vm842_vm2, %v4859_v30  ;;  %4331 = vmatmul.msk.bf16.gmra.mxu3 %vm842_vm2, %v4863_v31  ;;  %v5037_v30 = vld [vmem:[%s5371_s11] sm:$0xe]  ;;  %v1514_v31 = vrot.slane %v5383_v4, 1 }
  0xa9   : > { %v5038_v36 = vor.u32 %v5037_v30, %v5036_v27  ;;  %v1580_v27 = vrot.slane %v5489_v40, 1  ;;  %v4467_v40 = vld [vmem:[%s6776_s1 + $0x8] sm:$0x3] }
  0xaa   : > { %v1515_v3 = vsel %vm1447_vm4, %v1513_v32, %v1514_v31 }
  0xab   : > { %v1581_v29 = vsel %vm1447_vm4, %v1578_v6, %v1580_v27 }
  0xac   : > { %4266 = vmatmul.msk.bf16.gmra.mxu0 %vm842_vm2, %v1152_v37  ;;  %v5039_v37 = vld [vmem:[%s5371_s11 + $0x48] sm:$0xf0] }
  0xad   : > { %v5041_v43 = vor.u32 %v5040_v38, %v5039_v37  ;;  %v1644_v37 = vrot.slane %v5517_v7, 1  ;;  %v1455_v7 = vrot.slane %v5429_v45, 1 }
  0xae   : > { %4311 = vmatmul.msk.bf16.gmra.mxu2 %vm842_vm2, %v1322_v41  ;;  %v1448_v41 = vrot.slane %v5038_v36, 1  ;;  %v1520_v36 = vrot.slane %v5438_v51, 1 }
  0xaf   : > { %v1645_v51 = vsel %vm1447_vm4, %v1642_v16, %v1644_v37 }
  0xb0   : > { %v1450_v10 = vsel %vm1447_vm4, %v1448_v41, %v1449_v42 }
  0xb8   : > { %4287 = vmatmul.msk.bf16.gmra.mxu1 %vm842_vm2, %v4860_v46  ;;  %4332 = vmatmul.msk.bf16.gmra.mxu3 %vm842_vm2, %v4864_v47  ;;  %v1575_v47 = vrot.slane %v5041_v43, 1  ;;  %v1521_v43 = vsel %vm1447_vm4, %v1518_v14, %v1520_v36 }
  0xba   : > { %v1577_v52 = vsel %vm1447_vm4, %v1575_v47, %v1576_v48  ;;  %v1582_v48 = vrot.slane %v5508_v61, 1  ;;  %v4887_v61 = vld [vmem:[%s5371_s11 + $0xfc] sm:$0xff] }
  0xbc   : > { %4267 = vmatmul.msk.bf16.gmra.mxu0 %vm842_vm2, %v1160_v54  ;;  %v1640_v54 = vrot.slane %v5478_v28, 1  ;;  %v1452_v28 = vsel %vm1447_vm4, %v1449_v42, %v1451_v1  ;;  %v4875_v1 = vld [vmem:[%s5371_s11 + $0x90] sm:$0xff] }
  0xbe   : > { %4312 = vmatmul.msk.bf16.gmra.mxu2 %vm842_vm2, %v1330_v62  ;;  %v1517_v62 = vsel %vm1447_vm4, %v1514_v31, %v1516_v53  ;;  %v1641_v0 = vsel %vm1447_vm4, %v1638_v35, %v1640_v54  ;;  %v1643_v23 = vsel %vm1447_vm4, %v1640_v54, %v1642_v16 }
  0xc8   : > { %4288 = vmatmul.msk.bf16.gmra.mxu1 %vm842_vm2, %v4861_v9  ;;  %4333 = vmatmul.msk.bf16.gmra.mxu3 %vm842_vm2, %v4865_v11 }
  0xcc   : > { %4268 = vmatmul.msk.bf16.gmra.mxu0 %vm842_vm2, %v1168_v19 }
  0xce   : > { %4313 = vmatmul.msk.bf16.gmra.mxu2 %vm842_vm2, %v1338_v26 }
  0xd5   : > { %v911_v39 = vpop.f32.mrf.mxu1 }
  0xd8   : > { %4340 = vmatmul.msk.bf16.vlgmr.msra.gmra.mxu1 %vm842_vm2, %v1515_v3  ;;  %4350 = vmatmul.msk.bf16.vlgmr.msra.gmra.mxu3 %vm842_vm2, %v1639_v60 }
  0xd9   : > { %v871_v4 = vpop.f32.mrf.mxu0 }
  0xda   : > { %v5546_v46 = vadd.f32 %v911_v39, %v871_v4  ;;  %v2095_v39 = vand.u32 %v4467_v40, %v5367_v58 }
  0xdb   : > { %v1081_v49 = vpop.f32.mrf.mxu3 }
  0xdc   : > { %4335 = vmatmul.msk.bf16.vlgmr.msra.gmra.mxu0 %vm842_vm2, %v1450_v10  ;;  %2455 = vmatpush.bf16.msra.mxu3 %v2095_v39  ;;  %v1456_v10 = vsel %vm1447_vm4, %v1453_v25, %v1455_v7  ;;  %v4876_v25 = vld [vmem:[%s5371_s11 + $0x98] sm:$0xff] }
  0xdd   : > { %v913_v50 = vpop.f32.mrf.mxu1  ;;  %2104 = vmatpush.bf16.msra.mxu0 %v2095_v39  ;;  %2221 = vmatpush.bf16.msra.mxu1 %v2095_v39 }
  0xde   : > { %4345 = vmatmul.msk.bf16.vlgmr.msra.gmra.mxu2 %vm842_vm2, %v1577_v52 }
  0xdf   : > { %2338 = vmatpush.bf16.msra.mxu2 %v2095_v39  ;;  %v4881_v39 = vld [vmem:[%s5371_s11 + $0xc4] sm:$0xff] }
  0xe1   : > { %v873_v63 = vpop.f32.mrf.mxu0  ;;  %v1020_v57 = vpop.f32.mrf.mxu2 }
  0xe2   : > { %v5554_v55 = vadd.f32 %v913_v50, %v873_v63  ;;  %v5556_v59 = vadd.f32 %v1081_v49, %v1020_v57  ;;  %v1583_v63 = vsel %vm1447_vm4, %v1580_v27, %v1582_v48 }
  0xe3   : > { %v1083_v56 = vpop.f32.mrf.mxu3 }
  0xe5   : > { %v916_v2 = vpop.f32.mrf.mxu1 }
  0xe8   : > { %4341 = vmatmul.msk.bf16.gmra.mxu1 %vm842_vm2, %v1517_v62  ;;  %4351 = vmatmul.msk.bf16.gmra.mxu3 %vm842_vm2, %v1641_v0 }
  0xe9   : > { %v876_v20 = vpop.f32.mrf.mxu0  ;;  %v1022_v9 = vpop.f32.mrf.mxu2 }
  0xea   : > { %v5564_v5 = vadd.f32 %v916_v2, %v876_v20  ;;  %v5568_v11 = vadd.f32 %v1083_v56, %v1022_v9  ;;  %v4879_v2 = vld [vmem:[%s5371_s11 + $0xb4] sm:$0xff] }
  0xeb   : > { %v1086_v8 = vpop.f32.mrf.mxu3 }
  0xec   : > { %4336 = vmatmul.msk.bf16.gmra.mxu0 %vm842_vm2, %v1452_v28 }
  0xed   : > { %v918_v12 = vpop.f32.mrf.mxu1 }
  0xee   : > { %4346 = vmatmul.msk.bf16.gmra.mxu2 %vm842_vm2, %v1579_v15  ;;  %v4883_v15 = vld [vmem:[%s5371_s11 + $0xd8] sm:$0xff] }
  0xf1   : > { %v878_v13 = vpop.f32.mrf.mxu0  ;;  %v1025_v24 = vpop.f32.mrf.mxu2 }
  0xf2   : > { %v5574_v17 = vadd.f32 %v918_v12, %v878_v13  ;;  %v5576_v19 = vadd.f32 %v1086_v8, %v1025_v24  ;;  %v4880_v24 = vld [vmem:[%s5371_s11 + $0xbc] sm:$0xff] }
  0xf3   : > { %v1088_v18 = vpop.f32.mrf.mxu3 }
  0xf5   : > { %v921_v21 = vpop.f32.mrf.mxu1 }
  0xf8   : > { %4342 = vmatmul.msk.bf16.gmra.mxu1 %vm842_vm2, %v1519_v22  ;;  %4352 = vmatmul.msk.bf16.gmra.mxu3 %vm842_vm2, %v1643_v23 }
  0xf9   : > { %v881_v33 = vpop.f32.mrf.mxu0  ;;  %v1027_v31 = vpop.f32.mrf.mxu2 }
  0xfa   : > { %v5584_v26 = vadd.f32 %v921_v21, %v881_v33  ;;  %v5588_v32 = vadd.f32 %v1088_v18, %v1027_v31  ;;  %v4888_v21 = vld [vmem:[%s5371_s11 + $0x104] sm:$0xff] }
  0xfb   : > { %v1091_v30 = vpop.f32.mrf.mxu3 }
  0xfc   : > { %4337 = vmatmul.msk.bf16.gmra.mxu0 %vm842_vm2, %v1454_v44 }
  0xfd   : > { %v923_v34 = vpop.f32.mrf.mxu1 }
  0xfe   : > { %4347 = vmatmul.msk.bf16.gmra.mxu2 %vm842_vm2, %v1581_v29  ;;  %v4884_v29 = vld [vmem:[%s5371_s11 + $0xe0] sm:$0xff] }
 0x101   : > { %v883_v35 = vpop.f32.mrf.mxu0  ;;  %v1030_v60 = vpop.f32.mrf.mxu2 }
 0x102   : > { %v5597_v38 = vadd.f32 %v923_v34, %v883_v35  ;;  %v5600_v41 = vadd.f32 %v1091_v30, %v1030_v60 }
 0x103   : > { %v1093_v3 = vpop.f32.mrf.mxu3 }
 0x105   : > { %v926_v42 = vpop.f32.mrf.mxu1 }
 0x108   : > { %4343 = vmatmul.msk.bf16.gmra.mxu1 %vm842_vm2, %v1521_v43  ;;  %4353 = vmatmul.msk.bf16.gmra.mxu3 %vm842_vm2, %v1645_v51  ;;  %v4877_v43 = vld [vmem:[%s5371_s11 + $0xa0] sm:$0xff] }
 0x109   : > { %v886_v4 = vpop.f32.mrf.mxu0  ;;  %v1032_v50 = vpop.f32.mrf.mxu2 }
 0x10a   : > { %v5608_v47 = vadd.f32 %v926_v42, %v886_v4  ;;  %v5612_v45 = vadd.f32 %v1093_v3, %v1032_v50  ;;  %v4889_v3 = vld [vmem:[%s5371_s11 + $0x10c] sm:$0xff] }
 0x10b   : > { %v1096_v49 = vpop.f32.mrf.mxu3  ;;  %v4885_v50 = vld [vmem:[%s5371_s11 + $0xe8] sm:$0xff] }
 0x10c   : > { %4338 = vmatmul.msk.bf16.gmra.mxu0 %vm842_vm2, %v1456_v10 }
 0x10d   : > { %v928_v52 = vpop.f32.mrf.mxu1 }
 0x10e   : > { %4348 = vmatmul.msk.bf16.gmra.mxu2 %vm842_vm2, %v1583_v63  ;;  %v5665_v63 = vld [vmem:[%s5371_s11 + $0xb4] sm:$0xf0] }
 0x111   : > { %v888_v53 = vpop.f32.mrf.mxu0  ;;  %v1035_v57 = vpop.f32.mrf.mxu2 }
 0x112   : > { %v5616_v54 = vadd.f32 %v928_v52, %v888_v53  ;;  %v5620_v62 = vadd.f32 %v1096_v49, %v1035_v57  ;;  %v4493_v52 = vld [vmem:[%s5371_s11 + $0xb4] sm:$0xff]   ;;  %v4543_v53 = vld [vmem:[%s5371_s11 + $0xfc] sm:$0xff]  }
 0x113   : > { %v1098_v56 = vpop.f32.mrf.mxu3 }
 0x115   : > { %v1251_v0 = vpop.f32.mrf.mxu1 }
 0x118   : > { %4407 = vmatmul.msk.bf16.vlgmr.msrb.gmra.mxu1 %vm842_vm2, %v4879_v2  ;;  %4463 = vmatmul.msk.bf16.vlgmr.msrb.gmra.mxu3 %vm842_vm2, %v4887_v61  ;;  %v4568_v2 = vld [vmem:[%s6776_s1 + $0xa] sm:$0x3] }
 0x119   : > { %v1190_v20 = vpop.f32.mrf.mxu0  ;;  %v1037_v8 = vpop.f32.mrf.mxu2 }
 0x11a   : > { %v5625_v28 = vadd.f32 %v1251_v0, %v1190_v20  ;;  %v5628_v9 = vadd.f32 %v1098_v56, %v1037_v8  ;;  %v5669_v56 = vld [vmem:[%s5371_s11 + $0xfc] sm:$0xf0]  ;;  %v2513_v0 = vand.u32 %v4568_v2, %v5367_v58  ;;  %v4890_v8 = vld [vmem:[%s5371_s11 + $0x114] sm:$0xff] }
 0x11b   : > { %v1421_v6 = vpop.f32.mrf.mxu3 }
 0x11c   : > { %4379 = vmatmul.msk.bf16.vlgmr.msrb.gmra.mxu0 %vm842_vm2, %v4875_v1  ;;  %2708 = vmatpush.bf16.msrb.mxu3 %v2513_v0 }
 0x11d   : > { %v1253_v12 = vpop.f32.mrf.mxu1  ;;  %2522 = vmatpush.bf16.msrb.mxu0 %v2513_v0  ;;  %2584 = vmatpush.bf16.msrb.mxu1 %v2513_v0 }
 0x11e   : > { %4435 = vmatmul.msk.bf16.vlgmr.msrb.gmra.mxu2 %vm842_vm2, %v4883_v15 }
 0x11f   : > { %2646 = vmatpush.bf16.msrb.mxu2 %v2513_v0 }
 0x121   : > { %v1192_v13 = vpop.f32.mrf.mxu0  ;;  %v1360_v18 = vpop.f32.mrf.mxu2 }
 0x122   : > { %v5632_v14 = vadd.f32 %v1253_v12, %v1192_v13  ;;  %v5636_v22 = vadd.f32 %v1421_v6, %v1360_v18  ;;  %v4882_v6 = vld [vmem:[%s5371_s11 + $0xcc] sm:$0xff]  ;;  %v2169_v18 = vshll.u32 %v4493_v52, 16 }
 0x123   : > { %v1423_v16 = vpop.f32.mrf.mxu3  ;;  %v4878_v13 = vld [vmem:[%s5371_s11 + $0xa8] sm:$0xff] }
 0x125   : > { %v1256_v23 = vpop.f32.mrf.mxu1 }
 0x128   : > { %4408 = vmatmul.msk.bf16.gmra.mxu1 %vm842_vm2, %v4880_v24  ;;  %4464 = vmatmul.msk.bf16.gmra.mxu3 %vm842_vm2, %v4888_v21  ;;  %v2403_v24 = vshll.u32 %v4543_v53, 16 }
 0x129   : > { %v1195_v33 = vpop.f32.mrf.mxu0  ;;  %v1362_v30 = vpop.f32.mrf.mxu2 }
 0x12a   : > { %v5641_v44 = vadd.f32 %v1256_v23, %v1195_v33  ;;  %v5644_v31 = vadd.f32 %v1423_v16, %v1362_v30  ;;  %v5686_v16 = vld [vmem:[%s5371_s11 + $0xbc] sm:$0xff]  ;;  %v5689_v23 = vld [vmem:[%s5371_s11 + $0x104] sm:$0xff]  ;;  %v5042_v33 = vld [vmem:[%s5371_s11 + $0x90] sm:$0xff]   ;;  %v2167_v30 = vshrl.u32 %v4493_v52, 16 }
 0x12b   : > { %v1426_v27 = vpop.f32.mrf.mxu3 }
 0x12c   : > { %4380 = vmatmul.msk.bf16.gmra.mxu0 %vm842_vm2, %v4876_v25 }
 0x12d   : > { %v1258_v34 = vpop.f32.mrf.mxu1 }
 0x12e   : > { %4436 = vmatmul.msk.bf16.gmra.mxu2 %vm842_vm2, %v4884_v29  ;;  %v2171_v29 = vrot.slane %v2169_v18, 1 }
 0x131   : > { %v1197_v35 = vpop.f32.mrf.mxu0  ;;  %v1365_v40 = vpop.f32.mrf.mxu2 }
 0x132   : > { %v5648_v36 = vadd.f32 %v1258_v34, %v1197_v35  ;;  %v5652_v60 = vadd.f32 %v1426_v27, %v1365_v40  ;;  %v2174_v35 = vshll.u32 %v5686_v16, 16  ;;  %v2405_v40 = vrot.slane %v2403_v24, 1 }
 0x133   : > { %v1428_v37 = vpop.f32.mrf.mxu3 }
 0x135   : > { %v1261_v42 = vpop.f32.mrf.mxu1 }
 0x138   : > { %4409 = vmatmul.msk.bf16.gmra.mxu1 %vm842_vm2, %v4881_v39  ;;  %4465 = vmatmul.msk.bf16.gmra.mxu3 %vm842_vm2, %v4889_v3 }
 0x139   : > { %v1200_v51 = vpop.f32.mrf.mxu0  ;;  %v1367_v10 = vpop.f32.mrf.mxu2 }
 0x13a   : > { %v5657_v7 = vadd.f32 %v1261_v42, %v1200_v51  ;;  %v5660_v48 = vadd.f32 %v1428_v37, %v1367_v10  ;;  %v2401_v37 = vshrl.u32 %v4543_v53, 16  ;;  %v4886_v42 = vld [vmem:[%s5371_s11 + $0xf0] sm:$0xff]  ;;  %v5701_v51 = vld [vmem:[%s5371_s11 + $0x98] sm:$0xff]  ;;  %v2047_v53 = vshrl.u32 %v5042_v33, 16 }
 0x13b   : > { %v1431_v4 = vpop.f32.mrf.mxu3  ;;  %v5043_v10 = vld [vmem:[%s5371_s11 + $0xd8] sm:$0xff]  }
 0x13c   : > { %4381 = vmatmul.msk.bf16.gmra.mxu0 %vm842_vm2, %v4877_v43  ;;  %v2408_v43 = vshll.u32 %v5689_v23, 16  ;;  %v2406_v52 = vor.u32 %v2405_v40, %v2401_v37 }
 0x13d   : > { %v1263_v49 = vpop.f32.mrf.mxu1 }
 0x13e   : > { %4437 = vmatmul.msk.bf16.gmra.mxu2 %vm842_vm2, %v4885_v50  ;;  %v2176_v50 = vrot.slane %v2174_v35, 1  ;;  %v2410_v2 = vrot.slane %v2408_v43, 1  ;;  %v2284_v35 = vshrl.u32 %v5043_v10, 16  ;;  %v5726_v43 = vld [vmem:[%s5371_s11 + $0x10c] sm:$0xff] }
 0x141   : > { %v1202_v57 = vpop.f32.mrf.mxu0  ;;  %v1370_v20 = vpop.f32.mrf.mxu2 }
 0x142   : > { %v5675_v61 = vadd.f32 %v1263_v49, %v1202_v57  ;;  %v5680_v12 = vadd.f32 %v1431_v4, %v1370_v20  ;;  %v2049_v4 = vshll.u32 %v5042_v33, 16  ;;  %v2172_v49 = vor.u32 %v2171_v29, %v2167_v30 }
 0x143   : > { %v1433_v1 = vpop.f32.mrf.mxu3  ;;  %v2411_v30 = vsel %vm805_vm3, %v2406_v52, %v2410_v2 }
 0x144   : > { %v2051_v0 = vrot.slane %v2049_v4, 1  ;;  %v2177_v18 = vsel %vm805_vm3, %v2172_v49, %v2176_v50 }
 0x145   : > { %v1266_v15 = vpop.f32.mrf.mxu1 }
 0x146   : > { %v2052_v33 = vor.u32 %v2051_v0, %v2047_v53  ;;  %v2178_v53 = vshrl.u32 %v5686_v16, 16 }
 0x148   : > { %4410 = vmatmul.msk.bf16.gmra.mxu1 %vm842_vm2, %v4882_v6  ;;  %4466 = vmatmul.msk.bf16.gmra.mxu3 %vm842_vm2, %v4890_v8  ;;  %v5709_v6 = vld [vmem:[%s5371_s11 + $0xe0] sm:$0xff]  ;;  %v2286_v8 = vshll.u32 %v5043_v10, 16 }
 0x149   : > { %v1205_v21 = vpop.f32.mrf.mxu0  ;;  %v1372_v34 = vpop.f32.mrf.mxu2  ;;  %v2291_v40 = vshll.u32 %v5709_v6, 16 }
 0x14a   : > { %v5691_v25 = vadd.f32 %v1266_v15, %v1205_v21  ;;  %v5696_v39 = vadd.f32 %v1433_v1, %v1372_v34  ;;  %v2054_v1 = vshll.u32 %v5701_v51, 16  ;;  %v2288_v37 = vrot.slane %v2286_v8, 1 }
 0x14b   : > { %v1436_v27 = vpop.f32.mrf.mxu3  ;;  %v2293_v10 = vrot.slane %v2291_v40, 1  ;;  %v2058_v40 = vshrl.u32 %v5701_v51, 16 }
 0x14c   : > { %4382 = vmatmul.msk.bf16.gmra.mxu0 %vm842_vm2, %v4878_v13  ;;  %v2056_v34 = vrot.slane %v2054_v1, 1 }
 0x14d   : > { %v1268_v3 = vpop.f32.mrf.mxu1 }
 0x14e   : > { %4438 = vmatmul.msk.bf16.gmra.mxu2 %vm842_vm2, %v4886_v42  ;;  %v2057_v42 = vsel %vm805_vm3, %v2052_v33, %v2056_v34 }
 0x151   : > { %v1207_v57 = vpop.f32.mrf.mxu0  ;;  %v1375_v13 = vpop.f32.mrf.mxu2 }
 0x152   : > { %v5706_v20 = vadd.f32 %v1268_v3, %v1207_v57  ;;  %v5712_v24 = vadd.f32 %v1436_v27, %v1375_v13  ;;  %v5722_v3 = vld [vmem:[%s5371_s11 + $0xc4] sm:$0xff]  ;;  %v2416_v13 = vshll.u32 %v5726_v43, 16 }
 0x153   : > { %v1438_v15 = vpop.f32.mrf.mxu3  ;;  %v2182_v0 = vshll.u32 %v5722_v3, 16 }
 0x155   : > { %v1543_v21 = vpop.f32.mrf.mxu1  ;;  %v2184_v33 = vrot.slane %v2182_v0, 1 }
 0x156   : > { %v5716_v29 = vadd.f32 %v1543_v21, %v5556_v59  ;;  %v2289_v59 = vor.u32 %v2288_v37, %v2284_v35  ;;  %v2418_v37 = vrot.slane %v2416_v13, 1  ;;  %v2295_v13 = vshrl.u32 %v5709_v6, 16 }
 0x158   : > { %4514 = vmatmul.msk.bf16.vlgmr.msra.gmra.mxu1 %vm842_vm2, %v2177_v18  ;;  %4564 = vmatmul.msk.bf16.vlgmr.msra.gmra.mxu3 %vm842_vm2, %v2411_v30  ;;  %v5742_v18 = vld [vmem:[%s5371_s11 + $0xa0] sm:$0xff]  ;;  %v2180_v30 = vor.u32 %v2178_v53, %v2176_v50 }
 0x159   : > { %v1481_v27 = vpop.f32.mrf.mxu0  ;;  %v1377_v52 = vpop.f32.mrf.mxu2 }
 0x15a   : > { %v5729_v4 = vadd.f32 %v1481_v27, %v5546_v46  ;;  %v5737_v1 = vadd.f32 %v1438_v15, %v1377_v52  ;;  %v2412_v46 = vshrl.u32 %v5689_v23, 16  ;;  %v2062_v27 = vshll.u32 %v5742_v18, 16 }
 0x15b   : > { %v1667_v49 = vpop.f32.mrf.mxu3  ;;  %v2185_v52 = vsel %vm805_vm3, %v2180_v30, %v2184_v33 }
 0x15c   : > { %v5732_v57 = vadd.f32 %v1667_v49, %v5636_v22  ;;  %4489 = vmatmul.msk.bf16.vlgmr.msra.gmra.mxu0 %vm842_vm2, %v2057_v42  ;;  %v2294_v22 = vsel %vm805_vm3, %v2289_v59, %v2293_v10  ;;  %v2414_v15 = vor.u32 %v2412_v46, %v2410_v2  ;;  %v5755_v49 = vld [vmem:[%s5371_s11 + $0xe8] sm:$0xff] }
 0x15d   : > { %v1545_v8 = vpop.f32.mrf.mxu1 }
 0x15e   : > { %v5745_v21 = vadd.f32 %v1545_v8, %v5568_v11  ;;  %4539 = vmatmul.msk.bf16.vlgmr.msra.gmra.mxu2 %vm842_vm2, %v2294_v22  ;;  %v2419_v0 = vsel %vm805_vm3, %v2414_v15, %v2418_v37  ;;  %v2060_v8 = vor.u32 %v2058_v40, %v2056_v34  ;;  %v2299_v22 = vshll.u32 %v5755_v49, 16 }
 0x160   : > { %v2301_v15 = vrot.slane %v2299_v22, 1 }
 0x161   : > { %v1483_v35 = vpop.f32.mrf.mxu0  ;;  %v1605_v59 = vpop.f32.mrf.mxu2 }
 0x162   : > { %v5752_v42 = vadd.f32 %v1483_v35, %v5554_v55  ;;  %v5762_v2 = vadd.f32 %v1605_v59, %v5625_v28  ;;  %v2064_v55 = vrot.slane %v2062_v27, 1  ;;  %v5776_v28 = vld [vmem:[%s5371_s11 + $0x114] sm:$0xff]  ;;  %v2186_v27 = vshrl.u32 %v5722_v3, 16 }
 0x163   : > { %v1669_v11 = vpop.f32.mrf.mxu3 }
 0x164   : > { %v5758_v50 = vadd.f32 %v1669_v11, %v5644_v31  ;;  %v5773_v31 = vld [vmem:[%s5371_s11 + $0xcc] sm:$0xff]  ;;  %v2065_v34 = vsel %vm805_vm3, %v2060_v8, %v2064_v55  ;;  %v2188_v22 = vor.u32 %v2186_v27, %v2184_v33 }
 0x165   : > { %v1548_v53 = vpop.f32.mrf.mxu1  ;;  %v5794_v8 = vld [vmem:[%s5371_s11 + $0xa8] sm:$0xff] }
 0x166   : > { %v5766_v46 = vadd.f32 %v1548_v53, %v5576_v19  ;;  %v2297_v19 = vor.u32 %v2295_v13, %v2293_v10  ;;  %v2420_v53 = vshrl.u32 %v5726_v43, 16 }
 0x168   : > { %6783 = vst [vmem:[#allocation3_spill] sm:$0xff] %v5766_v46  ;;  %4515 = vmatmul.msk.bf16.gmra.mxu1 %vm842_vm2, %v2185_v52  ;;  %4565 = vmatmul.msk.bf16.gmra.mxu3 %vm842_vm2, %v2419_v0  ;;  %v2190_v52 = vshll.u32 %v5773_v31, 16  ;;  %v2424_v0 = vshll.u32 %v5776_v28, 16  ;;  %v2302_v13 = vsel %vm805_vm3, %v2297_v19, %v2301_v15  ;;  %v5808_v46 = vld [vmem:[%s5371_s11 + $0xf0] sm:$0xff] }
 0x169   : > { %v1486_v30 = vpop.f32.mrf.mxu0  ;;  %v1607_v11 = vpop.f32.mrf.mxu2 }
 0x16a   : > { %v5780_v35 = vadd.f32 %v1486_v30, %v5564_v5  ;;  %v5791_v5 = vadd.f32 %v1607_v11, %v5632_v14  ;;  %v2192_v30 = vrot.slane %v2190_v52, 1  ;;  %v2070_v14 = vshll.u32 %v5794_v8, 16  ;;  %v4501_v11 = vld [vmem:[%s5371_s11 + $0xd4] sm:$0x1] }
 0x16b   : > { %v1672_v40 = vpop.f32.mrf.mxu3 }
 0x16c   : > { %6784 = vst [vmem:[#allocation4_spill] sm:$0xff] %v5780_v35  ;;  %v5784_v59 = vadd.f32 %v1672_v40, %v5652_v60  ;;  %4490 = vmatmul.msk.bf16.gmra.mxu0 %vm842_vm2, %v2065_v34  ;;  %v2422_v34 = vor.u32 %v2420_v53, %v2418_v37  ;;  %v2426_v40 = vrot.slane %v2424_v0, 1  ;;  %v2066_v35 = vshrl.u32 %v5742_v18, 16 }
 0x16d   : > { %6786 = vst [vmem:[#allocation6_spill] sm:$0xff] %v5791_v5  ;;  %v1550_v10 = vpop.f32.mrf.mxu1  ;;  %v2193_v27 = vsel %vm805_vm3, %v2188_v22, %v2192_v30  ;;  %v2160_v53 = vunpack.c.l.b16 %v4501_v11 }
 0x16e   : > { %6785 = vst [vmem:[#allocation5_spill] sm:$0xff] %v5784_v59  ;;  %v5797_v60 = vadd.f32 %v1550_v10, %v5588_v32  ;;  %4540 = vmatmul.msk.bf16.gmra.mxu2 %vm842_vm2, %v2302_v13  ;;  %v4551_v32 = vld [vmem:[%s5371_s11 + $0x11c] sm:$0x1]  ;;  %v2427_v52 = vsel %vm805_vm3, %v2422_v34, %v2426_v40 }
 0x16f   : > { %v2394_v13 = vunpack.c.l.b16 %v4551_v32  ;;  %v5827_v22 = vpack.c.b16 %v2160_v53, %v2160_v53 }
 0x170   : > { %6787 = vst [vmem:[#allocation7_spill] sm:$0xff] %v5797_v60  ;;  %v2303_v60 = vshrl.u32 %v5755_v49, 16 }
 0x171   : > { %v1488_v59 = vpop.f32.mrf.mxu0  ;;  %v1610_v33 = vpop.f32.mrf.mxu2  ;;  %6789 = vst [vmem:[#allocation9_spill] sm:$0xff] %v5827_v22  ;;  %v2198_v53 = vshll.u32 %v5827_v22, 16  ;;  %v2074_v22 = vshrl.u32 %v5794_v8, 16 }
 0x172   : > { %v5805_v5 = vadd.f32 %v1488_v59, %v5574_v17  ;;  %v5817_v0 = vadd.f32 %v1610_v33, %v5641_v44  ;;  %v2068_v17 = vor.u32 %v2066_v35, %v2064_v55  ;;  %v2072_v59 = vrot.slane %v2070_v14, 1  ;;  %v4526_v33 = vld [vmem:[%s5371_s11 + $0xf8] sm:$0x1] }
 0x173   : > { %v1674_v19 = vpop.f32.mrf.mxu3  ;;  %v5830_v35 = vpack.c.b16 %v2394_v13, %v2394_v13  ;;  %v2305_v14 = vor.u32 %v2303_v60, %v2301_v15 }
 0x174   : > { %6788 = vst [vmem:[#allocation8_spill] sm:$0xff] %v5805_v5  ;;  %v5812_v37 = vadd.f32 %v1674_v19, %v5660_v48  ;;  %v2307_v48 = vshll.u32 %v5808_v46, 16  ;;  %v4476_v19 = vld [vmem:[%s5371_s11 + $0xb0] sm:$0x1]  ;;  %v2073_v55 = vsel %vm805_vm3, %v2068_v17, %v2072_v59 }
 0x175   : > { %v1553_v10 = vpop.f32.mrf.mxu1  ;;  %v2040_v34 = vunpack.c.l.b16 %v4476_v19  ;;  %v2432_v15 = vshll.u32 %v5830_v35, 16  ;;  %v2277_v19 = vunpack.c.l.b16 %v4526_v33 }
 0x176   : > { %v5820_v5 = vadd.f32 %v1553_v10, %v5600_v41  ;;  %v2309_v11 = vrot.slane %v2307_v48, 1 }
 0x177   : > { %v5847_v60 = vpack.c.b16 %v2040_v34, %v2040_v34 }
 0x178   : > { %4516 = vmatmul.msk.bf16.gmra.mxu1 %vm842_vm2, %v2193_v27  ;;  %4566 = vmatmul.msk.bf16.gmra.mxu3 %vm842_vm2, %v2427_v52  ;;  %v2194_v52 = vshrl.u32 %v5773_v31, 16 }
 0x179   : > { %v1491_v44 = vpop.f32.mrf.mxu0  ;;  %v1612_v10 = vpop.f32.mrf.mxu2 }
 0x17a   : > { %v5833_v41 = vadd.f32 %v1491_v44, %v5584_v26  ;;  %v5843_v17 = vadd.f32 %v1612_v10, %v5648_v36  ;;  %v2428_v26 = vshrl.u32 %v5776_v28, 16  ;;  %v2196_v44 = vor.u32 %v2194_v52, %v2192_v30 }
 0x17b   : > { %v1677_v32 = vpop.f32.mrf.mxu3  ;;  %v2434_v10 = vrot.slane %v2432_v15, 1  ;;  %v2076_v15 = vor.u32 %v2074_v22, %v2072_v59 }
 0x17c   : > { %v5837_v27 = vadd.f32 %v1677_v32, %v5680_v12  ;;  %4491 = vmatmul.msk.bf16.gmra.mxu0 %vm842_vm2, %v2073_v55  ;;  %6790 = vst [vmem:[#allocation10_spill] sm:$0xff] %v5843_v17  ;;  %v2310_v12 = vsel %vm805_vm3, %v2305_v14, %v2309_v11  ;;  %v2200_v55 = vrot.slane %v2198_v53, 1  ;;  %v2430_v36 = vor.u32 %v2428_v26, %v2426_v40 }
 0x17d   : > { %v1555_v13 = vpop.f32.mrf.mxu1  ;;  %v2078_v17 = vshll.u32 %v5847_v60, 16  ;;  %v5862_v14 = vpack.c.b16 %v2277_v19, %v2277_v19  ;;  %v5126_v19 = vld [vmem:[%s5371_s11 + $0xb4] sm:$0xe] }
 0x17e   : > { %v5850_v48 = vadd.f32 %v1555_v13, %v5612_v45  ;;  %4541 = vmatmul.msk.bf16.gmra.mxu2 %vm842_vm2, %v2310_v12  ;;  %v4589_v45 = vld [vmem:[%s6776_s1 + $0xc] sm:$0x3]  ;;  %v2201_v53 = vsel %vm805_vm3, %v2196_v44, %v2200_v55 }
 0x17f   : > { %v2782_v30 = vand.u32 %v4589_v45, %v5367_v58  ;;  %v2080_v12 = vrot.slane %v2078_v17, 1  ;;  %v2315_v44 = vshll.u32 %v5862_v14, 16  ;;  %v5129_v55 = vld [vmem:[%s5371_s11 + $0xfc] sm:$0xe] }
 0x181   : > { %v1493_v32 = vpop.f32.mrf.mxu0  ;;  %v1615_v52 = vpop.f32.mrf.mxu2  ;;  %2947 = vmatpush.bf16.msra.mxu2 %v2782_v30  ;;  %3025 = vmatpush.bf16.msra.mxu3 %v2782_v30  ;;  %v2081_v59 = vsel %vm805_vm3, %v2076_v15, %v2080_v12  ;;  %v2557_v15 = vrot.slane %v5686_v16, 1  ;;  %v2681_v12 = vrot.slane %v5689_v23, 1 }
 0x182   : > { %v5860_v34 = vadd.f32 %v1493_v32, %v5597_v38  ;;  %v5870_v13 = vadd.f32 %v1615_v52, %v5657_v7  ;;  %v2435_v38 = vsel %vm805_vm3, %v2430_v36, %v2434_v10  ;;  %2791 = vmatpush.bf16.msra.mxu0 %v2782_v30  ;;  %2869 = vmatpush.bf16.msra.mxu1 %v2782_v30 }
 0x183   : > { %v1679_v33 = vpop.f32.mrf.mxu3  ;;  %v5127_v30 = vor.u32 %v5126_v19, %v5665_v63 }
 0x184   : > { %v5866_v40 = vadd.f32 %v1679_v33, %v5696_v39  ;;  %v2311_v39 = vshrl.u32 %v5808_v46, 16 }
 0x185   : > { %v1558_v26 = vpop.f32.mrf.mxu1 }
 0x186   : > { %v5875_v32 = vadd.f32 %v1558_v26, %v5620_v62  ;;  %v2313_v17 = vor.u32 %v2311_v39, %v2309_v11  ;;  %v2317_v62 = vrot.slane %v2315_v44, 1  ;;  %v5044_v26 = vld [vmem:[%s5371_s11 + $0x90] sm:$0xf0]  ;;  %v5048_v44 = vld [vmem:[%s5371_s11 + $0xd8] sm:$0xe] }
 0x188   : > { %4517 = vmatmul.msk.bf16.gmra.mxu1 %vm842_vm2, %v2201_v53  ;;  %4567 = vmatmul.msk.bf16.gmra.mxu3 %vm842_vm2, %v2435_v38  ;;  %v2318_v53 = vsel %vm805_vm3, %v2313_v17, %v2317_v62  ;;  %v2556_v38 = vrot.slane %v5127_v30, 1 }
 0x189   : > { %v1496_v7 = vpop.f32.mrf.mxu0  ;;  %v1617_v10 = vpop.f32.mrf.mxu2 }
 0x18a   : > { %v5884_v22 = vadd.f32 %v1496_v7, %v5608_v47  ;;  %v5892_v33 = vadd.f32 %v1617_v10, %v5675_v61  ;;  %v5130_v47 = vor.u32 %v5129_v55, %v5669_v56 }
 0x18b   : > { %v1682_v36 = vpop.f32.mrf.mxu3 }
 0x18c   : > { %v5887_v45 = vadd.f32 %v1682_v36, %v5712_v24  ;;  %4492 = vmatmul.msk.bf16.gmra.mxu0 %vm842_vm2, %v2081_v59  ;;  %v5045_v24 = vld [vmem:[%s5371_s11 + $0x90] sm:$0xe]  ;;  %v2680_v61 = vrot.slane %v5130_v47, 1  ;;  %v2558_v59 = vsel %vm1447_vm4, %v2556_v38, %v2557_v15  ;;  %v2492_v36 = vrot.slane %v5701_v51, 1 }
 0x18d   : > { %v1560_v52 = vpop.f32.mrf.mxu1  ;;  %v5046_v19 = vor.u32 %v5045_v24, %v5044_v26  ;;  %v2619_v47 = vrot.slane %v5709_v6, 1  ;;  %v2559_v6 = vrot.slane %v5722_v3, 1  ;;  %v2494_v3 = vrot.slane %v5742_v18, 1  ;;  %v6794_v18 = vld [vmem:[#allocation6_spill] sm:$0xff] }
 0x18e   : > { %v5896_v11 = vadd.f32 %v1560_v52, %v5628_v9  ;;  %4542 = vmatmul.msk.bf16.gmra.mxu2 %vm842_vm2, %v2318_v53  ;;  %v5047_v9 = vld [vmem:[%s5371_s11 + $0xd8] sm:$0xf0]  ;;  %v2682_v62 = vsel %vm1447_vm4, %v2680_v61, %v2681_v12  ;;  %v2683_v61 = vrot.slane %v5726_v43, 1 }
 0x18f   : > { %v2491_v23 = vrot.slane %v5046_v19, 1  ;;  %v5049_v10 = vor.u32 %v5048_v44, %v5047_v9  ;;  %v2560_v44 = vsel %vm1447_vm4, %v2557_v15, %v2559_v6 }
 0x191   : > { %v1498_v63 = vpop.f32.mrf.mxu0  ;;  %v1620_v55 = vpop.f32.mrf.mxu2  ;;  %v2493_v30 = vsel %vm1447_vm4, %v2491_v23, %v2492_v36  ;;  %v2618_v52 = vrot.slane %v5049_v10, 1 }
 0x192   : > { %v5905_v39 = vadd.f32 %v1498_v63, %v5616_v54  ;;  %v5914_v16 = vadd.f32 %v1620_v55, %v5691_v25  ;;  %v2684_v55 = vsel %vm1447_vm4, %v2681_v12, %v2683_v61  ;;  %v6793_v12 = vld [vmem:[#allocation5_spill] sm:$0xff] }
 0x193   : > { %v1684_v56 = vpop.f32.mrf.mxu3 }
 0x194   : > { %v5910_v7 = vadd.f32 %v1684_v56, %v5737_v1 }
 0x195   : > { %v1828_v17 = vpop.f32.mrf.mxu1 }
 0x196   : > { %v5919_v54 = vadd.f32 %v1828_v17, %v5716_v29  ;;  %v6792_v17 = vld [vmem:[#allocation4_spill] sm:$0xff] }
 0x198   : > { %4575 = vmatmul.msk.bf16.vlgmr.msrb.gmra.mxu1 %vm842_vm2, %v2558_v59  ;;  %4585 = vmatmul.msk.bf16.vlgmr.msrb.gmra.mxu3 %vm842_vm2, %v2682_v62  ;;  %v6791_v59 = vld [vmem:[#allocation3_spill] sm:$0xff]  ;;  %v2621_v62 = vrot.slane %v5755_v49, 1  ;;  %v2561_v49 = vrot.slane %v5773_v31, 1  ;;  %v2496_v31 = vrot.slane %v5794_v8, 1 }
 0x199   : > { %v1750_v1 = vpop.f32.mrf.mxu0  ;;  %v1622_v26 = vpop.f32.mrf.mxu2 }
 0x19a   : > { %v5925_v25 = vadd.f32 %v1750_v1, %v5729_v4  ;;  %v5933_v29 = vadd.f32 %v1622_v26, %v5706_v20  ;;  %v2620_v4 = vsel %vm1447_vm4, %v2618_v52, %v2619_v47  ;;  %v6795_v52 = vld [vmem:[#allocation7_spill] sm:$0xff] }
 0x19b   : > { %v1984_v53 = vpop.f32.mrf.mxu3 }
 0x19c   : > { %v5929_v51 = vadd.f32 %v1984_v53, %v5732_v57  ;;  %4570 = vmatmul.msk.bf16.vlgmr.msrb.gmra.mxu0 %vm842_vm2, %v2493_v30 }
 0x19d   : > { %v1830_v24 = vpop.f32.mrf.mxu1 }
 0x19e   : > { %v5936_v38 = vadd.f32 %v1830_v24, %v5745_v21  ;;  %4580 = vmatmul.msk.bf16.vlgmr.msrb.gmra.mxu2 %vm842_vm2, %v2620_v4  ;;  %v2685_v24 = vrot.slane %v5776_v28, 1  ;;  %v6796_v4 = vld [vmem:[#allocation8_spill] sm:$0xff] }
 0x1a1   : > { %v1752_v63 = vpop.f32.mrf.mxu0  ;;  %v1906_v56 = vpop.f32.mrf.mxu2 }
 0x1a2   : > { %v5943_v57 = vadd.f32 %v1752_v63, %v5752_v42  ;;  %v5949_v21 = vadd.f32 %v1906_v56, %v5762_v2 }
 0x1a3   : > { %v1986_v19 = vpop.f32.mrf.mxu3 }
 0x1a4   : > { %v5946_v20 = vadd.f32 %v1986_v19, %v5758_v50  ;;  %v2495_v50 = vsel %vm1447_vm4, %v2492_v36, %v2494_v3  ;;  %v2622_v36 = vsel %vm1447_vm4, %v2619_v47, %v2621_v62  ;;  %v2562_v47 = vsel %vm1447_vm4, %v2559_v6, %v2561_v49 }
 0x1a5   : > { %v1833_v9 = vpop.f32.mrf.mxu1 }
 0x1a6   : > { %v5955_v43 = vadd.f32 %v1833_v9, %v6791_v59  ;;  %v2686_v59 = vsel %vm1447_vm4, %v2683_v61, %v2685_v24 }
 0x1a8   : > { %4576 = vmatmul.msk.bf16.gmra.mxu1 %vm842_vm2, %v2560_v44  ;;  %4586 = vmatmul.msk.bf16.gmra.mxu3 %vm842_vm2, %v2684_v55 }
 0x1a9   : > { %v1755_v42 = vpop.f32.mrf.mxu0  ;;  %v1908_v23 = vpop.f32.mrf.mxu2 }
 0x1aa   : > { %v5961_v2 = vadd.f32 %v1755_v42, %v6792_v17  ;;  %v5969_v1 = vadd.f32 %v1908_v23, %v6794_v18  ;;  %v2687_v18 = vrot.slane %v5830_v35, 1 }
 0x1ab   : > { %v1989_v15 = vpop.f32.mrf.mxu3 }
 0x1ac   : > { %v5965_v10 = vadd.f32 %v1989_v15, %v6793_v12  ;;  %4571 = vmatmul.msk.bf16.gmra.mxu0 %vm842_vm2, %v2495_v50  ;;  %v2623_v50 = vrot.slane %v5808_v46, 1  ;;  %v6798_v46 = vld [vmem:[#allocation9_spill] sm:$0xff] }
 0x1ad   : > { %v1835_v30 = vpop.f32.mrf.mxu1  ;;  %v2563_v12 = vrot.slane %v6798_v46, 1 }
 0x1ae   : > { %v5972_v53 = vadd.f32 %v1835_v30, %v6795_v52  ;;  %4581 = vmatmul.msk.bf16.gmra.mxu2 %vm842_vm2, %v2622_v36 }
 0x1b1   : > { %v1757_v26 = vpop.f32.mrf.mxu0  ;;  %v1911_v56 = vpop.f32.mrf.mxu2 }
 0x1b2   : > { %v5979_v63 = vadd.f32 %v1757_v26, %v6796_v4  ;;  %v5985_v44 = vadd.f32 %v1911_v56, %v5817_v0  ;;  %v2564_v4 = vsel %vm1447_vm4, %v2561_v49, %v2563_v12  ;;  %v2625_v49 = vrot.slane %v5862_v14, 1  ;;  %v4911_v12 = vld [vmem:[%s5371_s11 + $0x168] sm:$0xff] }
 0x1b3   : > { %v1991_v19 = vpop.f32.mrf.mxu3 }
 0x1b4   : > { %v5982_v9 = vadd.f32 %v1991_v19, %v5812_v37  ;;  %v2497_v37 = vsel %vm1447_vm4, %v2494_v3, %v2496_v31  ;;  %v2624_v3 = vsel %vm1447_vm4, %v2621_v62, %v2623_v50  ;;  %v2688_v19 = vsel %vm1447_vm4, %v2685_v24, %v2687_v18 }
 0x1b5   : > { %v1838_v55 = vpop.f32.mrf.mxu1 }
 0x1b6   : > { %v5991_v28 = vadd.f32 %v1838_v55, %v5820_v5  ;;  %v6797_v5 = vld [vmem:[#allocation10_spill] sm:$0xff] }
 0x1b8   : > { %4577 = vmatmul.msk.bf16.gmra.mxu1 %vm842_vm2, %v2562_v47  ;;  %4587 = vmatmul.msk.bf16.gmra.mxu3 %vm842_vm2, %v2686_v59 }
 0x1b9   : > { %v1760_v42 = vpop.f32.mrf.mxu0  ;;  %v1913_v17 = vpop.f32.mrf.mxu2 }
 0x1ba   : > { %v5997_v0 = vadd.f32 %v1760_v42, %v5833_v41  ;;  %v6005_v8 = vadd.f32 %v1913_v17, %v6797_v5  ;;  %v4915_v17 = vld [vmem:[%s5371_s11 + $0x18c] sm:$0xff] }
 0x1bb   : > { %v1994_v6 = vpop.f32.mrf.mxu3 }
 0x1bc   : > { %v6001_v61 = vadd.f32 %v1994_v6, %v5837_v27  ;;  %4572 = vmatmul.msk.bf16.gmra.mxu0 %vm842_vm2, %v2497_v37  ;;  %v4702_v27 = vld [vmem:[%s6776_s1 + $0xe] sm:$0x3] }
 0x1bd   : > { %v1840_v15 = vpop.f32.mrf.mxu1  ;;  %v3138_v52 = vand.u32 %v4702_v27, %v5367_v58 }
 0x1be   : > { %v6008_v23 = vadd.f32 %v1840_v15, %v5850_v48  ;;  %4582 = vmatmul.msk.bf16.gmra.mxu2 %vm842_vm2, %v2624_v3 }
 0x1bf   : > { %3381 = vmatpush.bf16.msrb.mxu2 %v3138_v52  ;;  %3498 = vmatpush.bf16.msrb.mxu3 %v3138_v52 }
 0x1c0   : > { %3147 = vmatpush.bf16.msrb.mxu0 %v3138_v52  ;;  %3264 = vmatpush.bf16.msrb.mxu1 %v3138_v52 }
 0x1c1   : > { %v1762_v41 = vpop.f32.mrf.mxu0  ;;  %v1916_v36 = vpop.f32.mrf.mxu2 }
 0x1c2   : > { %v6018_v30 = vadd.f32 %v1762_v41, %v5860_v34  ;;  %v6025_v26 = vadd.f32 %v1916_v36, %v5870_v13  ;;  %v2498_v34 = vrot.slane %v5847_v60, 1  ;;  %v4908_v36 = vld [vmem:[%s5371_s11 + $0x14c] sm:$0xff] }
 0x1c3   : > { %v1996_v48 = vpop.f32.mrf.mxu3 }
 0x1c4   : > { %v6022_v62 = vadd.f32 %v1996_v48, %v5866_v40  ;;  %v2499_v13 = vsel %vm1447_vm4, %v2496_v31, %v2498_v34 }
 0x1c5   : > { %v1843_v35 = vpop.f32.mrf.mxu1 }
 0x1c6   : > { %v6031_v56 = vadd.f32 %v1843_v35, %v5875_v32 }
 0x1c8   : > { %4578 = vmatmul.msk.bf16.gmra.mxu1 %vm842_vm2, %v2564_v4  ;;  %4588 = vmatmul.msk.bf16.gmra.mxu3 %vm842_vm2, %v2688_v19 }
 0x1c9   : > { %v1765_v40 = vpop.f32.mrf.mxu0  ;;  %v1918_v24 = vpop.f32.mrf.mxu2 }
 0x1ca   : > { %v6037_v55 = vadd.f32 %v1765_v40, %v5884_v22  ;;  %v6045_v32 = vadd.f32 %v1918_v24, %v5892_v33  ;;  %v2626_v22 = vsel %vm1447_vm4, %v2623_v50, %v2625_v49  ;;  %v4907_v33 = vld [vmem:[%s5371_s11 + $0x144] sm:$0xff]  ;;  %v4912_v49 = vld [vmem:[%s5371_s11 + $0x170] sm:$0xff] }
 0x1cb   : > { %v1999_v60 = vpop.f32.mrf.mxu3 }
 0x1cc   : > { %v6041_v47 = vadd.f32 %v1999_v60, %v5887_v45  ;;  %4573 = vmatmul.msk.bf16.gmra.mxu0 %vm842_vm2, %v2499_v13 }
 0x1cd   : > { %v1845_v59 = vpop.f32.mrf.mxu1 }
 0x1ce   : > { %v6048_v31 = vadd.f32 %v1845_v59, %v5896_v11  ;;  %4583 = vmatmul.msk.bf16.gmra.mxu2 %vm842_vm2, %v2626_v22 }
 0x1d1   : > { %v1767_v14 = vpop.f32.mrf.mxu0  ;;  %v1921_v37 = vpop.f32.mrf.mxu2 }
 0x1d2   : > { %v6053_v42 = vadd.f32 %v1767_v14, %v5905_v39  ;;  %v6061_v5 = vadd.f32 %v1921_v37, %v5914_v16  ;;  %v4903_v39 = vld [vmem:[%s5371_s11 + $0x120] sm:$0xff] }
 0x1d3   : > { %v2001_v45 = vpop.f32.mrf.mxu3  ;;  %v4917_v14 = vld [vmem:[%s5371_s11 + $0x19c] sm:$0xff] }
 0x1d4   : > { %v6056_v6 = vadd.f32 %v2001_v45, %v5910_v7 }
 0x1d5   : > { %v2223_v11 = vpop.f32.mrf.mxu1 }
 0x1d6   : > { %v6064_v50 = vadd.f32 %v2223_v11, %v5919_v54 }
 0x1d8   : > { %4642 = vmatmul.msk.bf16.vlgmr.msra.gmra.mxu1 %vm842_vm2, %v4907_v33  ;;  %4698 = vmatmul.msk.bf16.vlgmr.msra.gmra.mxu3 %vm842_vm2, %v4915_v17 }
 0x1d9   : > { %v2106_v15 = vpop.f32.mrf.mxu0  ;;  %v1923_v41 = vpop.f32.mrf.mxu2 }
 0x1da   : > { %v6070_v7 = vadd.f32 %v2106_v15, %v5925_v25  ;;  %v6077_v54 = vadd.f32 %v1923_v41, %v5933_v29  ;;  %v4916_v29 = vld [vmem:[%s5371_s11 + $0x194] sm:$0xff] }
 0x1db   : > { %v2457_v3 = vpop.f32.mrf.mxu3  ;;  %v4913_v41 = vld [vmem:[%s5371_s11 + $0x178] sm:$0xff] }
 0x1dc   : > { %v6073_v16 = vadd.f32 %v2457_v3, %v5929_v51  ;;  %4614 = vmatmul.msk.bf16.vlgmr.msra.gmra.mxu0 %vm842_vm2, %v4903_v39  ;;  %v4728_v39 = vld [vmem:[%s5371_s11 + $0x144] sm:$0xff]  }
 0x1dd   : > { %v2225_v46 = vpop.f32.mrf.mxu1 }
 0x1de   : > { %v6081_v18 = vadd.f32 %v2225_v46, %v5936_v38  ;;  %4670 = vmatmul.msk.bf16.vlgmr.msra.gmra.mxu2 %vm842_vm2, %v4911_v12  ;;  %v4778_v46 = vld [vmem:[%s5371_s11 + $0x18c] sm:$0xff]  }
 0x1e1   : > { %v2108_v25 = vpop.f32.mrf.mxu0  ;;  %v2340_v51 = vpop.f32.mrf.mxu2 }
 0x1e2   : > { %v6085_v27 = vadd.f32 %v2108_v25, %v5943_v57  ;;  %v6093_v35 = vadd.f32 %v2340_v51, %v5949_v21  ;;  %v4904_v57 = vld [vmem:[%s5371_s11 + $0x128] sm:$0xff]  ;;  %v4803_v25 = vld [vmem:[%s6776_s1 + $0x10] sm:$0x3] }
 0x1e3   : > { %v2459_v52 = vpop.f32.mrf.mxu3 }
 0x1e4   : > { %v6088_v48 = vadd.f32 %v2459_v52, %v5946_v20 }
 0x1e5   : > { %v2228_v4 = vpop.f32.mrf.mxu1 }
 0x1e6   : > { %v6096_v38 = vadd.f32 %v2228_v4, %v5955_v43  ;;  %v4918_v4 = vld [vmem:[%s5371_s11 + $0x1a4] sm:$0xff] }
 0x1e8   : > { %4643 = vmatmul.msk.bf16.gmra.mxu1 %vm842_vm2, %v4908_v36  ;;  %4699 = vmatmul.msk.bf16.gmra.mxu3 %vm842_vm2, %v4916_v29 }
 0x1e9   : > { %v2111_v19 = vpop.f32.mrf.mxu0  ;;  %v2342_v40 = vpop.f32.mrf.mxu2 }
 0x1ea   : > { %v6102_v20 = vadd.f32 %v2111_v19, %v5961_v2  ;;  %v6109_v43 = vadd.f32 %v2342_v40, %v5969_v1  ;;  %v4909_v1 = vld [vmem:[%s5371_s11 + $0x154] sm:$0xff]  ;;  %v3212_v19 = vshll.u32 %v4728_v39, 16  ;;  %v3446_v40 = vshll.u32 %v4778_v46, 16 }
 0x1eb   : > { %v2462_v34 = vpop.f32.mrf.mxu3 }
 0x1ec   : > { %v6105_v21 = vadd.f32 %v2462_v34, %v5965_v10  ;;  %4615 = vmatmul.msk.bf16.gmra.mxu0 %vm842_vm2, %v4904_v57  ;;  %v6178_v34 = vld [vmem:[%s5371_s11 + $0x14c] sm:$0xff] }
 0x1ed   : > { %v2230_v13 = vpop.f32.mrf.mxu1 }
 0x1ee   : > { %v6113_v60 = vadd.f32 %v2230_v13, %v5972_v53  ;;  %4671 = vmatmul.msk.bf16.gmra.mxu2 %vm842_vm2, %v4912_v49  ;;  %v6181_v49 = vld [vmem:[%s5371_s11 + $0x194] sm:$0xff] }
 0x1f1   : > { %v2113_v2 = vpop.f32.mrf.mxu0  ;;  %v2345_v10 = vpop.f32.mrf.mxu2 }
 0x1f2   : > { %v6117_v24 = vadd.f32 %v2113_v2, %v5979_v63  ;;  %v6125_v45 = vadd.f32 %v2345_v10, %v5985_v44  ;;  %v4905_v63 = vld [vmem:[%s5371_s11 + $0x130] sm:$0xff]  ;;  %v5050_v2 = vld [vmem:[%s5371_s11 + $0x120] sm:$0xff]   ;;  %v3214_v10 = vrot.slane %v3212_v19, 1 }
 0x1f3   : > { %v2464_v59 = vpop.f32.mrf.mxu3  ;;  %v6210_v19 = vld [vmem:[%s5371_s11 + $0x170] sm:$0xff] }
 0x1f4   : > { %v6120_v22 = vadd.f32 %v2464_v59, %v5982_v9  ;;  %v3210_v59 = vshrl.u32 %v4728_v39, 16  ;;  %v6198_v39 = vld [vmem:[%s5371_s11 + $0x128] sm:$0xff] }
 0x1f5   : > { %v2233_v53 = vpop.f32.mrf.mxu1 }
 0x1f6   : > { %v6128_v37 = vadd.f32 %v2233_v53, %v5991_v28  ;;  %v6142_v28 = vld [vmem:[%s5371_s11 + $0x144] sm:$0xf0]  ;;  %v3217_v53 = vshll.u32 %v6178_v34, 16 }
 0x1f8   : > { %4644 = vmatmul.msk.bf16.gmra.mxu1 %vm842_vm2, %v4909_v1  ;;  %4700 = vmatmul.msk.bf16.gmra.mxu3 %vm842_vm2, %v4917_v14 }
 0x1f9   : > { %v2116_v9 = vpop.f32.mrf.mxu0  ;;  %v2347_v11 = vpop.f32.mrf.mxu2 }
 0x1fa   : > { %v6134_v33 = vadd.f32 %v2116_v9, %v5997_v0  ;;  %v6145_v15 = vadd.f32 %v2347_v11, %v6005_v8  ;;  %v6150_v0 = vld [vmem:[%s5371_s11 + $0x18c] sm:$0xf0]  ;;  %v3556_v8 = vand.u32 %v4803_v25, %v5367_v58  ;;  %v3448_v9 = vrot.slane %v3446_v40, 1  ;;  %v4914_v11 = vld [vmem:[%s5371_s11 + $0x180] sm:$0xff] }
 0x1fb   : > { %v2467_v17 = vpop.f32.mrf.mxu3  ;;  %v3215_v25 = vor.u32 %v3214_v10, %v3210_v59 }
 0x1fc   : > { %v6137_v44 = vadd.f32 %v2467_v17, %v6001_v61  ;;  %4616 = vmatmul.msk.bf16.gmra.mxu0 %vm842_vm2, %v4905_v63  ;;  %3689 = vmatpush.bf16.msra.mxu2 %v3556_v8  ;;  %v3444_v63 = vshrl.u32 %v4778_v46, 16 }
 0x1fd   : > { %v2235_v3 = vpop.f32.mrf.mxu1  ;;  %3751 = vmatpush.bf16.msra.mxu3 %v3556_v8  ;;  %3565 = vmatpush.bf16.msra.mxu0 %v3556_v8 }
 0x1fe   : > { %v6153_v12 = vadd.f32 %v2235_v3, %v6008_v23  ;;  %4672 = vmatmul.msk.bf16.gmra.mxu2 %vm842_vm2, %v4913_v41  ;;  %v4910_v23 = vld [vmem:[%s5371_s11 + $0x15c] sm:$0xff]  ;;  %3627 = vmatpush.bf16.msra.mxu1 %v3556_v8  ;;  %v3451_v3 = vshll.u32 %v6181_v49, 16  ;;  %v3092_v41 = vshll.u32 %v5050_v2, 16  ;;  %v3219_v8 = vrot.slane %v3217_v53, 1 }
 0x201   : > { %v2118_v61 = vpop.f32.mrf.mxu0  ;;  %v2350_v36 = vpop.f32.mrf.mxu2 }
 0x202   : > { %v6160_v52 = vadd.f32 %v2118_v61, %v6018_v30  ;;  %v6169_v57 = vadd.f32 %v2350_v36, %v6025_v26  ;;  %v5051_v61 = vld [vmem:[%s5371_s11 + $0x168] sm:$0xff]   ;;  %v3090_v36 = vshrl.u32 %v5050_v2, 16 }
 0x203   : > { %v2469_v51 = vpop.f32.mrf.mxu3 }
 0x204   : > { %v6164_v29 = vadd.f32 %v2469_v51, %v6022_v62  ;;  %v4906_v62 = vld [vmem:[%s5371_s11 + $0x138] sm:$0xff]  ;;  %v3449_v51 = vor.u32 %v3448_v9, %v3444_v63  ;;  %v3327_v63 = vshrl.u32 %v5051_v61, 16 }
 0x205   : > { %v2238_v30 = vpop.f32.mrf.mxu1 }
 0x206   : > { %v6172_v58 = vadd.f32 %v2238_v30, %v6031_v56 }
 0x208   : > { %4645 = vmatmul.msk.bf16.gmra.mxu1 %vm842_vm2, %v4910_v23  ;;  %4701 = vmatmul.msk.bf16.gmra.mxu3 %vm842_vm2, %v4918_v4  ;;  %v3094_v23 = vrot.slane %v3092_v41, 1  ;;  %v3097_v4 = vshll.u32 %v6198_v39, 16 }
 0x209   : > { %v2121_v13 = vpop.f32.mrf.mxu0  ;;  %v2352_v1 = vpop.f32.mrf.mxu2 }
 0x20a   : > { %v6184_v26 = vadd.f32 %v2121_v13, %v6037_v55  ;;  %v6193_v17 = vadd.f32 %v2352_v1, %v6045_v32  ;;  %v3453_v32 = vrot.slane %v3451_v3, 1  ;;  %v3099_v1 = vrot.slane %v3097_v4, 1  ;;  %v6231_v3 = vld [vmem:[%s5371_s11 + $0x19c] sm:$0xff] }
 0x20b   : > { %v2472_v56 = vpop.f32.mrf.mxu3 }
 0x20c   : > { %v6188_v14 = vadd.f32 %v2472_v56, %v6041_v47  ;;  %4617 = vmatmul.msk.bf16.gmra.mxu0 %vm842_vm2, %v4906_v62  ;;  %v3329_v62 = vshll.u32 %v5051_v61, 16  ;;  %v3220_v56 = vsel %vm805_vm3, %v3215_v25, %v3219_v8  ;;  %v3454_v10 = vsel %vm805_vm3, %v3449_v51, %v3453_v32 }
 0x20d   : > { %v2240_v55 = vpop.f32.mrf.mxu1 }
 0x20e   : > { %v6201_v47 = vadd.f32 %v2240_v55, %v6048_v31  ;;  %4673 = vmatmul.msk.bf16.gmra.mxu2 %vm842_vm2, %v4914_v11  ;;  %v3331_v9 = vrot.slane %v3329_v62, 1  ;;  %v3334_v55 = vshll.u32 %v6210_v19, 16 }
 0x210   : > { %v3336_v61 = vrot.slane %v3334_v55, 1 }
 0x211   : > { %v2123_v46 = vpop.f32.mrf.mxu0  ;;  %v2355_v40 = vpop.f32.mrf.mxu2 }
 0x212   : > { %v6207_v30 = vadd.f32 %v2123_v46, %v6053_v42  ;;  %v6217_v2 = vadd.f32 %v2355_v40, %v6061_v5  ;;  %v3095_v42 = vor.u32 %v3094_v23, %v3090_v36  ;;  %v3221_v36 = vshrl.u32 %v6178_v34, 16  ;;  %v6248_v40 = vld [vmem:[%s5371_s11 + $0x130] sm:$0xff] }
 0x213   : > { %v2474_v31 = vpop.f32.mrf.mxu3  ;;  %v3105_v55 = vshll.u32 %v6248_v40, 16 }
 0x214   : > { %v6213_v13 = vadd.f32 %v2474_v31, %v6056_v6  ;;  %v6227_v6 = vld [vmem:[%s5371_s11 + $0x154] sm:$0xff]  ;;  %v3100_v11 = vsel %vm805_vm3, %v3095_v42, %v3099_v1  ;;  %v3459_v31 = vshll.u32 %v6231_v3, 16 }
 0x215   : > { %v2586_v59 = vpop.f32.mrf.mxu1  ;;  %v3225_v23 = vshll.u32 %v6227_v6, 16 }
 0x216   : > { %v6221_v53 = vadd.f32 %v2586_v59, %v6064_v50  ;;  %v3332_v50 = vor.u32 %v3331_v9, %v3327_v63  ;;  %v3223_v59 = vor.u32 %v3221_v36, %v3219_v8  ;;  %v3461_v63 = vrot.slane %v3459_v31, 1 }
 0x217   : > { %v3101_v9 = vshrl.u32 %v6198_v39, 16 }
 0x218   : > { %4749 = vmatmul.msk.bf16.vlgmr.msrb.gmra.mxu1 %vm842_vm2, %v3220_v56  ;;  %4799 = vmatmul.msk.bf16.vlgmr.msrb.gmra.mxu3 %vm842_vm2, %v3454_v10  ;;  %v3337_v56 = vsel %vm805_vm3, %v3332_v50, %v3336_v61  ;;  %v3227_v10 = vrot.slane %v3225_v23, 1 }
 0x219   : > { %v2524_v5 = vpop.f32.mrf.mxu0  ;;  %v2357_v51 = vpop.f32.mrf.mxu2  ;;  %v3103_v23 = vor.u32 %v3101_v9, %v3099_v1  ;;  %v3229_v9 = vshrl.u32 %v6227_v6, 16 }
 0x21a   : > { %v6234_v41 = vadd.f32 %v2524_v5, %v6070_v7  ;;  %v6243_v4 = vadd.f32 %v2357_v51, %v6077_v54  ;;  %v3455_v7 = vshrl.u32 %v6181_v49, 16 }
 0x21b   : > { %v2710_v25 = vpop.f32.mrf.mxu3 }
 0x21c   : > { %v6237_v46 = vadd.f32 %v2710_v25, %v6073_v16  ;;  %4724 = vmatmul.msk.bf16.vlgmr.msrb.gmra.mxu0 %vm842_vm2, %v3100_v11  ;;  %v3457_v54 = vor.u32 %v3455_v7, %v3453_v32  ;;  %v6261_v11 = vld [vmem:[%s5371_s11 + $0x178] sm:$0xff]  ;;  %v3228_v25 = vsel %vm805_vm3, %v3223_v59, %v3227_v10  ;;  %v3338_v7 = vshrl.u32 %v6210_v19, 16 }
 0x21d   : > { %v2588_v62 = vpop.f32.mrf.mxu1  ;;  %v3342_v31 = vshll.u32 %v6261_v11, 16 }
 0x21e   : > { %v6251_v16 = vadd.f32 %v2588_v62, %v6081_v18  ;;  %4774 = vmatmul.msk.bf16.vlgmr.msrb.gmra.mxu2 %vm842_vm2, %v3337_v56  ;;  %v3462_v36 = vsel %vm805_vm3, %v3457_v54, %v3461_v63 }
 0x221   : > { %v2526_v42 = vpop.f32.mrf.mxu0  ;;  %v2648_v50 = vpop.f32.mrf.mxu2 }
 0x222   : > { %v6258_v5 = vadd.f32 %v2526_v42, %v6085_v27  ;;  %v6268_v32 = vadd.f32 %v2648_v50, %v6093_v35  ;;  %v3107_v27 = vrot.slane %v3105_v55, 1  ;;  %v6282_v35 = vld [vmem:[%s5371_s11 + $0x1a4] sm:$0xff]  ;;  %v3344_v42 = vrot.slane %v3342_v31, 1 }
 0x223   : > { %v2712_v18 = vpop.f32.mrf.mxu3 }
 0x224   : > { %v6264_v8 = vadd.f32 %v2712_v18, %v6088_v48  ;;  %v6279_v48 = vld [vmem:[%s5371_s11 + $0x15c] sm:$0xff]  ;;  %v3108_v1 = vsel %vm805_vm3, %v3103_v23, %v3107_v27 }
 0x225   : > { %v2591_v51 = vpop.f32.mrf.mxu1  ;;  %v3233_v50 = vshll.u32 %v6279_v48, 16 }
 0x226   : > { %v6272_v62 = vadd.f32 %v2591_v51, %v6096_v38  ;;  %v3340_v38 = vor.u32 %v3338_v7, %v3336_v61  ;;  %v3467_v51 = vshll.u32 %v6282_v35, 16  ;;  %v3231_v7 = vor.u32 %v3229_v9, %v3227_v10 }
 0x227   : > { %v3235_v31 = vrot.slane %v3233_v50, 1 }
 0x228   : > { %4750 = vmatmul.msk.bf16.gmra.mxu1 %vm842_vm2, %v3228_v25  ;;  %4800 = vmatmul.msk.bf16.gmra.mxu3 %vm842_vm2, %v3462_v36  ;;  %v3463_v25 = vshrl.u32 %v6231_v3, 16  ;;  %v6300_v36 = vld [vmem:[%s5371_s11 + $0x138] sm:$0xff]  ;;  %v3345_v23 = vsel %vm805_vm3, %v3340_v38, %v3344_v42 }
 0x229   : > { %v2529_v56 = vpop.f32.mrf.mxu0  ;;  %v2650_v55 = vpop.f32.mrf.mxu2  ;;  %v3236_v9 = vsel %vm805_vm3, %v3231_v7, %v3235_v31 }
 0x22a   : > { %v6286_v59 = vadd.f32 %v2529_v56, %v6102_v20  ;;  %v6297_v20 = vadd.f32 %v2650_v55, %v6109_v43  ;;  %v3465_v56 = vor.u32 %v3463_v25, %v3461_v63  ;;  %v3113_v43 = vshll.u32 %v6300_v36, 16  ;;  %v4736_v55 = vld [vmem:[%s5371_s11 + $0x164] sm:$0x1] }
 0x22b   : > { %v2715_v54 = vpop.f32.mrf.mxu3  ;;  %v3203_v25 = vunpack.c.l.b16 %v4736_v55 }
 0x22c   : > { %6799 = vst [vmem:[#allocation3_spill] sm:$0xff] %v6286_v59  ;;  %v6290_v18 = vadd.f32 %v2715_v54, %v6105_v21  ;;  %4725 = vmatmul.msk.bf16.gmra.mxu0 %vm842_vm2, %v3108_v1  ;;  %v3469_v1 = vrot.slane %v3467_v51, 1  ;;  %v6314_v59 = vld [vmem:[%s5371_s11 + $0x180] sm:$0xff] }
 0x22d   : > { %6801 = vst [vmem:[#allocation5_spill] sm:$0xff] %v6297_v20  ;;  %v2593_v61 = vpop.f32.mrf.mxu1  ;;  %v6333_v7 = vpack.c.b16 %v3203_v25, %v3203_v25 }
 0x22e   : > { %6800 = vst [vmem:[#allocation4_spill] sm:$0xff] %v6290_v18  ;;  %v6303_v21 = vadd.f32 %v2593_v61, %v6113_v60  ;;  %4775 = vmatmul.msk.bf16.gmra.mxu2 %vm842_vm2, %v3345_v23  ;;  %v3109_v18 = vshrl.u32 %v6248_v40, 16  ;;  %v4786_v60 = vld [vmem:[%s5371_s11 + $0x1ac] sm:$0x1]  ;;  %v3470_v50 = vsel %vm805_vm3, %v3465_v56, %v3469_v1  ;;  %v3115_v23 = vrot.slane %v3113_v43, 1 }
 0x22f   : > { %6804 = vst [vmem:[#allocation8_spill] sm:$0xff] %v6333_v7  ;;  %v3241_v25 = vshll.u32 %v6333_v7, 16  ;;  %v3117_v7 = vshrl.u32 %v6300_v36, 16 }
 0x230   : > { %6802 = vst [vmem:[#allocation6_spill] sm:$0xff] %v6303_v21  ;;  %v3346_v21 = vshrl.u32 %v6261_v11, 16 }
 0x231   : > { %v2531_v54 = vpop.f32.mrf.mxu0  ;;  %v2653_v10 = vpop.f32.mrf.mxu2 }
 0x232   : > { %v6311_v20 = vadd.f32 %v2531_v54, %v6117_v24  ;;  %v6323_v51 = vadd.f32 %v2653_v10, %v6125_v45  ;;  %v3111_v24 = vor.u32 %v3109_v18, %v3107_v27  ;;  %v3437_v54 = vunpack.c.l.b16 %v4786_v60  ;;  %v4761_v10 = vld [vmem:[%s5371_s11 + $0x188] sm:$0x1] }
 0x233   : > { %v2717_v38 = vpop.f32.mrf.mxu3  ;;  %v3348_v43 = vor.u32 %v3346_v21, %v3344_v42 }
 0x234   : > { %6803 = vst [vmem:[#allocation7_spill] sm:$0xff] %v6311_v20  ;;  %v6318_v63 = vadd.f32 %v2717_v38, %v6120_v22  ;;  %v3350_v22 = vshll.u32 %v6314_v59, 16  ;;  %v4711_v38 = vld [vmem:[%s5371_s11 + $0x140] sm:$0x1]  ;;  %v3116_v27 = vsel %vm805_vm3, %v3111_v24, %v3115_v23  ;;  %v6336_v18 = vpack.c.b16 %v3437_v54, %v3437_v54 }
 0x235   : > { %v2596_v61 = vpop.f32.mrf.mxu1  ;;  %v3083_v56 = vunpack.c.l.b16 %v4711_v38  ;;  %v3320_v38 = vunpack.c.l.b16 %v4761_v10 }
 0x236   : > { %v6326_v20 = vadd.f32 %v2596_v61, %v6128_v37  ;;  %6805 = vst [vmem:[#allocation10_spill] sm:$0xff] %v6336_v18  ;;  %v3352_v55 = vrot.slane %v3350_v22, 1  ;;  %v3475_v42 = vshll.u32 %v6336_v18, 16 }
 0x237   : > { %v6353_v21 = vpack.c.b16 %v3083_v56, %v3083_v56 }
 0x238   : > { %4751 = vmatmul.msk.bf16.gmra.mxu1 %vm842_vm2, %v3236_v9  ;;  %4801 = vmatmul.msk.bf16.gmra.mxu3 %vm842_vm2, %v3470_v50  ;;  %v3237_v50 = vshrl.u32 %v6279_v48, 16 }
 0x239   : > { %v2534_v45 = vpop.f32.mrf.mxu0  ;;  %v2655_v61 = vpop.f32.mrf.mxu2  ;;  %v3121_v18 = vshll.u32 %v6353_v21, 16 }
 0x23a   : > { %v6339_v37 = vadd.f32 %v2534_v45, %v6134_v33  ;;  %v6349_v24 = vadd.f32 %v2655_v61, %v6145_v15  ;;  %v3471_v33 = vshrl.u32 %v6282_v35, 16  ;;  %v3239_v45 = vor.u32 %v3237_v50, %v3235_v31 }
 0x23b   : > { %v2720_v60 = vpop.f32.mrf.mxu3  ;;  %v3477_v61 = vrot.slane %v3475_v42, 1  ;;  %v3123_v42 = vrot.slane %v3121_v18, 1 }
 0x23c   : > { %v6343_v9 = vadd.f32 %v2720_v60, %v6137_v44  ;;  %4726 = vmatmul.msk.bf16.gmra.mxu0 %vm842_vm2, %v3116_v27  ;;  %v3353_v44 = vsel %vm805_vm3, %v3348_v43, %v3352_v55  ;;  %v3243_v27 = vrot.slane %v3241_v25, 1  ;;  %v3473_v15 = vor.u32 %v3471_v33, %v3469_v1 }
 0x23d   : > { %v2598_v54 = vpop.f32.mrf.mxu1  ;;  %v3119_v33 = vor.u32 %v3117_v7, %v3115_v23 }
 0x23e   : > { %v6356_v22 = vadd.f32 %v2598_v54, %v6153_v12  ;;  %4776 = vmatmul.msk.bf16.gmra.mxu2 %vm842_vm2, %v3353_v44  ;;  %v6365_v12 = vpack.c.b16 %v3320_v38, %v3320_v38  ;;  %v3244_v50 = vsel %vm805_vm3, %v3239_v45, %v3243_v27  ;;  %v3478_v54 = vsel %vm805_vm3, %v3473_v15, %v3477_v61  ;;  %v5132_v44 = vld [vmem:[%s5371_s11 + $0x144] sm:$0xe] }
 0x23f   : > { %v3354_v38 = vshrl.u32 %v6314_v59, 16  ;;  %v3124_v45 = vsel %vm805_vm3, %v3119_v33, %v3123_v42  ;;  %v5133_v61 = vor.u32 %v5132_v44, %v6142_v28  ;;  %v3600_v33 = vrot.slane %v6178_v34, 1 }
 0x240   : > { %v3724_v42 = vrot.slane %v6181_v49, 1 }
 0x241   : > { %v2536_v60 = vpop.f32.mrf.mxu0  ;;  %v2658_v10 = vpop.f32.mrf.mxu2  ;;  %v3356_v7 = vor.u32 %v3354_v38, %v3352_v55 }
 0x242   : > { %v6363_v56 = vadd.f32 %v2536_v60, %v6160_v52  ;;  %v6372_v1 = vadd.f32 %v2658_v10, %v6169_v57  ;;  %v3358_v60 = vshll.u32 %v6365_v12, 16 }
 0x243   : > { %v2722_v43 = vpop.f32.mrf.mxu3 }
 0x244   : > { %v6368_v31 = vadd.f32 %v2722_v43, %v6164_v29  ;;  %v5135_v29 = vld [vmem:[%s5371_s11 + $0x18c] sm:$0xe] }
 0x245   : > { %v2601_v25 = vpop.f32.mrf.mxu1 }
 0x246   : > { %v6377_v52 = vadd.f32 %v2601_v25, %v6172_v58  ;;  %v3360_v58 = vrot.slane %v3358_v60, 1  ;;  %v5052_v25 = vld [vmem:[%s5371_s11 + $0x120] sm:$0xf0]  ;;  %v5056_v60 = vld [vmem:[%s5371_s11 + $0x168] sm:$0xe] }
 0x248   : > { %4752 = vmatmul.msk.bf16.gmra.mxu1 %vm842_vm2, %v3244_v50  ;;  %4802 = vmatmul.msk.bf16.gmra.mxu3 %vm842_vm2, %v3478_v54  ;;  %v3361_v50 = vsel %vm805_vm3, %v3356_v7, %v3360_v58  ;;  %v3599_v54 = vrot.slane %v5133_v61, 1 }
 0x249   : > { %v2539_v57 = vpop.f32.mrf.mxu0  ;;  %v2660_v27 = vpop.f32.mrf.mxu2 }
 0x24a   : > { %v6386_v23 = vadd.f32 %v2539_v57, %v6184_v26  ;;  %v6394_v43 = vadd.f32 %v2660_v27, %v6193_v17  ;;  %v5136_v26 = vor.u32 %v5135_v29, %v6150_v0 }
 0x24b   : > { %v2725_v18 = vpop.f32.mrf.mxu3 }
 0x24c   : > { %v6389_v15 = vadd.f32 %v2725_v18, %v6188_v14  ;;  %4727 = vmatmul.msk.bf16.gmra.mxu0 %vm842_vm2, %v3124_v45  ;;  %v5053_v14 = vld [vmem:[%s5371_s11 + $0x120] sm:$0xe]  ;;  %v3723_v17 = vrot.slane %v5136_v26, 1  ;;  %v3601_v45 = vsel %vm1447_vm4, %v3599_v54, %v3600_v33  ;;  %v3535_v18 = vrot.slane %v6198_v39, 1 }
 0x24d   : > { %v2603_v10 = vpop.f32.mrf.mxu1  ;;  %v5054_v44 = vor.u32 %v5053_v14, %v5052_v25  ;;  %v3662_v26 = vrot.slane %v6210_v19, 1  ;;  %v3602_v19 = vrot.slane %v6227_v6, 1  ;;  %v3537_v6 = vrot.slane %v6248_v40, 1  ;;  %v6808_v40 = vld [vmem:[#allocation5_spill] sm:$0xff] }
 0x24e   : > { %v6398_v55 = vadd.f32 %v2603_v10, %v6201_v47  ;;  %4777 = vmatmul.msk.bf16.gmra.mxu2 %vm842_vm2, %v3361_v50  ;;  %v5055_v47 = vld [vmem:[%s5371_s11 + $0x168] sm:$0xf0]  ;;  %v3725_v58 = vsel %vm1447_vm4, %v3723_v17, %v3724_v42  ;;  %v3726_v17 = vrot.slane %v6231_v3, 1 }
 0x24f   : > { %v3534_v49 = vrot.slane %v5054_v44, 1  ;;  %v5057_v27 = vor.u32 %v5056_v60, %v5055_v47  ;;  %v3603_v60 = vsel %vm1447_vm4, %v3600_v33, %v3602_v19 }
 0x251   : > { %v2541_v28 = vpop.f32.mrf.mxu0  ;;  %v2663_v29 = vpop.f32.mrf.mxu2  ;;  %v3536_v61 = vsel %vm1447_vm4, %v3534_v49, %v3535_v18  ;;  %v3661_v10 = vrot.slane %v5057_v27, 1 }
 0x252   : > { %v6407_v38 = vadd.f32 %v2541_v28, %v6207_v30  ;;  %v6416_v34 = vadd.f32 %v2663_v29, %v6217_v2  ;;  %v3727_v29 = vsel %vm1447_vm4, %v3724_v42, %v3726_v17  ;;  %v6807_v42 = vld [vmem:[#allocation4_spill] sm:$0xff] }
 0x253   : > { %v2727_v0 = vpop.f32.mrf.mxu3 }
 0x254   : > { %v6412_v57 = vadd.f32 %v2727_v0, %v6213_v13 }
 0x255   : > { %v2871_v7 = vpop.f32.mrf.mxu1 }
 0x256   : > { %v6421_v30 = vadd.f32 %v2871_v7, %v6221_v53  ;;  %v3664_v7 = vrot.slane %v6261_v11, 1  ;;  %v3604_v11 = vrot.slane %v6279_v48, 1  ;;  %v3539_v48 = vrot.slane %v6300_v36, 1 }
 0x258   : > { %4810 = vmatmul.msk.bf16.vlgmr.msra.gmra.mxu1 %vm842_vm2, %v3601_v45  ;;  %4820 = vmatmul.msk.bf16.vlgmr.msra.gmra.mxu3 %vm842_vm2, %v3725_v58  ;;  %v6806_v45 = vld [vmem:[#allocation3_spill] sm:$0xff] }
 0x259   : > { %v2793_v13 = vpop.f32.mrf.mxu0  ;;  %v2665_v25 = vpop.f32.mrf.mxu2 }
 0x25a   : > { %v6427_v2 = vadd.f32 %v2793_v13, %v6234_v41  ;;  %v6435_v53 = vadd.f32 %v2665_v25, %v6243_v4  ;;  %v3663_v41 = vsel %vm1447_vm4, %v3661_v10, %v3662_v26  ;;  %v6809_v13 = vld [vmem:[#allocation6_spill] sm:$0xff]  ;;  %v6810_v25 = vld [vmem:[#allocation7_spill] sm:$0xff] }
 0x25b   : > { %v3027_v50 = vpop.f32.mrf.mxu3 }
 0x25c   : > { %v6431_v39 = vadd.f32 %v3027_v50, %v6237_v46  ;;  %4805 = vmatmul.msk.bf16.vlgmr.msra.gmra.mxu0 %vm842_vm2, %v3536_v61  ;;  %v3728_v50 = vrot.slane %v6282_v35, 1 }
 0x25d   : > { %v2873_v14 = vpop.f32.mrf.mxu1 }
 0x25e   : > { %v6438_v54 = vadd.f32 %v2873_v14, %v6251_v16  ;;  %4815 = vmatmul.msk.bf16.vlgmr.msra.gmra.mxu2 %vm842_vm2, %v3663_v41 }
 0x261   : > { %v2795_v28 = vpop.f32.mrf.mxu0  ;;  %v2949_v0 = vpop.f32.mrf.mxu2 }
 0x262   : > { %v6445_v46 = vadd.f32 %v2795_v28, %v6258_v5  ;;  %v6451_v16 = vadd.f32 %v2949_v0, %v6268_v32 }
 0x263   : > { %v3029_v44 = vpop.f32.mrf.mxu3 }
 0x264   : > { %v6448_v4 = vadd.f32 %v3029_v44, %v6264_v8  ;;  %v3538_v8 = vsel %vm1447_vm4, %v3535_v18, %v3537_v6  ;;  %v3665_v18 = vsel %vm1447_vm4, %v3662_v26, %v3664_v7  ;;  %v3605_v26 = vsel %vm1447_vm4, %v3602_v19, %v3604_v11 }
 0x265   : > { %v2876_v47 = vpop.f32.mrf.mxu1 }
 0x266   : > { %v6457_v3 = vadd.f32 %v2876_v47, %v6272_v62 }
 0x268   : > { %4811 = vmatmul.msk.bf16.gmra.mxu1 %vm842_vm2, %v3603_v60  ;;  %4821 = vmatmul.msk.bf16.gmra.mxu3 %vm842_vm2, %v3727_v29  ;;  %v3729_v60 = vsel %vm1447_vm4, %v3726_v17, %v3728_v50 }
 0x269   : > { %v2798_v5 = vpop.f32.mrf.mxu0  ;;  %v2951_v58 = vpop.f32.mrf.mxu2 }
 0x26a   : > { %v6463_v32 = vadd.f32 %v2798_v5, %v6806_v45  ;;  %v6471_v62 = vadd.f32 %v2951_v58, %v6808_v40  ;;  %v3666_v5 = vrot.slane %v6314_v59, 1  ;;  %v6811_v59 = vld [vmem:[#allocation8_spill] sm:$0xff]  ;;  %v6812_v58 = vld [vmem:[#allocation10_spill] sm:$0xff] }
 0x26b   : > { %v3032_v33 = vpop.f32.mrf.mxu3 }
 0x26c   : > { %v6467_v49 = vadd.f32 %v3032_v33, %v6807_v42  ;;  %4806 = vmatmul.msk.bf16.gmra.mxu0 %vm842_vm2, %v3538_v8  ;;  %v3606_v33 = vrot.slane %v6811_v59, 1  ;;  %v3730_v42 = vrot.slane %v6812_v58, 1 }
 0x26d   : > { %v2878_v27 = vpop.f32.mrf.mxu1 }
 0x26e   : > { %v6474_v61 = vadd.f32 %v2878_v27, %v6809_v13  ;;  %4816 = vmatmul.msk.bf16.gmra.mxu2 %vm842_vm2, %v3665_v18  ;;  %v3731_v18 = vsel %vm1447_vm4, %v3728_v50, %v3730_v42 }
 0x271   : > { %v2800_v10 = vpop.f32.mrf.mxu0  ;;  %v2954_v28 = vpop.f32.mrf.mxu2 }
 0x272   : > { %v6481_v14 = vadd.f32 %v2800_v10, %v6810_v25  ;;  %v6487_v0 = vadd.f32 %v2954_v28, %v6323_v51  ;;  %v3541_v10 = vrot.slane %v6353_v21, 1 }
 0x273   : > { %v3034_v41 = vpop.f32.mrf.mxu3 }
 0x274   : > { %v6484_v44 = vadd.f32 %v3034_v41, %v6318_v63  ;;  %v3540_v63 = vsel %vm1447_vm4, %v3537_v6, %v3539_v48  ;;  %v3667_v6 = vsel %vm1447_vm4, %v3664_v7, %v3666_v5  ;;  %v3607_v7 = vsel %vm1447_vm4, %v3604_v11, %v3606_v33 }
 0x275   : > { %v2881_v47 = vpop.f32.mrf.mxu1 }
 0x276   : > { %v6493_v35 = vadd.f32 %v2881_v47, %v6326_v20 }
 0x278   : > { %4812 = vmatmul.msk.bf16.gmra.mxu1 %vm842_vm2, %v3605_v26  ;;  %4822 = vmatmul.msk.bf16.gmra.mxu3 %vm842_vm2, %v3729_v60 }
 0x279   : > { %v2803_v29 = vpop.f32.mrf.mxu0  ;;  %v2956_v8 = vpop.f32.mrf.mxu2 }
 0x27a   : > { %v6499_v51 = vadd.f32 %v2803_v29, %v6339_v37  ;;  %v6507_v20 = vadd.f32 %v2956_v8, %v6349_v24 }
 0x27b   : > { %v3037_v19 = vpop.f32.mrf.mxu3 }
 0x27c   : > { %v6503_v17 = vadd.f32 %v3037_v19, %v6343_v9  ;;  %4807 = vmatmul.msk.bf16.gmra.mxu0 %vm842_vm2, %v3540_v63 }
 0x27d   : > { %v2883_v36 = vpop.f32.mrf.mxu1 }
 0x27e   : > { %v6510_v45 = vadd.f32 %v2883_v36, %v6356_v22  ;;  %4817 = vmatmul.msk.bf16.gmra.mxu2 %vm842_vm2, %v3667_v6 }
 0x281   : > { %v2805_v37 = vpop.f32.mrf.mxu0  ;;  %v2959_v27 = vpop.f32.mrf.mxu2 }
 0x282   : > { %v6517_v9 = vadd.f32 %v2805_v37, %v6363_v56  ;;  %v6523_v22 = vadd.f32 %v2959_v27, %v6372_v1  ;;  %v3668_v1 = vrot.slane %v6365_v12, 1 }
 0x283   : > { %v3039_v40 = vpop.f32.mrf.mxu3 }
 0x284   : > { %v6520_v24 = vadd.f32 %v3039_v40, %v6368_v31  ;;  %v3542_v31 = vsel %vm1447_vm4, %v3539_v48, %v3541_v10  ;;  %v3669_v26 = vsel %vm1447_vm4, %v3666_v5, %v3668_v1 }
 0x285   : > { %v2886_v13 = vpop.f32.mrf.mxu1 }
 0x286   : > { %v2897_v25 = vadd.f32 %v2886_v13, %v6377_v52 }
 0x288   : > { %4813 = vmatmul.msk.bf16.gmra.mxu1 %vm842_vm2, %v3607_v7  ;;  %4823 = vmatmul.msk.bf16.gmra.mxu3 %vm842_vm2, %v3731_v18 }
 0x289   : > { %v2808_v56 = vpop.f32.mrf.mxu0  ;;  %v2961_v47 = vpop.f32.mrf.mxu2 }
 0x28a   : > { %v2819_v41 = vadd.f32 %v2808_v56, %v6386_v23  ;;  %v6537_v21 = vadd.f32 %v2961_v47, %v6394_v43 }
 0x28b   : > { %v3042_v28 = vpop.f32.mrf.mxu3 }
 0x28c   : > { %v3053_v11 = vadd.f32 %v3042_v28, %v6389_v15  ;;  %4808 = vmatmul.msk.bf16.gmra.mxu0 %vm842_vm2, %v3542_v31 }
 0x28d   : > { %v2888_v52 = vpop.f32.mrf.mxu1 }
 0x28e   : > { %v2898_v50 = vadd.f32 %v2888_v52, %v6398_v55  ;;  %4818 = vmatmul.msk.bf16.gmra.mxu2 %vm842_vm2, %v3669_v26 }
 0x291   : > { %v2810_v60 = vpop.f32.mrf.mxu0  ;;  %v2964_v48 = vpop.f32.mrf.mxu2 }
 0x292   : > { %v6543_v23 = vadd.f32 %v2810_v60, %v6407_v38  ;;  %v2975_v29 = vadd.f32 %v2964_v48, %v6416_v34 }
 0x293   : > { %v3044_v12 = vpop.f32.mrf.mxu3 }
 0x294   : > { %v3054_v15 = vadd.f32 %v3044_v12, %v6412_v57 }
 0x295   : > { %v3266_v63 = vpop.f32.mrf.mxu1 }
 0x296   : > { %v3286_v43 = vadd.f32 %v3266_v63, %v6421_v30 }
 0x299   : > { %v3149_v19 = vpop.f32.mrf.mxu0  ;;  %v2966_v5 = vpop.f32.mrf.mxu2 }
 0x29a   : > { %v3169_v55 = vadd.f32 %v3149_v19, %v6427_v2  ;;  %v6551_v6 = vadd.f32 %v2966_v5, %v6435_v53 }
 0x29b   : > { %v3500_v8 = vpop.f32.mrf.mxu3 }
 0x29c   : > { %v3520_v36 = vadd.f32 %v3500_v8, %v6431_v39 }
 0x29d   : > { %v3268_v38 = vpop.f32.mrf.mxu1 }
 0x2a1   : > { %v6553_v37 = vpop.f32.mrf.mxu0  ;;  %v3383_v57 = vpop.f32.mrf.mxu2 }
 0x2a2   : > { %v6558_v34 = vadd.f32 %v3383_v57, %v6451_v16 }
 0x2a3   : > { %v6555_v59 = vpop.f32.mrf.mxu3 }
 0x2a5   : > { %v3271_v30 = vpop.f32.mrf.mxu1 }
 0x2a6   : > { %v6561_v33 = vadd.f32 %v3271_v30, %v6457_v3 }
 0x2a9   : > { %v3154_v2 = vpop.f32.mrf.mxu0  ;;  %v6566_v53 = vpop.f32.mrf.mxu2 }
 0x2aa   : > { %v6564_v58 = vadd.f32 %v3154_v2, %v6463_v32 }
 0x2ab   : > { %v3505_v39 = vpop.f32.mrf.mxu3 }
 0x2ac   : > { %v6569_v42 = vadd.f32 %v3505_v39, %v6467_v49 }
 0x2ad   : > { %v6571_v40 = vpop.f32.mrf.mxu1 }
 0x2b1   : > { %v6573_v27 = vpop.f32.mrf.mxu0  ;;  %v3388_v13 = vpop.f32.mrf.mxu2 }
 0x2b2   : > { %v6579_v3 = vadd.f32 %v3388_v13, %v6487_v0 }
 0x2b3   : > { %v3507_v16 = vpop.f32.mrf.mxu3 }
 0x2b4   : > { %v6576_v7 = vadd.f32 %v3507_v16, %v6484_v44 }
 0x2b5   : > { %v3276_v32 = vpop.f32.mrf.mxu1 }
 0x2b6   : > { %v6582_v18 = vadd.f32 %v3276_v32, %v6493_v35 }
 0x2b9   : > { %v3159_v10 = vpop.f32.mrf.mxu0  ;;  %v6587_v31 = vpop.f32.mrf.mxu2 }
 0x2ba   : > { %v6585_v49 = vadd.f32 %v3159_v10, %v6499_v51 }
 0x2bb   : > { %v3510_v56 = vpop.f32.mrf.mxu3 }
 0x2bc   : > { %v6590_v1 = vadd.f32 %v3510_v56, %v6503_v17 }
 0x2bd   : > { %v6592_v28 = vpop.f32.mrf.mxu1 }
 0x2c1   : > { %v6594_v44 = vpop.f32.mrf.mxu0  ;;  %v3393_v47 = vpop.f32.mrf.mxu2 }
 0x2c2   : > { %v6600_v35 = vadd.f32 %v3393_v47, %v6523_v22 }
 0x2c3   : > { %v3512_v0 = vpop.f32.mrf.mxu3 }
 0x2c4   : > { %v6597_v52 = vadd.f32 %v3512_v0, %v6520_v24 }
 0x2c5   : > { %v3281_v51 = vpop.f32.mrf.mxu1 }
 0x2c6   : > { %v6602_v26 = vadd.f32 %v3281_v51, %v2897_v25 }
 0x2c9   : > { %v3164_v60 = vpop.f32.mrf.mxu0  ;;  %v6606_v48 = vpop.f32.mrf.mxu2 }
 0x2ca   : > { %v6604_v12 = vadd.f32 %v3164_v60, %v2819_v41  ;;  %v6621_v41 = vld [vmem:[%s6777_s2] ss:$0 sm:$0xff] }
 0x2cb   : > { %v3515_v17 = vpop.f32.mrf.mxu3 }
 0x2cc   : > { %v6608_v63 = vadd.f32 %v3515_v17, %v3053_v11 }
 0x2cd   : > { %v3283_v19 = vpop.f32.mrf.mxu1 }
 0x2ce   : > { %v6610_v8 = vadd.f32 %v3283_v19, %v2898_v50  ;;  %v6627_v50 = vld [vmem:[%s6778_s3] ss:$0 sm:$0xff] }
 0x2d1   : > { %v6612_v24 = vpop.f32.mrf.mxu0  ;;  %v3398_v22 = vpop.f32.mrf.mxu2 }
 0x2d2   : > { %v6616_v25 = vadd.f32 %v3398_v22, %v2975_v29  ;;  %v3287_v29 = vadd.f32 %v3268_v38, %v6438_v54  ;;  %v3521_v54 = vadd.f32 %v6555_v59, %v6448_v4 }
 0x2d3   : > { %v3517_v5 = vpop.f32.mrf.mxu3 }
 0x2d4   : > { %v6614_v57 = vadd.f32 %v3517_v5, %v3054_v15 }
 0x2d5   : > { %v3629_v30 = vpop.f32.mrf.mxu1 }
 0x2d6   : > { %v3649_v2 = vadd.f32 %v3629_v30, %v3286_v43 }
 0x2d8   : > { %v3843_v39 = vmul.f32 %v6621_v41, %v3649_v2 }
 0x2d9   : > { %v3567_v11 = vpop.f32.mrf.mxu0  ;;  %v6631_v43 = vpop.f32.mrf.mxu2 }
 0x2da   : > { %v3587_v15 = vadd.f32 %v3567_v11, %v3169_v55  ;;  %v3851_v10 = vadd.f32 %v6627_v50, %v3843_v39  ;;  %v3170_v55 = vadd.f32 %v6553_v37, %v6445_v46 }
 0x2db   : > { %v3753_v16 = vpop.f32.mrf.mxu3 }
 0x2dc   : > { %v3773_v13 = vadd.f32 %v3753_v16, %v3520_v36  ;;  %v3784_v0 = vmul.f32 %v6621_v41, %v3587_v15  ;;  %v3867_v38 = vmul.f32 0.01, %v3851_v10  ;;  %vm3859_vm5 = vcmp.gt.f32.partialorder %v3851_v10, 0.0 }
 0x2dd   : > { %v3631_v32 = vpop.f32.mrf.mxu1 }
 0x2de   : > { %v3650_v56 = vadd.f32 %v3631_v32, %v3287_v29  ;;  %v3957_v47 = vmul.f32 %v6621_v41, %v3773_v13  ;;  %v3795_v17 = vadd.f32 %v6627_v50, %v3784_v0  ;;  %v3875_v59 = vsel %vm3859_vm5, %v3851_v10, %v3867_v38 }
 0x2e0   : > { %v3844_v51 = vmul.f32 %v6621_v41, %v3650_v56  ;;  %v3965_v22 = vadd.f32 %v6627_v50, %v3957_v47  ;;  %v3811_v29 = vmul.f32 0.01, %v3795_v17  ;;  %vm3803_vm7 = vcmp.gt.f32.partialorder %v3795_v17, 0.0 }
 0x2e1   : > { %v3569_v60 = vpop.f32.mrf.mxu0  ;;  %v3691_v2 = vpop.f32.mrf.mxu2 }
 0x2e2   : > { %v3852_v36 = vadd.f32 %v6627_v50, %v3844_v51  ;;  %v3588_v19 = vadd.f32 %v3569_v60, %v3170_v55  ;;  %v3711_v37 = vadd.f32 %v3691_v2, %v6558_v34  ;;  %v3981_v34 = vmul.f32 0.01, %v3965_v22 }
 0x2e3   : > { %v3755_v5 = vpop.f32.mrf.mxu3  ;;  %vm3973_vm8 = vcmp.gt.f32.partialorder %v3965_v22, 0.0 }
 0x2e4   : > { %vm3860_vm6 = vcmp.gt.f32.partialorder %v3852_v36, 0.0  ;;  %v3868_v30 = vmul.f32 0.01, %v3852_v36  ;;  %v3774_v11 = vadd.f32 %v3755_v5, %v3521_v54  ;;  %v3785_v46 = vmul.f32 %v6621_v41, %v3588_v19 }
 0x2e5   : > { %v3634_v4 = vpop.f32.mrf.mxu1  ;;  %v3900_v56 = vmul.f32 %v6621_v41, %v3711_v37  ;;  %v3819_v54 = vsel %vm3803_vm7, %v3795_v17, %v3811_v29  ;;  %v3989_v2 = vsel %vm3973_vm8, %v3965_v22, %v3981_v34 }
 0x2e6   : > { %v3876_v39 = vsel %vm3860_vm6, %v3852_v36, %v3868_v30  ;;  %v3958_v15 = vmul.f32 %v6621_v41, %v3774_v11  ;;  %v3651_v16 = vadd.f32 %v3634_v4, %v6561_v33  ;;  %v3796_v32 = vadd.f32 %v6627_v50, %v3785_v46 }
 0x2e7   : > { %v4978_v13 = vpack.c.bf16 %v3876_v39, %v3875_v59  ;;  %v3404_v33 = vadd.f32 %v6566_v53, %v6471_v62  ;;  %v3908_v36 = vadd.f32 %v6627_v50, %v3900_v56  ;;  %v3289_v30 = vadd.f32 %v6571_v40, %v6474_v61 }
 0x2e8   : > { %v3966_v10 = vadd.f32 %v6627_v50, %v3958_v15  ;;  %v3845_v0 = vmul.f32 %v6621_v41, %v3651_v16  ;;  %vm3804_vm9 = vcmp.gt.f32.partialorder %v3796_v32, 0.0  ;;  %v3812_v47 = vmul.f32 0.01, %v3796_v32 }
 0x2e9   : > { %5061 = vst [vmem:[%s6649_s13 + $0x20] sm:$0xff] %v4978_v13   ;;  %v3572_v51 = vpop.f32.mrf.mxu0  ;;  %v3693_v62 = vpop.f32.mrf.mxu2  ;;  %v3172_v39 = vadd.f32 %v6573_v27, %v6481_v14  ;;  %v3924_v15 = vmul.f32 0.01, %v3908_v36  ;;  %vm3916_vm11 = vcmp.gt.f32.partialorder %v3908_v36, 0.0 }
 0x2ea   : > { %vm3974_vm10 = vcmp.gt.f32.partialorder %v3966_v10, 0.0  ;;  %v3982_v55 = vmul.f32 0.01, %v3966_v10  ;;  %v3589_v60 = vadd.f32 %v3572_v51, %v6564_v58  ;;  %v3820_v38 = vsel %vm3804_vm9, %v3796_v32, %v3812_v47 }
 0x2eb   : > { %v3853_v19 = vadd.f32 %v6627_v50, %v3845_v0  ;;  %v3758_v5 = vpop.f32.mrf.mxu3  ;;  %v4958_v11 = vpack.c.bf16 %v3820_v38, %v3819_v54  ;;  %v3712_v4 = vadd.f32 %v3693_v62, %v3404_v33  ;;  %v3932_v14 = vsel %vm3916_vm11, %v3908_v36, %v3924_v15 }
 0x2ec   : > { %v3990_v46 = vsel %vm3974_vm10, %v3966_v10, %v3982_v55  ;;  %v3786_v37 = vmul.f32 %v6621_v41, %v3589_v60  ;;  %v3775_v17 = vadd.f32 %v3758_v5, %v6569_v42 }
 0x2ed   : > { %v5018_v53 = vpack.c.bf16 %v3990_v46, %v3989_v2  ;;  %v3636_v58 = vpop.f32.mrf.mxu1  ;;  %4959 = vst [vmem:[%s6649_s13] sm:$0xff] %v4958_v11   ;;  %v3869_v16 = vmul.f32 0.01, %v3853_v19  ;;  %v3901_v61 = vmul.f32 %v6621_v41, %v3712_v4  ;;  %vm3861_vm12 = vcmp.gt.f32.partialorder %v3853_v19, 0.0 }
 0x2ee   : > { %v3652_v59 = vadd.f32 %v3636_v58, %v3289_v30  ;;  %v3797_v40 = vadd.f32 %v6627_v50, %v3786_v37  ;;  %v3959_v42 = vmul.f32 %v6621_v41, %v3775_v17 }
 0x2ef   : > { %5069 = vst [vmem:[%s6649_s13 + $0x60] sm:$0xff] %v5018_v53   ;;  %v3909_v29 = vadd.f32 %v6627_v50, %v3901_v61  ;;  %v3877_v27 = vsel %vm3861_vm12, %v3853_v19, %v3869_v16 }
 0x2f0   : > { %v3846_v22 = vmul.f32 %v6621_v41, %v3652_v59  ;;  %vm3805_vm14 = vcmp.gt.f32.partialorder %v3797_v40, 0.0  ;;  %v3813_v0 = vmul.f32 0.01, %v3797_v40  ;;  %v3967_v19 = vadd.f32 %v6627_v50, %v3959_v42 }
 0x2f1   : > { %v3574_v13 = vpop.f32.mrf.mxu0  ;;  %vm3917_vm13 = vcmp.gt.f32.partialorder %v3909_v29, 0.0  ;;  %v3925_v34 = vmul.f32 0.01, %v3909_v29  ;;  %v3696_v51 = vpop.f32.mrf.mxu2 }
 0x2f2   : > { %v3854_v32 = vadd.f32 %v6627_v50, %v3846_v22  ;;  %v3590_v56 = vadd.f32 %v3574_v13, %v3172_v39  ;;  %v3713_v60 = vadd.f32 %v3696_v51, %v6579_v3  ;;  %vm3975_vm1 = vcmp.gt.f32.partialorder %v3967_v19, 0.0 }
 0x2f3   : > { %v3760_v10 = vpop.f32.mrf.mxu3  ;;  %v3933_v33 = vsel %vm3917_vm13, %v3909_v29, %v3925_v34  ;;  %v3983_v58 = vmul.f32 0.01, %v3967_v19 }
 0x2f4   : > { %vm3862_vm15 = vcmp.gt.f32.partialorder %v3854_v32, 0.0  ;;  %v3870_v47 = vmul.f32 0.01, %v3854_v32  ;;  %v3787_v55 = vmul.f32 %v6621_v41, %v3590_v56  ;;  %v3776_v54 = vadd.f32 %v3760_v10, %v6576_v7 }
 0x2f5   : > { %v3639_v38 = vpop.f32.mrf.mxu1  ;;  %v4998_v36 = vpack.c.bf16 %v3933_v33, %v3932_v14  ;;  %v3902_v46 = vmul.f32 %v6621_v41, %v3713_v60  ;;  %v3406_v7 = vadd.f32 %v6587_v31, %v6507_v20  ;;  %v3291_v31 = vadd.f32 %v6592_v28, %v6510_v45 }
 0x2f6   : > { %v3878_v5 = vsel %vm3862_vm15, %v3854_v32, %v3870_v47  ;;  %v3653_v30 = vadd.f32 %v3639_v38, %v6582_v18  ;;  %v3798_v11 = vadd.f32 %v6627_v50, %v3787_v55  ;;  %v3960_v62 = vmul.f32 %v6621_v41, %v3776_v54 }
 0x2f7   : > { %v4983_v2 = vpack.c.bf16 %v3878_v5, %v3877_v27  ;;  %5065 = vst [vmem:[%s6649_s13 + $0x40] sm:$0xff] %v4998_v36   ;;  %v3821_v18 = vsel %vm3805_vm14, %v3797_v40, %v3813_v0  ;;  %v3910_v39 = vadd.f32 %v6627_v50, %v3902_v46  ;;  %v3174_v40 = vadd.f32 %v6594_v44, %v6517_v9 }
 0x2f8   : > { %v3847_v53 = vmul.f32 %v6621_v41, %v3653_v30  ;;  %vm3806_vm0 = vcmp.gt.f32.partialorder %v3798_v11, 0.0  ;;  %v3814_v3 = vmul.f32 0.01, %v3798_v11  ;;  %v3968_v37 = vadd.f32 %v6627_v50, %v3960_v62 }
 0x2f9   : > { %5062 = vst [vmem:[%s6649_s13 + $0x28] sm:$0xff] %v4983_v2   ;;  %v3577_v4 = vpop.f32.mrf.mxu0  ;;  %v3698_v22 = vpop.f32.mrf.mxu2  ;;  %v3991_v42 = vsel %vm3975_vm1, %v3967_v19, %v3983_v58  ;;  %v3926_v27 = vmul.f32 0.01, %v3910_v39  ;;  %vm3918_vm3 = vcmp.gt.f32.partialorder %v3910_v39, 0.0 }
 0x2fa   : > { %v3591_v17 = vadd.f32 %v3577_v4, %v6585_v49  ;;  %v3822_v59 = vsel %vm3806_vm0, %v3798_v11, %v3814_v3  ;;  %vm3976_vm2 = vcmp.gt.f32.partialorder %v3968_v37, 0.0  ;;  %v3855_v15 = vadd.f32 %v6627_v50, %v3847_v53 }
 0x2fb   : > { %v3763_v20 = vpop.f32.mrf.mxu3  ;;  %v4963_v16 = vpack.c.bf16 %v3822_v59, %v3821_v18  ;;  %v3984_v61 = vmul.f32 0.01, %v3968_v37  ;;  %v3714_v49 = vadd.f32 %v3698_v22, %v3406_v7  ;;  %v3934_v33 = vsel %vm3918_vm3, %v3910_v39, %v3926_v27 }
 0x2fc   : > { %v3788_v29 = vmul.f32 %v6621_v41, %v3591_v17  ;;  %v3777_v56 = vadd.f32 %v3763_v20, %v6590_v1  ;;  %v3871_v28 = vmul.f32 0.01, %v3855_v15  ;;  %vm3863_vm4 = vcmp.gt.f32.partialorder %v3855_v15, 0.0 }
 0x2fd   : > { %v3641_v13 = vpop.f32.mrf.mxu1  ;;  %5058 = vst [vmem:[%s6649_s13 + $0x8] sm:$0xff] %v4963_v16   ;;  %v3992_v32 = vsel %vm3976_vm2, %v3968_v37, %v3984_v61  ;;  %v3903_v34 = vmul.f32 %v6621_v41, %v3714_v49 }
 0x2fe   : > { %v3654_v14 = vadd.f32 %v3641_v13, %v3291_v31  ;;  %v5023_v45 = vpack.c.bf16 %v3992_v32, %v3991_v42  ;;  %v3799_v9 = vadd.f32 %v6627_v50, %v3788_v29  ;;  %v3961_v47 = vmul.f32 %v6621_v41, %v3777_v56 }
 0x2ff   : > { %v3911_v10 = vadd.f32 %v6627_v50, %v3903_v34  ;;  %v3879_v55 = vsel %vm3863_vm4, %v3855_v15, %v3871_v28  ;;  %v3176_v28 = vadd.f32 %v6612_v24, %v6543_v23 }
 0x300   : > { %v3848_v44 = vmul.f32 %v6621_v41, %v3654_v14  ;;  %5070 = vst [vmem:[%s6649_s13 + $0x68] sm:$0xff] %v5023_v45   ;;  %vm3807_vm6 = vcmp.gt.f32.partialorder %v3799_v9, 0.0  ;;  %v3815_v5 = vmul.f32 0.01, %v3799_v9  ;;  %v3969_v53 = vadd.f32 %v6627_v50, %v3961_v47 }
 0x301   : > { %v3579_v0 = vpop.f32.mrf.mxu0  ;;  %vm3919_vm5 = vcmp.gt.f32.partialorder %v3911_v10, 0.0  ;;  %v3927_v60 = vmul.f32 0.01, %v3911_v10  ;;  %v3701_v19 = vpop.f32.mrf.mxu2 }
 0x302   : > { %v3856_v1 = vadd.f32 %v6627_v50, %v3848_v44  ;;  %v3592_v51 = vadd.f32 %v3579_v0, %v3174_v40  ;;  %v3715_v2 = vadd.f32 %v3701_v19, %v6600_v35  ;;  %v3823_v17 = vsel %vm3807_vm6, %v3799_v9, %v3815_v5 }
 0x303   : > { %v3765_v54 = vpop.f32.mrf.mxu3  ;;  %v3935_v30 = vsel %vm3919_vm5, %v3911_v10, %v3927_v60  ;;  %v3985_v15 = vmul.f32 0.01, %v3969_v53  ;;  %vm3977_vm9 = vcmp.gt.f32.partialorder %v3969_v53, 0.0 }
 0x304   : > { %vm3864_vm7 = vcmp.gt.f32.partialorder %v3856_v1, 0.0  ;;  %v3872_v38 = vmul.f32 0.01, %v3856_v1  ;;  %v3789_v36 = vmul.f32 %v6621_v41, %v3592_v51  ;;  %v3778_v11 = vadd.f32 %v3765_v54, %v6597_v52 }
 0x305   : > { %v3644_v46 = vpop.f32.mrf.mxu1  ;;  %v5003_v62 = vpack.c.bf16 %v3935_v30, %v3934_v33  ;;  %v3904_v4 = vmul.f32 %v6621_v41, %v3715_v2  ;;  %v3408_v52 = vadd.f32 %v6606_v48, %v6537_v21  ;;  %v3993_v42 = vsel %vm3977_vm9, %v3969_v53, %v3985_v15 }
 0x306   : > { %v3880_v7 = vsel %vm3864_vm7, %v3856_v1, %v3872_v38  ;;  %v3800_v3 = vadd.f32 %v6627_v50, %v3789_v36  ;;  %v3962_v18 = vmul.f32 %v6621_v41, %v3778_v11  ;;  %v3655_v58 = vadd.f32 %v3644_v46, %v6602_v26 }
 0x307   : > { %v4988_v37 = vpack.c.bf16 %v3880_v7, %v3879_v55  ;;  %5066 = vst [vmem:[%s6649_s13 + $0x48] sm:$0xff] %v5003_v62   ;;  %v3912_v31 = vadd.f32 %v6627_v50, %v3904_v4 }
 0x308   : > { %vm3808_vm8 = vcmp.gt.f32.partialorder %v3800_v3, 0.0  ;;  %v3816_v35 = vmul.f32 0.01, %v3800_v3  ;;  %v3970_v59 = vadd.f32 %v6627_v50, %v3962_v18  ;;  %v3849_v61 = vmul.f32 %v6621_v41, %v3655_v58 }
 0x309   : > { %5063 = vst [vmem:[%s6649_s13 + $0x30] sm:$0xff] %v4988_v37   ;;  %v3582_v39 = vpop.f32.mrf.mxu0  ;;  %v3703_v48 = vpop.f32.mrf.mxu2  ;;  %v3928_v32 = vmul.f32 0.01, %v3912_v31  ;;  %vm3920_vm11 = vcmp.gt.f32.partialorder %v3912_v31, 0.0  ;;  %v3410_v18 = vadd.f32 %v6631_v43, %v6551_v6 }
 0x30a   : > { %v3824_v20 = vsel %vm3808_vm8, %v3800_v3, %v3816_v35  ;;  %v3593_v16 = vadd.f32 %v3582_v39, %v6604_v12  ;;  %vm3978_vm10 = vcmp.gt.f32.partialorder %v3970_v59, 0.0  ;;  %v3986_v21 = vmul.f32 0.01, %v3970_v59 }
 0x30b   : > { %v4968_v26 = vpack.c.bf16 %v3824_v20, %v3823_v17  ;;  %v3768_v22 = vpop.f32.mrf.mxu3  ;;  %v3716_v29 = vadd.f32 %v3703_v48, %v3408_v52  ;;  %v3857_v14 = vadd.f32 %v6627_v50, %v3849_v61  ;;  %v3936_v47 = vsel %vm3920_vm11, %v3912_v31, %v3928_v32 }
 0x30c   : > { %v3790_v40 = vmul.f32 %v6621_v41, %v3593_v16  ;;  %v3779_v49 = vadd.f32 %v3768_v22, %v6608_v63  ;;  %v3994_v56 = vsel %vm3978_vm10, %v3970_v59, %v3986_v21 }
 0x30d   : > { %5059 = vst [vmem:[%s6649_s13 + $0x10] sm:$0xff] %v4968_v26   ;;  %v3646_v13 = vpop.f32.mrf.mxu1  ;;  %v5028_v12 = vpack.c.bf16 %v3994_v56, %v3993_v42  ;;  %v3905_v27 = vmul.f32 %v6621_v41, %v3716_v29  ;;  %vm3865_vm12 = vcmp.gt.f32.partialorder %v3857_v14, 0.0  ;;  %v3873_v51 = vmul.f32 0.01, %v3857_v14 }
 0x30e   : > { %v3656_v45 = vadd.f32 %v3646_v13, %v6610_v8  ;;  %v3801_v34 = vadd.f32 %v6627_v50, %v3790_v40  ;;  %v3963_v9 = vmul.f32 %v6621_v41, %v3779_v49 }
 0x30f   : > { %5071 = vst [vmem:[%s6649_s13 + $0x70] sm:$0xff] %v5028_v12   ;;  %v3913_v63 = vadd.f32 %v6627_v50, %v3905_v27  ;;  %v3881_v46 = vsel %vm3865_vm12, %v3857_v14, %v3873_v51 }
 0x310   : > { %v3850_v44 = vmul.f32 %v6621_v41, %v3656_v45  ;;  %v3817_v60 = vmul.f32 0.01, %v3801_v34  ;;  %v3971_v38 = vadd.f32 %v6627_v50, %v3963_v9  ;;  %vm3809_vm15 = vcmp.gt.f32.partialorder %v3801_v34, 0.0 }
 0x311   : > { %v3584_v10 = vpop.f32.mrf.mxu0  ;;  %vm3921_vm13 = vcmp.gt.f32.partialorder %v3913_v63, 0.0  ;;  %v3929_v1 = vmul.f32 0.01, %v3913_v63  ;;  %v3706_v33 = vpop.f32.mrf.mxu2 }
 0x312   : > { %v3594_v0 = vadd.f32 %v3584_v10, %v3176_v28  ;;  %v3858_v23 = vadd.f32 %v6627_v50, %v3850_v44  ;;  %v3717_v36 = vadd.f32 %v3706_v33, %v6616_v25  ;;  %v3825_v3 = vsel %vm3809_vm15, %v3801_v34, %v3817_v60 }
 0x313   : > { %v3770_v8 = vpop.f32.mrf.mxu3  ;;  %v3937_v54 = vsel %vm3921_vm13, %v3913_v63, %v3929_v1  ;;  %v3987_v37 = vmul.f32 0.01, %v3971_v38  ;;  %vm3979_vm1 = vcmp.gt.f32.partialorder %v3971_v38, 0.0 }
 0x314   : > { %v3791_v24 = vmul.f32 %v6621_v41, %v3594_v0  ;;  %v3780_v55 = vadd.f32 %v3770_v8, %v6614_v57  ;;  %v5008_v19 = vpack.c.bf16 %v3937_v54, %v3936_v47  ;;  %vm3866_vm14 = vcmp.gt.f32.partialorder %v3858_v23, 0.0 }
 0x315   : > { %v3874_v5 = vmul.f32 0.01, %v3858_v23  ;;  %v3906_v2 = vmul.f32 %v6621_v41, %v3717_v36  ;;  %v3995_v59 = vsel %vm3979_vm1, %v3971_v38, %v3987_v37 }
 0x316   : > { %v3802_v30 = vadd.f32 %v6627_v50, %v3791_v24  ;;  %v3964_v11 = vmul.f32 %v6621_v41, %v3780_v55  ;;  %5067 = vst [vmem:[%s6649_s13 + $0x50] sm:$0xff] %v5008_v19  }
 0x317   : > { %v3882_v57 = vsel %vm3866_vm14, %v3858_v23, %v3874_v5  ;;  %v3914_v25 = vadd.f32 %v6627_v50, %v3906_v2 }
 0x318   : > { %vm3810_vm0 = vcmp.gt.f32.partialorder %v3802_v30, 0.0  ;;  %v3818_v62 = vmul.f32 0.01, %v3802_v30  ;;  %v4993_v53 = vpack.c.bf16 %v3882_v57, %v3881_v46  ;;  %v3972_v7 = vadd.f32 %v6627_v50, %v3964_v11 }
 0x319   : > { %v3708_v52 = vpop.f32.mrf.mxu2  ;;  %v3930_v31 = vmul.f32 0.01, %v3914_v25  ;;  %vm3922_vm3 = vcmp.gt.f32.partialorder %v3914_v25, 0.0 }
 0x31a   : > { %v3826_v4 = vsel %vm3810_vm0, %v3802_v30, %v3818_v62  ;;  %5064 = vst [vmem:[%s6649_s13 + $0x38] sm:$0xff] %v4993_v53   ;;  %vm3980_vm2 = vcmp.gt.f32.partialorder %v3972_v7, 0.0  ;;  %v3988_v35 = vmul.f32 0.01, %v3972_v7  ;;  %v3718_v17 = vadd.f32 %v3708_v52, %v3410_v18 }
 0x31b   : > { %v4973_v58 = vpack.c.bf16 %v3826_v4, %v3825_v3  ;;  %v3938_v43 = vsel %vm3922_vm3, %v3914_v25, %v3930_v31 }
 0x31c   : > { %v3996_v39 = vsel %vm3980_vm2, %v3972_v7, %v3988_v35  ;;  %v3907_v20 = vmul.f32 %v6621_v41, %v3718_v17 }
 0x31d   : > { %5060 = vst [vmem:[%s6649_s13 + $0x18] sm:$0xff] %v4973_v58   ;;  %v5033_v15 = vpack.c.bf16 %v3996_v39, %v3995_v59 }
 0x31e   : > { %v3915_v16 = vadd.f32 %v6627_v50, %v3907_v20 }
 0x31f   : > { %5072 = vst [vmem:[%s6649_s13 + $0x78] sm:$0xff] %v5033_v15  }
 0x320   : > { %vm3923_vm4 = vcmp.gt.f32.partialorder %v3915_v16, 0.0  ;;  %v3931_v6 = vmul.f32 0.01, %v3915_v16 }
 0x322   : > { %v3939_v26 = vsel %vm3923_vm4, %v3915_v16, %v3931_v6 }
 0x323   : > { %v5013_v61 = vpack.c.bf16 %v3939_v26, %v3938_v43 }
 0x325   : > { %5068 = vst [vmem:[%s6649_s13 + $0x58] sm:$0xff] %v5013_v61  }
 0x326 PF: > { %s14_s19 = sadd.s32 1, %s5175_s19   ;;  %s6813_s15 = smov %s5163_s16 }
 0x327   : > { %p11_p10 = scmp.ge.s32.totalorder %s14_s19, 34   ;;  %s6814_s16 = smov %s5238_s23 }
 0x328   : > { %s6815_s17 = smov %s5171_s18  ;;  %s6816_s18 = smov %s6818_s20 }
 0x329   :  { %13 = sbr.rel (!%p11_p10) target bundleno = 3 (0x3), region = 143 }

</bundles_post_ra>
